<compile_context>
chip_gen: v7x
topology: tpu7x:2x2x1
jax: 0.10.0
libtpu: 0.0.40
codegen_flags: <defaults>
</compile_context>

<pallas_src>
import math
import functools

import jax
import jax.numpy as jnp
from jax.experimental import pallas as pl
from jax.experimental.pallas import tpu as pltpu

BN_EPS = 1e-5
LANE = 128                      # TPU lane width; channel dims are padded to this
ACT_DTYPE = jnp.bfloat16        # activation storage dtype (MXU in bf16, accum f32)
TM = 512                        # GEMM row tile (review: raise from 256)
K_FOOTPRINT_BUDGET = 8 * 1024 * 1024   # double-buffered A+W block budget before K-tiling


def _pick_vmem_limit():
    # Per-generation scoped-VMEM budget: v7x has only 64 MiB physical per core,
    # v4/v5/v6 have 128 MiB.  Unknown chips fall back to a conservative 32 MiB.
    try:
        kind = jax.devices()[0].device_kind.lower()
    except Exception:
        kind = ""
    if "v7" in kind or "7x" in kind:
        return 48 * 1024 * 1024
    if any(v in kind for v in ("v4", "v5", "v6")):
        return 96 * 1024 * 1024
    return 32 * 1024 * 1024


VMEM_LIMIT_BYTES = _pick_vmem_limit()


def make_divisible(v, divisor, min_value=None):
    if min_value is None:
        min_value = divisor
    new_v = max(min_value, int(v + divisor / 2) // divisor * divisor)
    if new_v < 0.9 * v:
        new_v += divisor
    return new_v


def pad_lane(c):
    return ((c + LANE - 1) // LANE) * LANE


# ----------------------------- GEMM (1x1 conv / im2col stems / head) --------

def gemm_kernel(*refs, relu, nk, has_res):
    # bf16 x bf16 -> f32 on the MXU; bias / residual / ReLU fused in f32.
    # When nk > 1 a VMEM f32 accumulator is carried across the K grid axis
    # (init at k==0, epilogue at k==nk-1).  Partial M blocks are safe because
    # every accumulator row depends only on its own A row; garbage OOB rows
    # never reach valid output (masked at store).
    a_ref, w_ref, b_ref = refs[0], refs[1], refs[2]
    idx = 3
    r_ref = None
    if has_res:
        r_ref = refs[idx]
        idx += 1
    o_ref = refs[idx]
    idx += 1
    acc_ref = refs[idx] if nk > 1 else None

    part = jnp.dot(a_ref[...], w_ref[...], preferred_element_type=jnp.float32)

    def epilogue(acc):
        out = acc + b_ref[...]
        if has_res:
            out = out + r_ref[...].astype(jnp.float32)
        if relu:
            out = jnp.maximum(out, 0.0)
        o_ref[...] = out.astype(o_ref.dtype)

    if nk == 1:
        epilogue(part)
    else:
        k = pl.program_id(2)

        @pl.when(k == 0)
        def _():
            acc_ref[...] = part

        @pl.when(k > 0)
        def _():
            acc_ref[...] += part

        @pl.when(k == nk - 1)
        def _():
            epilogue(acc_ref[...])


def gemm_bias_act(a, w, bias, residual=None, relu=False, out_dtype=ACT_DTYPE):
    """a: (M, K), w: (K, N) bf16 with BN scale pre-folded, bias: (N,) f32.

    N (and K, by construction of the padded weights) is a multiple of 128 so
    all loads/stores are lane-dense.  M is never padded: the grid uses pl.cdiv
    and Pallas masks the partial last block.  The residual operand is optional
    so non-shortcut layers never stream a zero tensor from HBM.
    """
    a = a.astype(jnp.bfloat16)
    w = w.astype(jnp.bfloat16)
    M, K = a.shape
    N = w.shape[1]
    assert N % LANE == 0, N

    tm = min(TM, M)
    tn = 512 if N % 512 == 0 else (256 if N % 256 == 0 else LANE)
    n_m, n_n = pl.cdiv(M, tm), N // tn
    # v7x has 2 TensorCores sharded over "parallel" axes: make reasonably sized
    # GEMMs expose >= 2 grid steps so both cores get work.
    if n_m * n_n == 1 and M >= 256 and (M // 2) % 8 == 0:
        tm = M // 2
        n_m = 2

    # K-tile only when full-K blocks would stress VMEM (keeps the tiny layers
    # of this net as one fused step; keeps large-channel configs safe on
    # v7x's 64 MiB VMEM without shrinking tm/tn).
    if 2 * 2 * K * (tm + tn) <= K_FOOTPRINT_BUDGET:
        tk = K
    else:
        tk = next((t for t in (512, 256, 128) if K % t == 0), K)
    nk = K // tk

    has_res = residual is not None
    args = [a, w, bias.reshape(1, N).astype(jnp.float32)]
    if has_res:
        args.append(residual)

    if nk == 1:
        grid = (n_m, n_n)
        sem = ("parallel", "parallel")
        a_spec = pl.BlockSpec((tm, K), lambda i, j: (i, 0))
        w_spec = pl.BlockSpec((K, tn), lambda i, j: (0, j))
        b_spec = pl.BlockSpec((1, tn), lambda i, j: (0, j))
        r_spec = pl.BlockSpec((tm, tn), lambda i, j: (i, j))
        o_spec = pl.BlockSpec((tm, tn), lambda i, j: (i, j))
        scratch = []
    else:
        grid = (n_m, n_n, nk)
        sem = ("parallel", "parallel", "arbitrary")
        a_spec = pl.BlockSpec((tm, tk), lambda i, j, k: (i, k))
        w_spec = pl.BlockSpec((tk, tn), lambda i, j, k: (k, j))
        b_spec = pl.BlockSpec((1, tn), lambda i, j, k: (0, j))
        r_spec = pl.BlockSpec((tm, tn), lambda i, j, k: (i, j))
        o_spec = pl.BlockSpec((tm, tn), lambda i, j, k: (i, j))
        scratch = [pltpu.VMEM((tm, tn), jnp.float32)]

    in_specs = [a_spec, w_spec, b_spec] + ([r_spec] if has_res else [])

    return pl.pallas_call(
        functools.partial(gemm_kernel, relu=relu, nk=nk, has_res=has_res),
        out_shape=jax.ShapeDtypeStruct((M, N), out_dtype),
        grid=grid,
        in_specs=in_specs,
        out_specs=o_spec,
        scratch_shapes=scratch,
        compiler_params=pltpu.CompilerParams(
            dimension_semantics=sem,
            vmem_limit_bytes=VMEM_LIMIT_BYTES),
    )(*args)


# ----------------------- depthwise 3x3 / AvgPool kernels --------------------

def dw3x3_s1_kernel(x_ref, w_ref, b_ref, o_ref, scr_ref, *, H, W, TH, relu):
    """Stride-1 depthwise 3x3 (padding=1) with the zero-pad done in VMEM.

    The padded image (f32) is built in a persistent scratch at the first H-tile
    of each batch tile, so: no padded copy of the activation ever hits HBM, the
    bf16->f32 cast happens once per image (not per tap), and only the 3 column
    shifts are loaded (row shifts are cheap value slices).
    """
    nbt = x_ref.shape[0]
    C = x_ref.shape[-1]
    h = pl.program_id(1)

    @pl.when(h == 0)
    def _():
        scr_ref[...] = jnp.zeros_like(scr_ref)             # border zeros
        scr_ref[:, pl.ds(1, H), pl.ds(1, W), :] = x_ref[...].astype(jnp.float32)

    wv = w_ref[...]                                        # (3, 3, C) f32, BN folded
    bv = b_ref[...].reshape(1, 1, 1, C)
    r0 = h * TH
    acc = jnp.zeros((nbt, TH, W, C), jnp.float32)
    for dj in range(3):                                    # <=3 distinct column shifts
        band = scr_ref[:, pl.ds(r0, TH + 2), pl.ds(dj, W), :]
        for di in range(3):                                # row shifts: cheap slices
            acc = acc + band[:, di:di + TH, :, :] * wv[di, dj].reshape(1, 1, 1, C)
    acc = acc + bv
    if relu:
        acc = jnp.maximum(acc, 0.0)
    o_ref[...] = acc.astype(o_ref.dtype)


def dw3x3_s1(x, w, bias, relu):
    Nb, H, W, C = x.shape
    # Group several small images per grid step (amortizes per-step overhead)
    # while keeping >= 2 grid steps for megacore sharding.
    nbt = 1
    img_bytes = H * W * C * 2
    for cand in range(min(Nb, 8), 0, -1):
        if Nb % cand == 0 and Nb // cand >= 2 and cand * img_bytes <= 128 * 1024:
            nbt = cand
            break
    # H-tile for large feature maps (bounds per-step accumulator / output).
    TH = H
    if H > 32:
        for cand in (32, 16, 8):
            if H % cand == 0:
                TH = cand
                break
    n_h = H // TH
    grid = (Nb // nbt, n_h)

    return pl.pallas_call(
        functools.partial(dw3x3_s1_kernel, H=H, W=W, TH=TH, relu=relu),
        out_shape=jax.ShapeDtypeStruct((Nb, H, W, C), x.dtype),
        grid=grid,
        in_specs=[
            pl.BlockSpec((nbt, H, W, C), lambda b, h: (b, 0, 0, 0)),
            pl.BlockSpec((3, 3, C), lambda b, h: (0, 0, 0)),
            pl.BlockSpec((1, C), lambda b, h: (0, 0)),
        ],
        out_specs=pl.BlockSpec((nbt, TH, W, C), lambda b, h: (b, h, 0, 0)),
        scratch_shapes=[pltpu.VMEM((nbt, H + 2, W + 2, C), jnp.float32)],
        compiler_params=pltpu.CompilerParams(
            # h axis must be "arbitrary": the scratch fill at h==0 is reused by
            # later h steps of the same batch tile on the same core.
            dimension_semantics=("parallel", "arbitrary"),
            vmem_limit_bytes=VMEM_LIMIT_BYTES),
    )(x, w.astype(jnp.float32), bias.reshape(1, C).astype(jnp.float32))


def dw3x3_phase_kernel(*args, n_phase, tap_plan, relu):
    # Strided 9-tap depthwise 3x3 (one batch image per grid step).  `tap_plan`
    # maps each tap (di, dj) to (phase view, row offset, col offset) so that
    # strided convs read exactly the Ho x Wo output window through slices.
    phase_refs = args[:n_phase]
    w_ref, b_ref, o_ref = args[n_phase:]
    _, Ho, Wo, C = o_ref.shape
    wv = w_ref[...]                                   # (3, 3, C) f32 (BN folded)
    # Cast hoisted: once per stride-phase instead of once per tap.
    phases = [r[...].astype(jnp.float32) for r in phase_refs]
    acc = jnp.zeros((1, Ho, Wo, C), jnp.float32)
    for (di, dj), (ph, oy, ox) in tap_plan:
        tap = phases[ph][:, oy:oy + Ho, ox:ox + Wo, :]
        acc = acc + tap * wv[di, dj].reshape(1, 1, 1, C)
    acc = acc + b_ref[...].reshape(1, 1, 1, C)
    if relu:
        acc = jnp.maximum(acc, 0.0)
    o_ref[...] = acc.astype(o_ref.dtype)


def dw3x3_strided(x, w, bias, stride, relu):
    """Strided depthwise 3x3, padding=1, fused BN bias + optional ReLU.

    Strides are handled by decomposing the zero-padded input into stride-phase
    views (space-to-depth), so the kernel computes the strided output directly.
    With w = 1/9, bias = 0 this also implements
    AvgPool2d(3, stride, padding=1, count_include_pad=True).
    """
    # TODO(synk): move the zero-pad + phase extraction in-kernel (manual halo
    # DMA from a pl.ANY ref) for the strided case too, as done for stride 1.
    Nb, H, W, C = x.shape
    sh, sw = stride
    xp = jnp.pad(x, ((0, 0), (1, 1), (1, 1), (0, 0)))
    Hp, Wp = H + 2, W + 2
    Ho = (Hp - 3) // sh + 1
    Wo = (Wp - 3) // sw + 1

    phases = [xp[:, p::sh, q::sw, :] for p in range(sh) for q in range(sw)]
    tap_plan = tuple(((di, dj), ((di % sh) * sw + (dj % sw), di // sh, dj // sw))
                     for di in range(3) for dj in range(3))

    in_specs = [pl.BlockSpec((1,) + ph.shape[1:], lambda n: (n, 0, 0, 0))
                for ph in phases]
    in_specs += [
        pl.BlockSpec((3, 3, C), lambda n: (0, 0, 0)),
        pl.BlockSpec((1, C), lambda n: (0, 0)),
    ]
    return pl.pallas_call(
        functools.partial(dw3x3_phase_kernel, n_phase=len(phases),
                          tap_plan=tap_plan, relu=relu),
        out_shape=jax.ShapeDtypeStruct((Nb, Ho, Wo, C), x.dtype),
        grid=(Nb,),
        in_specs=in_specs,
        out_specs=pl.BlockSpec((1, Ho, Wo, C), lambda n: (n, 0, 0, 0)),
        compiler_params=pltpu.CompilerParams(
            dimension_semantics=("parallel",),
            vmem_limit_bytes=VMEM_LIMIT_BYTES),
    )(*phases, w.astype(jnp.float32), bias.reshape(1, C).astype(jnp.float32))


def dw3x3(x, w, bias, stride, relu):
    if tuple(stride) == (1, 1):
        return dw3x3_s1(x, w, bias, relu)
    return dw3x3_strided(x, w, bias, tuple(stride), relu)


def gap_kernel(x_ref, o_ref):
    # AdaptiveAvgPool2d((1, 1)): mean over the flattened spatial axis, in f32.
    o_ref[...] = jnp.mean(x_ref[...].astype(jnp.float32), axis=1, keepdims=True)


def global_avg_pool(x):
    Nb, H, W, C = x.shape
    out = pl.pallas_call(
        gap_kernel,
        out_shape=jax.ShapeDtypeStruct((Nb, 1, C), jnp.float32),
        grid=(Nb,),
        in_specs=[pl.BlockSpec((1, H * W, C), lambda n: (n, 0, 0))],
        out_specs=pl.BlockSpec((1, 1, C), lambda n: (n, 0, 0)),
        compiler_params=pltpu.CompilerParams(
            dimension_semantics=("parallel",),
            vmem_limit_bytes=VMEM_LIMIT_BYTES),
    )(x.reshape(Nb, H * W, C))
    return out.reshape(Nb, C)


# ------------------------------ conv wrappers -------------------------------

def im2col3x3(x, stride):
    # XLA-level im2col; used only for the two tiny 3x3 stems.  The K dim is
    # zero-padded to a multiple of 128 so the GEMM's A blocks are lane-dense.
    # TODO(synk): replace with an in-kernel 9-shifted-dot over halo'd blocks so
    # the patch tensor never round-trips HBM (acceptable for stems only).
    Nb, H, W, C = x.shape
    sh, sw = stride
    xp = jnp.pad(x, ((0, 0), (1, 1), (1, 1), (0, 0)))
    Ho = (H + 2 - 3) // sh + 1
    Wo = (W + 2 - 3) // sw + 1
    cols = []
    for di in range(3):
        for dj in range(3):
            cols.append(xp[:, di:di + (Ho - 1) * sh + 1:sh,
                           dj:dj + (Wo - 1) * sw + 1:sw, :])
    patches = jnp.concatenate(cols, axis=-1)            # (Nb, Ho, Wo, 9*C)
    patches = patches.reshape(Nb * Ho * Wo, 9 * C)
    kp = pad_lane(9 * C)
    if kp != 9 * C:
        patches = jnp.pad(patches, ((0, 0), (0, kp - 9 * C)))
    return patches, (Nb, Ho, Wo)


def conv3x3_bn(x, w, bias, stride, relu):
    patches, (Nb, Ho, Wo) = im2col3x3(x, stride)
    assert patches.shape[1] == w.shape[0], (patches.shape, w.shape)
    out = gemm_bias_act(patches, w, bias, relu=relu)
    return out.reshape(Nb, Ho, Wo, w.shape[1])


def conv1x1_bn(x, w, bias, relu, residual=None, out_dtype=ACT_DTYPE):
    Nb, H, W, C = x.shape
    N = w.shape[1]
    res = None if residual is None else residual.reshape(Nb * H * W, N)
    out = gemm_bias_act(x.reshape(Nb * H * W, C), w, bias,
                        residual=res, relu=relu, out_dtype=out_dtype)
    return out.reshape(Nb, H, W, N)


# ------------------------------ network ------------------------------------

def kaiming(key, shape, fan_out):
    return math.sqrt(2.0 / fan_out) * jax.random.normal(key, shape, jnp.float32)


def build_params(config, key):
    """Weights built at logical sizes, BN (inference mode, fresh running stats:
    scale = 1/sqrt(1+eps), shift = 0) folded into the conv weights, channel
    dims zero-padded to a multiple of 128 so every layer is lane-dense.
    Padded channels stay exactly zero through the whole net."""
    n_classes = config['n_classes']
    in_channels = config['in_channels']
    base_channels = make_divisible(config['base_channels'], 8)
    cm = config['channels_multiplier']
    er = config['expansion_rate']
    n_blocks = config['n_blocks']
    strides = config['strides']
    n_stages = len(n_blocks)
    cps = [base_channels] + [make_divisible(base_channels * cm ** s, 8)
                             for s in range(n_stages)]
    s_bn = 1.0 / math.sqrt(1.0 + BN_EPS)

    keys = iter(jax.random.split(key, 64))
    params = {'n_classes': n_classes}

    def conv1x1_params(cin, cout):
        w = kaiming(next(keys), (cin, cout), cout) * s_bn
        wp = jnp.zeros((pad_lane(cin), pad_lane(cout)), jnp.float32)
        wp = wp.at[:cin, :cout].set(w)
        return wp.astype(jnp.bfloat16), jnp.zeros((pad_lane(cout),), jnp.float32)

    def conv3x3_params(cin, cin_tap, cout):
        # cin: real channels; cin_tap: channels per tap in the im2col patches.
        w = kaiming(next(keys), (3, 3, cin, cout), cout * 9) * s_bn
        wp = jnp.zeros((3, 3, cin_tap, pad_lane(cout)), jnp.float32)
        wp = wp.at[:, :, :cin, :cout].set(w)
        wp = wp.reshape(9 * cin_tap, pad_lane(cout))      # tap-major, matches im2col
        kp = pad_lane(9 * cin_tap)
        if kp != 9 * cin_tap:
            wp = jnp.pad(wp, ((0, kp - 9 * cin_tap), (0, 0)))
        return wp.astype(jnp.bfloat16), jnp.zeros((pad_lane(cout),), jnp.float32)

    c0 = cps[0] // 4
    params['stem1_w'], params['stem1_b'] = conv3x3_params(in_channels, in_channels, c0)
    params['stem2_w'], params['stem2_b'] = conv3x3_params(c0, pad_lane(c0), cps[0])

    blocks = []
    block_id = 0
    for stage_id in range(n_stages):
        in_c = cps[stage_id]
        out_c = cps[stage_id + 1]
        for _ in range(n_blocks[stage_id]):
            block_id += 1
            stride = tuple(strides.get(f'b{block_id}', (1, 1)))
            exp_c = make_divisible(in_c * er, 8)
            exp_w, exp_b = conv1x1_params(in_c, exp_c)
            proj_w, proj_b = conv1x1_params(exp_c, out_c)
            dw = kaiming(next(keys), (3, 3, exp_c), exp_c * 9) * s_bn
            dw_w = jnp.zeros((3, 3, pad_lane(exp_c)), jnp.float32)
            dw_w = dw_w.at[:, :, :exp_c].set(dw)
            blocks.append(dict(
                in_c=in_c, out_c=out_c, stride=stride,
                exp_w=exp_w, exp_b=exp_b,
                dw_w=dw_w, dw_b=jnp.zeros((pad_lane(exp_c),), jnp.float32),
                proj_w=proj_w, proj_b=proj_b))
            in_c = out_c
    params['blocks'] = blocks
    params['ff_w'], params['ff_b'] = conv1x1_params(cps[-1], n_classes)
    return params


def block_forward(x, p):
    # Block.forward: exp -> depthwise -> proj (+ shortcut) -> ReLU.
    h = conv1x1_bn(x, p['exp_w'], p['exp_b'], relu=True)
    h = dw3x3(h, p['dw_w'], p['dw_b'], p['stride'], relu=True)
    if p['in_c'] == p['out_c']:
        if p['stride'] == (1, 1):
            sc = x                                        # identity shortcut
        else:
            # AvgPool2d(kernel=3, stride, padding=1, count_include_pad=True)
            C = x.shape[-1]
            sc = dw3x3(x, jnp.full((3, 3, C), 1.0 / 9.0, jnp.float32),
                       jnp.zeros((C,), jnp.float32), p['stride'], relu=False)
        # proj conv + BN, + shortcut, + after_block ReLU, all fused in the GEMM.
        h = conv1x1_bn(h, p['proj_w'], p['proj_b'], relu=True, residual=sc)
    else:
        h = conv1x1_bn(h, p['proj_w'], p['proj_b'], relu=True)
    return h


def network_forward(params, x_nchw):
    x = jnp.transpose(x_nchw, (0, 2, 3, 1)).astype(ACT_DTYPE)   # NCHW -> NHWC bf16
    x = conv3x3_bn(x, params['stem1_w'], params['stem1_b'], stride=(2, 2), relu=True)
    x = conv3x3_bn(x, params['stem2_w'], params['stem2_b'], stride=(2, 2), relu=True)
    for blk in params['blocks']:
        x = block_forward(x, blk)
    # Head: global average pool FIRST (exact: the ff 1x1 conv + BN is affine
    # with no activation, so it commutes with the spatial mean), then a tiny GEMM.
    Nb = x.shape[0]
    pooled = global_avg_pool(x)                                  # (Nb, C) f32
    rows = max(8, ((Nb + 7) // 8) * 8)                           # sublane pad only
    pooled = jnp.pad(pooled, ((0, rows - Nb), (0, 0)))
    logits = gemm_bias_act(pooled, params['ff_w'], params['ff_b'],
                           relu=False, out_dtype=jnp.float32)
    return logits[:Nb, :params['n_classes']]


if __name__ == "__main__":
    # Config chosen so every Block code path runs: b1 = identity shortcut
    # (stride-1 dw kernel), b2 = AvgPool shortcut (strided dw kernel, in==out),
    # b3 = no shortcut (channel expansion).
    config = dict(
        n_classes=10,
        in_channels=1,
        base_channels=32,
        channels_multiplier=2.0,
        expansion_rate=2,
        n_blocks=(2, 1),
        strides={'b2': (2, 2)},
    )
    key = jax.random.PRNGKey(0)
    pkey, xkey = jax.random.split(key)
    params = build_params(config, pkey)
    x = jax.random.normal(xkey, (2, config['in_channels'], 32, 32), jnp.float32)  # NCHW

    fwd = jax.jit(functools.partial(network_forward, params))
    logits = jax.block_until_ready(fwd(x))
    assert logits.shape == (2, config['n_classes']), logits.shape
    assert bool(jnp.all(jnp.isfinite(logits)))
    print("KERNEL_OK")
</pallas_src>

<mosaic_0001>
module attributes {stable_mosaic.version = 11 : i64} {
  func.func @gemm_kernel(%arg0: i32, %arg1: i32, %arg2: memref<256x128xbf16, #tpu.memory_space<vmem>>, %arg3: memref<128x128xbf16, #tpu.memory_space<vmem>>, %arg4: memref<1x128xf32, #tpu.memory_space<vmem>>, %arg5: memref<256x128xbf16, #tpu.memory_space<vmem>>) attributes {dimension_semantics = [#tpu.dimension_semantics<parallel>, #tpu.dimension_semantics<parallel>], iteration_bounds = array<i64: 2, 1>, scalar_prefetch = 0 : i64, scratch_operands = 0 : i64, tpu.core_type = #tpu.core_type<tc>, window_params = [{transform_indices = @transform_0, window_bounds = array<i64: 256, 128>}, {transform_indices = @transform_1, window_bounds = array<i64: 128, 128>}, {transform_indices = @transform_2, window_bounds = array<i64: 1, 128>}, {transform_indices = @transform_3, window_bounds = array<i64: 256, 128>}]} {
    %c0 = arith.constant 0 : index
    %c0_0 = arith.constant 0 : index
    %0 = vector.load %arg2[%c0, %c0_0] : memref<256x128xbf16, #tpu.memory_space<vmem>>, vector<256x128xbf16>
    %c0_1 = arith.constant 0 : index
    %c0_2 = arith.constant 0 : index
    %1 = vector.load %arg3[%c0_1, %c0_2] : memref<128x128xbf16, #tpu.memory_space<vmem>>, vector<128x128xbf16>
    %cst = arith.constant dense<0.000000e+00> : vector<256x128xf32>
    %2 = tpu.matmul %0, %1, %cst {dimension_numbers = #tpu.dot_dimension_numbers<[1], [0], [0], [1], [0, 0, 1, 1], [], []>} : vector<256x128xbf16>, vector<128x128xbf16>, vector<256x128xf32> -> vector<256x128xf32>
    %c0_3 = arith.constant 0 : index
    %c0_4 = arith.constant 0 : index
    %3 = vector.load %arg4[%c0_3, %c0_4] : memref<1x128xf32, #tpu.memory_space<vmem>>, vector<1x128xf32>
    %4 = vector.broadcast %3 : vector<1x128xf32> to vector<256x128xf32>
    %5 = arith.addf %2, %4 : vector<256x128xf32>
    %cst_5 = arith.constant 0.000000e+00 : f32
    %6 = vector.broadcast %cst_5 : f32 to vector<256x128xf32>
    %7 = arith.maximumf %5, %6 : vector<256x128xf32>
    %8 = arith.truncf %7 : vector<256x128xf32> to vector<256x128xbf16>
    %c0_6 = arith.constant 0 : index
    %c0_7 = arith.constant 0 : index
    %9 = vector.load %arg5[%c0_6, %c0_7] : memref<256x128xbf16, #tpu.memory_space<vmem>>, vector<256x128xbf16>
    tpu.vector_store %arg5[%c0_6, %c0_7], %8 {strides = array<i32>} : memref<256x128xbf16, #tpu.memory_space<vmem>>, vector<256x128xbf16>,
    return
  }
  func.func @transform_0(%arg0: i32, %arg1: i32) -> (i32, i32) {
    %c0_i32 = arith.constant 0 : i32
    %c0_i32_0 = arith.constant 0 : i32
    return %arg0, %c0_i32 : i32, i32
  }
  func.func @transform_1(%arg0: i32, %arg1: i32) -> (i32, i32) {
    %c0_i32 = arith.constant 0 : i32
    %c0_i32_0 = arith.constant 0 : i32
    return %c0_i32, %arg1 : i32, i32
  }
  func.func @transform_2(%arg0: i32, %arg1: i32) -> (i32, i32) {
    %c0_i32 = arith.constant 0 : i32
    %c0_i32_0 = arith.constant 0 : i32
    return %c0_i32, %arg1 : i32, i32
  }
  func.func @transform_3(%arg0: i32, %arg1: i32) -> (i32, i32) {
    %c0_i32 = arith.constant 0 : i32
    return %arg0, %arg1 : i32, i32
  }
}

module attributes {stable_mosaic.version = 11 : i64} {
  func.func @gemm_kernel(%arg0: i32, %arg1: i32, %arg2: memref<128x128xbf16, #tpu.memory_space<vmem>>, %arg3: memref<128x128xbf16, #tpu.memory_space<vmem>>, %arg4: memref<1x128xf32, #tpu.memory_space<vmem>>, %arg5: memref<128x128xbf16, #tpu.memory_space<vmem>>) attributes {dimension_semantics = [#tpu.dimension_semantics<parallel>, #tpu.dimension_semantics<parallel>], iteration_bounds = array<i64: 1, 1>, scalar_prefetch = 0 : i64, scratch_operands = 0 : i64, tpu.core_type = #tpu.core_type<tc>, window_params = [{transform_indices = @transform_0, window_bounds = array<i64: 128, 128>}, {transform_indices = @transform_1, window_bounds = array<i64: 128, 128>}, {transform_indices = @transform_2, window_bounds = array<i64: 1, 128>}, {transform_indices = @transform_3, window_bounds = array<i64: 128, 128>}]} {
    %c0 = arith.constant 0 : index
    %c0_0 = arith.constant 0 : index
    %0 = vector.load %arg2[%c0, %c0_0] : memref<128x128xbf16, #tpu.memory_space<vmem>>, vector<128x128xbf16>
    %c0_1 = arith.constant 0 : index
    %c0_2 = arith.constant 0 : index
    %1 = vector.load %arg3[%c0_1, %c0_2] : memref<128x128xbf16, #tpu.memory_space<vmem>>, vector<128x128xbf16>
    %cst = arith.constant dense<0.000000e+00> : vector<128x128xf32>
    %2 = tpu.matmul %0, %1, %cst {dimension_numbers = #tpu.dot_dimension_numbers<[1], [0], [0], [1], [0, 0, 1, 1], [], []>} : vector<128x128xbf16>, vector<128x128xbf16>, vector<128x128xf32> -> vector<128x128xf32>
    %c0_3 = arith.constant 0 : index
    %c0_4 = arith.constant 0 : index
    %3 = vector.load %arg4[%c0_3, %c0_4] : memref<1x128xf32, #tpu.memory_space<vmem>>, vector<1x128xf32>
    %4 = vector.broadcast %3 : vector<1x128xf32> to vector<128x128xf32>
    %5 = arith.addf %2, %4 : vector<128x128xf32>
    %cst_5 = arith.constant 0.000000e+00 : f32
    %6 = vector.broadcast %cst_5 : f32 to vector<128x128xf32>
    %7 = arith.maximumf %5, %6 : vector<128x128xf32>
    %8 = arith.truncf %7 : vector<128x128xf32> to vector<128x128xbf16>
    %c0_6 = arith.constant 0 : index
    %c0_7 = arith.constant 0 : index
    %9 = vector.load %arg5[%c0_6, %c0_7] : memref<128x128xbf16, #tpu.memory_space<vmem>>, vector<128x128xbf16>
    tpu.vector_store %arg5[%c0_6, %c0_7], %8 {strides = array<i32>} : memref<128x128xbf16, #tpu.memory_space<vmem>>, vector<128x128xbf16>,
    return
  }
  func.func @transform_0(%arg0: i32, %arg1: i32) -> (i32, i32) {
    %c0_i32 = arith.constant 0 : i32
    %c0_i32_0 = arith.constant 0 : i32
    return %arg0, %c0_i32 : i32, i32
  }
  func.func @transform_1(%arg0: i32, %arg1: i32) -> (i32, i32) {
    %c0_i32 = arith.constant 0 : i32
    %c0_i32_0 = arith.constant 0 : i32
    return %c0_i32, %arg1 : i32, i32
  }
  func.func @transform_2(%arg0: i32, %arg1: i32) -> (i32, i32) {
    %c0_i32 = arith.constant 0 : i32
    %c0_i32_0 = arith.constant 0 : i32
    return %c0_i32, %arg1 : i32, i32
  }
  func.func @transform_3(%arg0: i32, %arg1: i32) -> (i32, i32) {
    %c0_i32 = arith.constant 0 : i32
    return %arg0, %arg1 : i32, i32
  }
}

module attributes {stable_mosaic.version = 11 : i64} {
  func.func @gemm_kernel(%arg0: i32, %arg1: i32, %arg2: memref<128x1152xbf16, #tpu.memory_space<vmem>>, %arg3: memref<1152x128xbf16, #tpu.memory_space<vmem>>, %arg4: memref<1x128xf32, #tpu.memory_space<vmem>>, %arg5: memref<128x128xbf16, #tpu.memory_space<vmem>>) attributes {dimension_semantics = [#tpu.dimension_semantics<parallel>, #tpu.dimension_semantics<parallel>], iteration_bounds = array<i64: 1, 1>, scalar_prefetch = 0 : i64, scratch_operands = 0 : i64, tpu.core_type = #tpu.core_type<tc>, window_params = [{transform_indices = @transform_0, window_bounds = array<i64: 128, 1152>}, {transform_indices = @transform_1, window_bounds = array<i64: 1152, 128>}, {transform_indices = @transform_2, window_bounds = array<i64: 1, 128>}, {transform_indices = @transform_3, window_bounds = array<i64: 128, 128>}]} {
    %c0 = arith.constant 0 : index
    %c0_0 = arith.constant 0 : index
    %0 = vector.load %arg2[%c0, %c0_0] : memref<128x1152xbf16, #tpu.memory_space<vmem>>, vector<128x1152xbf16>
    %c0_1 = arith.constant 0 : index
    %c0_2 = arith.constant 0 : index
    %1 = vector.load %arg3[%c0_1, %c0_2] : memref<1152x128xbf16, #tpu.memory_space<vmem>>, vector<1152x128xbf16>
    %cst = arith.constant dense<0.000000e+00> : vector<128x128xf32>
    %2 = tpu.matmul %0, %1, %cst {dimension_numbers = #tpu.dot_dimension_numbers<[1], [0], [0], [1], [0, 0, 1, 1], [], []>} : vector<128x1152xbf16>, vector<1152x128xbf16>, vector<128x128xf32> -> vector<128x128xf32>
    %c0_3 = arith.constant 0 : index
    %c0_4 = arith.constant 0 : index
    %3 = vector.load %arg4[%c0_3, %c0_4] : memref<1x128xf32, #tpu.memory_space<vmem>>, vector<1x128xf32>
    %4 = vector.broadcast %3 : vector<1x128xf32> to vector<128x128xf32>
    %5 = arith.addf %2, %4 : vector<128x128xf32>
    %cst_5 = arith.constant 0.000000e+00 : f32
    %6 = vector.broadcast %cst_5 : f32 to vector<128x128xf32>
    %7 = arith.maximumf %5, %6 : vector<128x128xf32>
    %8 = arith.truncf %7 : vector<128x128xf32> to vector<128x128xbf16>
    %c0_6 = arith.constant 0 : index
    %c0_7 = arith.constant 0 : index
    %9 = vector.load %arg5[%c0_6, %c0_7] : memref<128x128xbf16, #tpu.memory_space<vmem>>, vector<128x128xbf16>
    tpu.vector_store %arg5[%c0_6, %c0_7], %8 {strides = array<i32>} : memref<128x128xbf16, #tpu.memory_space<vmem>>, vector<128x128xbf16>,
    return
  }
  func.func @transform_0(%arg0: i32, %arg1: i32) -> (i32, i32) {
    %c0_i32 = arith.constant 0 : i32
    %c0_i32_0 = arith.constant 0 : i32
    return %arg0, %c0_i32 : i32, i32
  }
  func.func @transform_1(%arg0: i32, %arg1: i32) -> (i32, i32) {
    %c0_i32 = arith.constant 0 : i32
    %c0_i32_0 = arith.constant 0 : i32
    return %c0_i32, %arg1 : i32, i32
  }
  func.func @transform_2(%arg0: i32, %arg1: i32) -> (i32, i32) {
    %c0_i32 = arith.constant 0 : i32
    %c0_i32_0 = arith.constant 0 : i32
    return %c0_i32, %arg1 : i32, i32
  }
  func.func @transform_3(%arg0: i32, %arg1: i32) -> (i32, i32) {
    %c0_i32 = arith.constant 0 : i32
    return %arg0, %arg1 : i32, i32
  }
}

module attributes {stable_mosaic.version = 11 : i64} {
  func.func @gemm_kernel(%arg0: i32, %arg1: i32, %arg2: memref<128x128xbf16, #tpu.memory_space<vmem>>, %arg3: memref<128x128xbf16, #tpu.memory_space<vmem>>, %arg4: memref<1x128xf32, #tpu.memory_space<vmem>>, %arg5: memref<128x128xbf16, #tpu.memory_space<vmem>>, %arg6: memref<128x128xbf16, #tpu.memory_space<vmem>>) attributes {dimension_semantics = [#tpu.dimension_semantics<parallel>, #tpu.dimension_semantics<parallel>], iteration_bounds = array<i64: 1, 1>, scalar_prefetch = 0 : i64, scratch_operands = 0 : i64, tpu.core_type = #tpu.core_type<tc>, window_params = [{transform_indices = @transform_0, window_bounds = array<i64: 128, 128>}, {transform_indices = @transform_1, window_bounds = array<i64: 128, 128>}, {transform_indices = @transform_2, window_bounds = array<i64: 1, 128>}, {transform_indices = @transform_3, window_bounds = array<i64: 128, 128>}, {transform_indices = @transform_4, window_bounds = array<i64: 128, 128>}]} {
    %c0 = arith.constant 0 : index
    %c0_0 = arith.constant 0 : index
    %0 = vector.load %arg2[%c0, %c0_0] : memref<128x128xbf16, #tpu.memory_space<vmem>>, vector<128x128xbf16>
    %c0_1 = arith.constant 0 : index
    %c0_2 = arith.constant 0 : index
    %1 = vector.load %arg3[%c0_1, %c0_2] : memref<128x128xbf16, #tpu.memory_space<vmem>>, vector<128x128xbf16>
    %cst = arith.constant dense<0.000000e+00> : vector<128x128xf32>
    %2 = tpu.matmul %0, %1, %cst {dimension_numbers = #tpu.dot_dimension_numbers<[1], [0], [0], [1], [0, 0, 1, 1], [], []>} : vector<128x128xbf16>, vector<128x128xbf16>, vector<128x128xf32> -> vector<128x128xf32>
    %c0_3 = arith.constant 0 : index
    %c0_4 = arith.constant 0 : index
    %3 = vector.load %arg4[%c0_3, %c0_4] : memref<1x128xf32, #tpu.memory_space<vmem>>, vector<1x128xf32>
    %4 = vector.broadcast %3 : vector<1x128xf32> to vector<128x128xf32>
    %5 = arith.addf %2, %4 : vector<128x128xf32>
    %c0_5 = arith.constant 0 : index
    %c0_6 = arith.constant 0 : index
    %6 = vector.load %arg5[%c0_5, %c0_6] : memref<128x128xbf16, #tpu.memory_space<vmem>>, vector<128x128xbf16>
    %7 = arith.extf %6 : vector<128x128xbf16> to vector<128x128xf32>
    %8 = arith.addf %5, %7 : vector<128x128xf32>
    %cst_7 = arith.constant 0.000000e+00 : f32
    %9 = vector.broadcast %cst_7 : f32 to vector<128x128xf32>
    %10 = arith.maximumf %8, %9 : vector<128x128xf32>
    %11 = arith.truncf %10 : vector<128x128xf32> to vector<128x128xbf16>
    %c0_8 = arith.constant 0 : index
    %c0_9 = arith.constant 0 : index
    %12 = vector.load %arg6[%c0_8, %c0_9] : memref<128x128xbf16, #tpu.memory_space<vmem>>, vector<128x128xbf16>
    tpu.vector_store %arg6[%c0_8, %c0_9], %11 {strides = array<i32>} : memref<128x128xbf16, #tpu.memory_space<vmem>>, vector<128x128xbf16>,
    return
  }
  func.func @transform_0(%arg0: i32, %arg1: i32) -> (i32, i32) {
    %c0_i32 = arith.constant 0 : i32
    %c0_i32_0 = arith.constant 0 : i32
    return %arg0, %c0_i32 : i32, i32
  }
  func.func @transform_1(%arg0: i32, %arg1: i32) -> (i32, i32) {
    %c0_i32 = arith.constant 0 : i32
    %c0_i32_0 = arith.constant 0 : i32
    return %c0_i32, %arg1 : i32, i32
  }
  func.func @transform_2(%arg0: i32, %arg1: i32) -> (i32, i32) {
    %c0_i32 = arith.constant 0 : i32
    %c0_i32_0 = arith.constant 0 : i32
    return %c0_i32, %arg1 : i32, i32
  }
  func.func @transform_3(%arg0: i32, %arg1: i32) -> (i32, i32) {
    %c0_i32 = arith.constant 0 : i32
    return %arg0, %arg1 : i32, i32
  }
  func.func @transform_4(%arg0: i32, %arg1: i32) -> (i32, i32) {
    %c0_i32 = arith.constant 0 : i32
    return %arg0, %arg1 : i32, i32
  }
}

module attributes {stable_mosaic.version = 11 : i64} {
  func.func @dw3x3_s1_kernel(%arg0: i32, %arg1: i32, %arg2: memref<1x8x8x128xbf16, #tpu.memory_space<vmem>>, %arg3: memref<3x3x128xf32, #tpu.memory_space<vmem>>, %arg4: memref<1x128xf32, #tpu.memory_space<vmem>>, %arg5: memref<1x8x8x128xbf16, #tpu.memory_space<vmem>>, %arg6: memref<1x10x10x128xf32, #tpu.memory_space<vmem>>) attributes {dimension_semantics = [#tpu.dimension_semantics<parallel>, #tpu.dimension_semantics<arbitrary>], iteration_bounds = array<i64: 2, 1>, scalar_prefetch = 0 : i64, scratch_operands = 1 : i64, tpu.core_type = #tpu.core_type<tc>, window_params = [{transform_indices = @transform_0, window_bounds = array<i64: 1, 8, 8, 128>}, {pipeline_mode = #tpu.pipeline_mode<synchronous>, transform_indices = @transform_1, window_bounds = array<i64: 3, 3, 128>}, {pipeline_mode = #tpu.pipeline_mode<synchronous>, transform_indices = @transform_2, window_bounds = array<i64: 1, 128>}, {transform_indices = @transform_3, window_bounds = array<i64: 1, 8, 8, 128>}]} {
    %c0_i32 = arith.constant 0 : i32
    %0 = arith.cmpi eq, %arg1, %c0_i32 : i32
    %1 = arith.extui %0 : i1 to i32
    %c0_i32_0 = arith.constant 0 : i32
    %2 = arith.cmpi ne, %1, %c0_i32_0 : i32
    scf.if %2 {
      %cst_17 = arith.constant 0.000000e+00 : f32
      %83 = vector.broadcast %cst_17 : f32 to vector<1x10x10x128xf32>
      %c0_18 = arith.constant 0 : index
      %c0_19 = arith.constant 0 : index
      %c0_20 = arith.constant 0 : index
      %c0_21 = arith.constant 0 : index
      %84 = vector.load %arg6[%c0_18, %c0_19, %c0_20, %c0_21] : memref<1x10x10x128xf32, #tpu.memory_space<vmem>>, vector<1x10x10x128xf32>
      tpu.vector_store %arg6[%c0_18, %c0_19, %c0_20, %c0_21], %83 {strides = array<i32>} : memref<1x10x10x128xf32, #tpu.memory_space<vmem>>, vector<1x10x10x128xf32>,
      %c0_22 = arith.constant 0 : index
      %c0_23 = arith.constant 0 : index
      %c0_24 = arith.constant 0 : index
      %c0_25 = arith.constant 0 : index
      %85 = vector.load %arg2[%c0_22, %c0_23, %c0_24, %c0_25] : memref<1x8x8x128xbf16, #tpu.memory_space<vmem>>, vector<1x8x8x128xbf16>
      %86 = arith.extf %85 : vector<1x8x8x128xbf16> to vector<1x8x8x128xf32>
      %c0_26 = arith.constant 0 : index
      %c1_27 = arith.constant 1 : index
      %c1_28 = arith.constant 1 : index
      %c0_29 = arith.constant 0 : index
      %87 = vector.load %arg6[%c0_26, %c1_27, %c1_28, %c0_29] : memref<1x10x10x128xf32, #tpu.memory_space<vmem>>, vector<1x8x8x128xf32>
      tpu.vector_store %arg6[%c0_26, %c1_27, %c1_28, %c0_29], %86 {strides = array<i32>} : memref<1x10x10x128xf32, #tpu.memory_space<vmem>>, vector<1x8x8x128xf32>,
    } else {
    }
    %c0 = arith.constant 0 : index
    %c0_1 = arith.constant 0 : index
    %c0_2 = arith.constant 0 : index
    %3 = vector.load %arg3[%c0, %c0_1, %c0_2] : memref<3x3x128xf32, #tpu.memory_space<vmem>>, vector<3x3x128xf32>
    %c0_3 = arith.constant 0 : index
    %c0_4 = arith.constant 0 : index
    %4 = vector.load %arg4[%c0_3, %c0_4] : memref<1x128xf32, #tpu.memory_space<vmem>>, vector<1x128xf32>
    %5 = vector.shape_cast %4 : vector<1x128xf32> to vector<1x1x1x128xf32>
    %c8_i32 = arith.constant 8 : i32
    %6 = arith.muli %arg1, %c8_i32 : i32
    %cst = arith.constant 0.000000e+00 : f32
    %7 = vector.broadcast %cst : f32 to vector<1x8x8x128xf32>
    %c0_5 = arith.constant 0 : index
    %8 = arith.index_cast %6 : i32 to index
    %c0_6 = arith.constant 0 : index
    %c0_7 = arith.constant 0 : index
    %9 = vector.load %arg6[%c0_5, %8, %c0_6, %c0_7] : memref<1x10x10x128xf32, #tpu.memory_space<vmem>>, vector<1x10x8x128xf32>
    %10 = vector.extract_strided_slice %9 {offsets = [0, 0, 0, 0], sizes = [1, 8, 8, 128], strides = [1, 1, 1, 1]} : vector<1x10x8x128xf32> to vector<1x8x8x128xf32>
    %11 = vector.extract_strided_slice %3 {offsets = [0, 0, 0], sizes = [1, 1, 128], strides = [1, 1, 1]} : vector<3x3x128xf32> to vector<1x1x128xf32>
    %12 = vector.shape_cast %11 : vector<1x1x128xf32> to vector<128xf32>
    %13 = vector.shape_cast %12 : vector<128xf32> to vector<1x1x1x128xf32>
    %14 = vector.broadcast %13 : vector<1x1x1x128xf32> to vector<1x8x8x128xf32>
    %15 = arith.mulf %10, %14 : vector<1x8x8x128xf32>
    %16 = arith.addf %7, %15 : vector<1x8x8x128xf32>
    %17 = vector.extract_strided_slice %9 {offsets = [0, 1, 0, 0], sizes = [1, 8, 8, 128], strides = [1, 1, 1, 1]} : vector<1x10x8x128xf32> to vector<1x8x8x128xf32>
    %18 = vector.extract_strided_slice %3 {offsets = [1, 0, 0], sizes = [1, 1, 128], strides = [1, 1, 1]} : vector<3x3x128xf32> to vector<1x1x128xf32>
    %19 = vector.shape_cast %18 : vector<1x1x128xf32> to vector<128xf32>
    %20 = vector.shape_cast %19 : vector<128xf32> to vector<1x1x1x128xf32>
    %21 = vector.broadcast %20 : vector<1x1x1x128xf32> to vector<1x8x8x128xf32>
    %22 = arith.mulf %17, %21 : vector<1x8x8x128xf32>
    %23 = arith.addf %16, %22 : vector<1x8x8x128xf32>
    %24 = vector.extract_strided_slice %9 {offsets = [0, 2, 0, 0], sizes = [1, 8, 8, 128], strides = [1, 1, 1, 1]} : vector<1x10x8x128xf32> to vector<1x8x8x128xf32>
    %25 = vector.extract_strided_slice %3 {offsets = [2, 0, 0], sizes = [1, 1, 128], strides = [1, 1, 1]} : vector<3x3x128xf32> to vector<1x1x128xf32>
    %26 = vector.shape_cast %25 : vector<1x1x128xf32> to vector<128xf32>
    %27 = vector.shape_cast %26 : vector<128xf32> to vector<1x1x1x128xf32>
    %28 = vector.broadcast %27 : vector<1x1x1x128xf32> to vector<1x8x8x128xf32>
    %29 = arith.mulf %24, %28 : vector<1x8x8x128xf32>
    %30 = arith.addf %23, %29 : vector<1x8x8x128xf32>
    %c0_8 = arith.constant 0 : index
    %31 = arith.index_cast %6 : i32 to index
    %c1 = arith.constant 1 : index
    %c0_9 = arith.constant 0 : index
    %32 = vector.load %arg6[%c0_8, %31, %c1, %c0_9] : memref<1x10x10x128xf32, #tpu.memory_space<vmem>>, vector<1x10x8x128xf32>
    %33 = vector.extract_strided_slice %32 {offsets = [0, 0, 0, 0], sizes = [1, 8, 8, 128], strides = [1, 1, 1, 1]} : vector<1x10x8x128xf32> to vector<1x8x8x128xf32>
    %34 = vector.extract_strided_slice %3 {offsets = [0, 1, 0], sizes = [1, 1, 128], strides = [1, 1, 1]} : vector<3x3x128xf32> to vector<1x1x128xf32>
    %35 = vector.shape_cast %34 : vector<1x1x128xf32> to vector<128xf32>
    %36 = vector.shape_cast %35 : vector<128xf32> to vector<1x1x1x128xf32>
    %37 = vector.broadcast %36 : vector<1x1x1x128xf32> to vector<1x8x8x128xf32>
    %38 = arith.mulf %33, %37 : vector<1x8x8x128xf32>
    %39 = arith.addf %30, %38 : vector<1x8x8x128xf32>
    %40 = vector.extract_strided_slice %32 {offsets = [0, 1, 0, 0], sizes = [1, 8, 8, 128], strides = [1, 1, 1, 1]} : vector<1x10x8x128xf32> to vector<1x8x8x128xf32>
    %41 = vector.extract_strided_slice %3 {offsets = [1, 1, 0], sizes = [1, 1, 128], strides = [1, 1, 1]} : vector<3x3x128xf32> to vector<1x1x128xf32>
    %42 = vector.shape_cast %41 : vector<1x1x128xf32> to vector<128xf32>
    %43 = vector.shape_cast %42 : vector<128xf32> to vector<1x1x1x128xf32>
    %44 = vector.broadcast %43 : vector<1x1x1x128xf32> to vector<1x8x8x128xf32>
    %45 = arith.mulf %40, %44 : vector<1x8x8x128xf32>
    %46 = arith.addf %39, %45 : vector<1x8x8x128xf32>
    %47 = vector.extract_strided_slice %32 {offsets = [0, 2, 0, 0], sizes = [1, 8, 8, 128], strides = [1, 1, 1, 1]} : vector<1x10x8x128xf32> to vector<1x8x8x128xf32>
    %48 = vector.extract_strided_slice %3 {offsets = [2, 1, 0], sizes = [1, 1, 128], strides = [1, 1, 1]} : vector<3x3x128xf32> to vector<1x1x128xf32>
    %49 = vector.shape_cast %48 : vector<1x1x128xf32> to vector<128xf32>
    %50 = vector.shape_cast %49 : vector<128xf32> to vector<1x1x1x128xf32>
    %51 = vector.broadcast %50 : vector<1x1x1x128xf32> to vector<1x8x8x128xf32>
    %52 = arith.mulf %47, %51 : vector<1x8x8x128xf32>
    %53 = arith.addf %46, %52 : vector<1x8x8x128xf32>
    %c0_10 = arith.constant 0 : index
    %54 = arith.index_cast %6 : i32 to index
    %c2 = arith.constant 2 : index
    %c0_11 = arith.constant 0 : index
    %55 = vector.load %arg6[%c0_10, %54, %c2, %c0_11] : memref<1x10x10x128xf32, #tpu.memory_space<vmem>>, vector<1x10x8x128xf32>
    %56 = vector.extract_strided_slice %55 {offsets = [0, 0, 0, 0], sizes = [1, 8, 8, 128], strides = [1, 1, 1, 1]} : vector<1x10x8x128xf32> to vector<1x8x8x128xf32>
    %57 = vector.extract_strided_slice %3 {offsets = [0, 2, 0], sizes = [1, 1, 128], strides = [1, 1, 1]} : vector<3x3x128xf32> to vector<1x1x128xf32>
    %58 = vector.shape_cast %57 : vector<1x1x128xf32> to vector<128xf32>
    %59 = vector.shape_cast %58 : vector<128xf32> to vector<1x1x1x128xf32>
    %60 = vector.broadcast %59 : vector<1x1x1x128xf32> to vector<1x8x8x128xf32>
    %61 = arith.mulf %56, %60 : vector<1x8x8x128xf32>
    %62 = arith.addf %53, %61 : vector<1x8x8x128xf32>
    %63 = vector.extract_strided_slice %55 {offsets = [0, 1, 0, 0], sizes = [1, 8, 8, 128], strides = [1, 1, 1, 1]} : vector<1x10x8x128xf32> to vector<1x8x8x128xf32>
    %64 = vector.extract_strided_slice %3 {offsets = [1, 2, 0], sizes = [1, 1, 128], strides = [1, 1, 1]} : vector<3x3x128xf32> to vector<1x1x128xf32>
    %65 = vector.shape_cast %64 : vector<1x1x128xf32> to vector<128xf32>
    %66 = vector.shape_cast %65 : vector<128xf32> to vector<1x1x1x128xf32>
    %67 = vector.broadcast %66 : vector<1x1x1x128xf32> to vector<1x8x8x128xf32>
    %68 = arith.mulf %63, %67 : vector<1x8x8x128xf32>
    %69 = arith.addf %62, %68 : vector<1x8x8x128xf32>
    %70 = vector.extract_strided_slice %55 {offsets = [0, 2, 0, 0], sizes = [1, 8, 8, 128], strides = [1, 1, 1, 1]} : vector<1x10x8x128xf32> to vector<1x8x8x128xf32>
    %71 = vector.extract_strided_slice %3 {offsets = [2, 2, 0], sizes = [1, 1, 128], strides = [1, 1, 1]} : vector<3x3x128xf32> to vector<1x1x128xf32>
    %72 = vector.shape_cast %71 : vector<1x1x128xf32> to vector<128xf32>
    %73 = vector.shape_cast %72 : vector<128xf32> to vector<1x1x1x128xf32>
    %74 = vector.broadcast %73 : vector<1x1x1x128xf32> to vector<1x8x8x128xf32>
    %75 = arith.mulf %70, %74 : vector<1x8x8x128xf32>
    %76 = arith.addf %69, %75 : vector<1x8x8x128xf32>
    %77 = vector.broadcast %5 : vector<1x1x1x128xf32> to vector<1x8x8x128xf32>
    %78 = arith.addf %76, %77 : vector<1x8x8x128xf32>
    %cst_12 = arith.constant 0.000000e+00 : f32
    %79 = vector.broadcast %cst_12 : f32 to vector<1x8x8x128xf32>
    %80 = arith.maximumf %78, %79 : vector<1x8x8x128xf32>
    %81 = arith.truncf %80 : vector<1x8x8x128xf32> to vector<1x8x8x128xbf16>
    %c0_13 = arith.constant 0 : index
    %c0_14 = arith.constant 0 : index
    %c0_15 = arith.constant 0 : index
    %c0_16 = arith.constant 0 : index
    %82 = vector.load %arg5[%c0_13, %c0_14, %c0_15, %c0_16] : memref<1x8x8x128xbf16, #tpu.memory_space<vmem>>, vector<1x8x8x128xbf16>
    tpu.vector_store %arg5[%c0_13, %c0_14, %c0_15, %c0_16], %81 {strides = array<i32>} : memref<1x8x8x128xbf16, #tpu.memory_space<vmem>>, vector<1x8x8x128xbf16>,
    return
  }
  func.func @transform_0(%arg0: i32, %arg1: i32) -> (i32, i32, i32, i32) {
    %c0_i32 = arith.constant 0 : i32
    %c0_i32_0 = arith.constant 0 : i32
    %c0_i32_1 = arith.constant 0 : i32
    %c0_i32_2 = arith.constant 0 : i32
    return %arg0, %c0_i32, %c0_i32_0, %c0_i32_1 : i32, i32, i32, i32
  }
  func.func @transform_1(%arg0: i32, %arg1: i32) -> (i32, i32, i32) {
    %c0_i32 = arith.constant 0 : i32
    %c0_i32_0 = arith.constant 0 : i32
    %c0_i32_1 = arith.constant 0 : i32
    %c0_i32_2 = arith.constant 0 : i32
    return %c0_i32, %c0_i32_0, %c0_i32_1 : i32, i32, i32
  }
  func.func @transform_2(%arg0: i32, %arg1: i32) -> (i32, i32) {
    %c0_i32 = arith.constant 0 : i32
    %c0_i32_0 = arith.constant 0 : i32
    %c0_i32_1 = arith.constant 0 : i32
    return %c0_i32, %c0_i32_0 : i32, i32
  }
  func.func @transform_3(%arg0: i32, %arg1: i32) -> (i32, i32, i32, i32) {
    %c0_i32 = arith.constant 0 : i32
    %c0_i32_0 = arith.constant 0 : i32
    %c0_i32_1 = arith.constant 0 : i32
    return %arg0, %arg1, %c0_i32, %c0_i32_0 : i32, i32, i32, i32
  }
}

module attributes {stable_mosaic.version = 11 : i64} {
  func.func @dw3x3_phase_kernel(%arg0: i32, %arg1: memref<1x5x5x128xbf16, #tpu.memory_space<vmem>>, %arg2: memref<1x5x5x128xbf16, #tpu.memory_space<vmem>>, %arg3: memref<1x5x5x128xbf16, #tpu.memory_space<vmem>>, %arg4: memref<1x5x5x128xbf16, #tpu.memory_space<vmem>>, %arg5: memref<3x3x128xf32, #tpu.memory_space<vmem>>, %arg6: memref<1x128xf32, #tpu.memory_space<vmem>>, %arg7: memref<1x4x4x128xbf16, #tpu.memory_space<vmem>>) attributes {dimension_semantics = [#tpu.dimension_semantics<parallel>], iteration_bounds = array<i64: 2>, scalar_prefetch = 0 : i64, scratch_operands = 0 : i64, tpu.core_type = #tpu.core_type<tc>, window_params = [{transform_indices = @transform_0, window_bounds = array<i64: 1, 5, 5, 128>}, {transform_indices = @transform_1, window_bounds = array<i64: 1, 5, 5, 128>}, {transform_indices = @transform_2, window_bounds = array<i64: 1, 5, 5, 128>}, {transform_indices = @transform_3, window_bounds = array<i64: 1, 5, 5, 128>}, {pipeline_mode = #tpu.pipeline_mode<synchronous>, transform_indices = @transform_4, window_bounds = array<i64: 3, 3, 128>}, {pipeline_mode = #tpu.pipeline_mode<synchronous>, transform_indices = @transform_5, window_bounds = array<i64: 1, 128>}, {transform_indices = @transform_6, window_bounds = array<i64: 1, 4, 4, 128>}]} {
    %c0 = arith.constant 0 : index
    %c0_0 = arith.constant 0 : index
    %c0_1 = arith.constant 0 : index
    %0 = vector.load %arg5[%c0, %c0_0, %c0_1] : memref<3x3x128xf32, #tpu.memory_space<vmem>>, vector<3x3x128xf32>
    %c0_2 = arith.constant 0 : index
    %c0_3 = arith.constant 0 : index
    %c0_4 = arith.constant 0 : index
    %c0_5 = arith.constant 0 : index
    %1 = vector.load %arg1[%c0_2, %c0_3, %c0_4, %c0_5] : memref<1x5x5x128xbf16, #tpu.memory_space<vmem>>, vector<1x5x5x128xbf16>
    %2 = arith.extf %1 : vector<1x5x5x128xbf16> to vector<1x5x5x128xf32>
    %c0_6 = arith.constant 0 : index
    %c0_7 = arith.constant 0 : index
    %c0_8 = arith.constant 0 : index
    %c0_9 = arith.constant 0 : index
    %3 = vector.load %arg2[%c0_6, %c0_7, %c0_8, %c0_9] : memref<1x5x5x128xbf16, #tpu.memory_space<vmem>>, vector<1x5x5x128xbf16>
    %4 = arith.extf %3 : vector<1x5x5x128xbf16> to vector<1x5x5x128xf32>
    %c0_10 = arith.constant 0 : index
    %c0_11 = arith.constant 0 : index
    %c0_12 = arith.constant 0 : index
    %c0_13 = arith.constant 0 : index
    %5 = vector.load %arg3[%c0_10, %c0_11, %c0_12, %c0_13] : memref<1x5x5x128xbf16, #tpu.memory_space<vmem>>, vector<1x5x5x128xbf16>
    %6 = arith.extf %5 : vector<1x5x5x128xbf16> to vector<1x5x5x128xf32>
    %c0_14 = arith.constant 0 : index
    %c0_15 = arith.constant 0 : index
    %c0_16 = arith.constant 0 : index
    %c0_17 = arith.constant 0 : index
    %7 = vector.load %arg4[%c0_14, %c0_15, %c0_16, %c0_17] : memref<1x5x5x128xbf16, #tpu.memory_space<vmem>>, vector<1x5x5x128xbf16>
    %8 = arith.extf %7 : vector<1x5x5x128xbf16> to vector<1x5x5x128xf32>
    %cst = arith.constant 0.000000e+00 : f32
    %9 = vector.broadcast %cst : f32 to vector<1x4x4x128xf32>
    %10 = vector.extract_strided_slice %2 {offsets = [0, 0, 0, 0], sizes = [1, 4, 4, 128], strides = [1, 1, 1, 1]} : vector<1x5x5x128xf32> to vector<1x4x4x128xf32>
    %11 = vector.extract_strided_slice %0 {offsets = [0, 0, 0], sizes = [1, 1, 128], strides = [1, 1, 1]} : vector<3x3x128xf32> to vector<1x1x128xf32>
    %12 = vector.shape_cast %11 : vector<1x1x128xf32> to vector<128xf32>
    %13 = vector.shape_cast %12 : vector<128xf32> to vector<1x1x1x128xf32>
    %14 = vector.broadcast %13 : vector<1x1x1x128xf32> to vector<1x4x4x128xf32>
    %15 = arith.mulf %10, %14 : vector<1x4x4x128xf32>
    %16 = arith.addf %9, %15 : vector<1x4x4x128xf32>
    %17 = vector.extract_strided_slice %4 {offsets = [0, 0, 0, 0], sizes = [1, 4, 4, 128], strides = [1, 1, 1, 1]} : vector<1x5x5x128xf32> to vector<1x4x4x128xf32>
    %18 = vector.extract_strided_slice %0 {offsets = [0, 1, 0], sizes = [1, 1, 128], strides = [1, 1, 1]} : vector<3x3x128xf32> to vector<1x1x128xf32>
    %19 = vector.shape_cast %18 : vector<1x1x128xf32> to vector<128xf32>
    %20 = vector.shape_cast %19 : vector<128xf32> to vector<1x1x1x128xf32>
    %21 = vector.broadcast %20 : vector<1x1x1x128xf32> to vector<1x4x4x128xf32>
    %22 = arith.mulf %17, %21 : vector<1x4x4x128xf32>
    %23 = arith.addf %16, %22 : vector<1x4x4x128xf32>
    %24 = vector.extract_strided_slice %2 {offsets = [0, 0, 1, 0], sizes = [1, 4, 4, 128], strides = [1, 1, 1, 1]} : vector<1x5x5x128xf32> to vector<1x4x4x128xf32>
    %25 = vector.extract_strided_slice %0 {offsets = [0, 2, 0], sizes = [1, 1, 128], strides = [1, 1, 1]} : vector<3x3x128xf32> to vector<1x1x128xf32>
    %26 = vector.shape_cast %25 : vector<1x1x128xf32> to vector<128xf32>
    %27 = vector.shape_cast %26 : vector<128xf32> to vector<1x1x1x128xf32>
    %28 = vector.broadcast %27 : vector<1x1x1x128xf32> to vector<1x4x4x128xf32>
    %29 = arith.mulf %24, %28 : vector<1x4x4x128xf32>
    %30 = arith.addf %23, %29 : vector<1x4x4x128xf32>
    %31 = vector.extract_strided_slice %6 {offsets = [0, 0, 0, 0], sizes = [1, 4, 4, 128], strides = [1, 1, 1, 1]} : vector<1x5x5x128xf32> to vector<1x4x4x128xf32>
    %32 = vector.extract_strided_slice %0 {offsets = [1, 0, 0], sizes = [1, 1, 128], strides = [1, 1, 1]} : vector<3x3x128xf32> to vector<1x1x128xf32>
    %33 = vector.shape_cast %32 : vector<1x1x128xf32> to vector<128xf32>
    %34 = vector.shape_cast %33 : vector<128xf32> to vector<1x1x1x128xf32>
    %35 = vector.broadcast %34 : vector<1x1x1x128xf32> to vector<1x4x4x128xf32>
    %36 = arith.mulf %31, %35 : vector<1x4x4x128xf32>
    %37 = arith.addf %30, %36 : vector<1x4x4x128xf32>
    %38 = vector.extract_strided_slice %8 {offsets = [0, 0, 0, 0], sizes = [1, 4, 4, 128], strides = [1, 1, 1, 1]} : vector<1x5x5x128xf32> to vector<1x4x4x128xf32>
    %39 = vector.extract_strided_slice %0 {offsets = [1, 1, 0], sizes = [1, 1, 128], strides = [1, 1, 1]} : vector<3x3x128xf32> to vector<1x1x128xf32>
    %40 = vector.shape_cast %39 : vector<1x1x128xf32> to vector<128xf32>
    %41 = vector.shape_cast %40 : vector<128xf32> to vector<1x1x1x128xf32>
    %42 = vector.broadcast %41 : vector<1x1x1x128xf32> to vector<1x4x4x128xf32>
    %43 = arith.mulf %38, %42 : vector<1x4x4x128xf32>
    %44 = arith.addf %37, %43 : vector<1x4x4x128xf32>
    %45 = vector.extract_strided_slice %6 {offsets = [0, 0, 1, 0], sizes = [1, 4, 4, 128], strides = [1, 1, 1, 1]} : vector<1x5x5x128xf32> to vector<1x4x4x128xf32>
    %46 = vector.extract_strided_slice %0 {offsets = [1, 2, 0], sizes = [1, 1, 128], strides = [1, 1, 1]} : vector<3x3x128xf32> to vector<1x1x128xf32>
    %47 = vector.shape_cast %46 : vector<1x1x128xf32> to vector<128xf32>
    %48 = vector.shape_cast %47 : vector<128xf32> to vector<1x1x1x128xf32>
    %49 = vector.broadcast %48 : vector<1x1x1x128xf32> to vector<1x4x4x128xf32>
    %50 = arith.mulf %45, %49 : vector<1x4x4x128xf32>
    %51 = arith.addf %44, %50 : vector<1x4x4x128xf32>
    %52 = vector.extract_strided_slice %2 {offsets = [0, 1, 0, 0], sizes = [1, 4, 4, 128], strides = [1, 1, 1, 1]} : vector<1x5x5x128xf32> to vector<1x4x4x128xf32>
    %53 = vector.extract_strided_slice %0 {offsets = [2, 0, 0], sizes = [1, 1, 128], strides = [1, 1, 1]} : vector<3x3x128xf32> to vector<1x1x128xf32>
    %54 = vector.shape_cast %53 : vector<1x1x128xf32> to vector<128xf32>
    %55 = vector.shape_cast %54 : vector<128xf32> to vector<1x1x1x128xf32>
    %56 = vector.broadcast %55 : vector<1x1x1x128xf32> to vector<1x4x4x128xf32>
    %57 = arith.mulf %52, %56 : vector<1x4x4x128xf32>
    %58 = arith.addf %51, %57 : vector<1x4x4x128xf32>
    %59 = vector.extract_strided_slice %4 {offsets = [0, 1, 0, 0], sizes = [1, 4, 4, 128], strides = [1, 1, 1, 1]} : vector<1x5x5x128xf32> to vector<1x4x4x128xf32>
    %60 = vector.extract_strided_slice %0 {offsets = [2, 1, 0], sizes = [1, 1, 128], strides = [1, 1, 1]} : vector<3x3x128xf32> to vector<1x1x128xf32>
    %61 = vector.shape_cast %60 : vector<1x1x128xf32> to vector<128xf32>
    %62 = vector.shape_cast %61 : vector<128xf32> to vector<1x1x1x128xf32>
    %63 = vector.broadcast %62 : vector<1x1x1x128xf32> to vector<1x4x4x128xf32>
    %64 = arith.mulf %59, %63 : vector<1x4x4x128xf32>
    %65 = arith.addf %58, %64 : vector<1x4x4x128xf32>
    %66 = vector.extract_strided_slice %2 {offsets = [0, 1, 1, 0], sizes = [1, 4, 4, 128], strides = [1, 1, 1, 1]} : vector<1x5x5x128xf32> to vector<1x4x4x128xf32>
    %67 = vector.extract_strided_slice %0 {offsets = [2, 2, 0], sizes = [1, 1, 128], strides = [1, 1, 1]} : vector<3x3x128xf32> to vector<1x1x128xf32>
    %68 = vector.shape_cast %67 : vector<1x1x128xf32> to vector<128xf32>
    %69 = vector.shape_cast %68 : vector<128xf32> to vector<1x1x1x128xf32>
    %70 = vector.broadcast %69 : vector<1x1x1x128xf32> to vector<1x4x4x128xf32>
    %71 = arith.mulf %66, %70 : vector<1x4x4x128xf32>
    %72 = arith.addf %65, %71 : vector<1x4x4x128xf32>
    %c0_18 = arith.constant 0 : index
    %c0_19 = arith.constant 0 : index
    %73 = vector.load %arg6[%c0_18, %c0_19] : memref<1x128xf32, #tpu.memory_space<vmem>>, vector<1x128xf32>
    %74 = vector.shape_cast %73 : vector<1x128xf32> to vector<1x1x1x128xf32>
    %75 = vector.broadcast %74 : vector<1x1x1x128xf32> to vector<1x4x4x128xf32>
    %76 = arith.addf %72, %75 : vector<1x4x4x128xf32>
    %77 = arith.truncf %76 : vector<1x4x4x128xf32> to vector<1x4x4x128xbf16>
    %c0_20 = arith.constant 0 : index
    %c0_21 = arith.constant 0 : index
    %c0_22 = arith.constant 0 : index
    %c0_23 = arith.constant 0 : index
    %78 = vector.load %arg7[%c0_20, %c0_21, %c0_22, %c0_23] : memref<1x4x4x128xbf16, #tpu.memory_space<vmem>>, vector<1x4x4x128xbf16>
    tpu.vector_store %arg7[%c0_20, %c0_21, %c0_22, %c0_23], %77 {strides = array<i32>} : memref<1x4x4x128xbf16, #tpu.memory_space<vmem>>, vector<1x4x4x128xbf16>,
    return
  }
  func.func @transform_0(%arg0: i32) -> (i32, i32, i32, i32) {
    %c0_i32 = arith.constant 0 : i32
    %c0_i32_0 = arith.constant 0 : i32
    %c0_i32_1 = arith.constant 0 : i32
    %c0_i32_2 = arith.constant 0 : i32
    return %arg0, %c0_i32, %c0_i32_0, %c0_i32_1 : i32, i32, i32, i32
  }
  func.func @transform_1(%arg0: i32) -> (i32, i32, i32, i32) {
    %c0_i32 = arith.constant 0 : i32
    %c0_i32_0 = arith.constant 0 : i32
    %c0_i32_1 = arith.constant 0 : i32
    %c0_i32_2 = arith.constant 0 : i32
    return %arg0, %c0_i32, %c0_i32_0, %c0_i32_1 : i32, i32, i32, i32
  }
  func.func @transform_2(%arg0: i32) -> (i32, i32, i32, i32) {
    %c0_i32 = arith.constant 0 : i32
    %c0_i32_0 = arith.constant 0 : i32
    %c0_i32_1 = arith.constant 0 : i32
    %c0_i32_2 = arith.constant 0 : i32
    return %arg0, %c0_i32, %c0_i32_0, %c0_i32_1 : i32, i32, i32, i32
  }
  func.func @transform_3(%arg0: i32) -> (i32, i32, i32, i32) {
    %c0_i32 = arith.constant 0 : i32
    %c0_i32_0 = arith.constant 0 : i32
    %c0_i32_1 = arith.constant 0 : i32
    %c0_i32_2 = arith.constant 0 : i32
    return %arg0, %c0_i32, %c0_i32_0, %c0_i32_1 : i32, i32, i32, i32
  }
  func.func @transform_4(%arg0: i32) -> (i32, i32, i32) {
    %c0_i32 = arith.constant 0 : i32
    %c0_i32_0 = arith.constant 0 : i32
    %c0_i32_1 = arith.constant 0 : i32
    %c0_i32_2 = arith.constant 0 : i32
    return %c0_i32, %c0_i32_0, %c0_i32_1 : i32, i32, i32
  }
  func.func @transform_5(%arg0: i32) -> (i32, i32) {
    %c0_i32 = arith.constant 0 : i32
    %c0_i32_0 = arith.constant 0 : i32
    %c0_i32_1 = arith.constant 0 : i32
    return %c0_i32, %c0_i32_0 : i32, i32
  }
  func.func @transform_6(%arg0: i32) -> (i32, i32, i32, i32) {
    %c0_i32 = arith.constant 0 : i32
    %c0_i32_0 = arith.constant 0 : i32
    %c0_i32_1 = arith.constant 0 : i32
    %c0_i32_2 = arith.constant 0 : i32
    return %arg0, %c0_i32, %c0_i32_0, %c0_i32_1 : i32, i32, i32, i32
  }
}

module attributes {stable_mosaic.version = 11 : i64} {
  func.func @dw3x3_phase_kernel(%arg0: i32, %arg1: memref<1x5x5x128xbf16, #tpu.memory_space<vmem>>, %arg2: memref<1x5x5x128xbf16, #tpu.memory_space<vmem>>, %arg3: memref<1x5x5x128xbf16, #tpu.memory_space<vmem>>, %arg4: memref<1x5x5x128xbf16, #tpu.memory_space<vmem>>, %arg5: memref<3x3x128xf32, #tpu.memory_space<vmem>>, %arg6: memref<1x128xf32, #tpu.memory_space<vmem>>, %arg7: memref<1x4x4x128xbf16, #tpu.memory_space<vmem>>) attributes {dimension_semantics = [#tpu.dimension_semantics<parallel>], iteration_bounds = array<i64: 2>, scalar_prefetch = 0 : i64, scratch_operands = 0 : i64, tpu.core_type = #tpu.core_type<tc>, window_params = [{transform_indices = @transform_0, window_bounds = array<i64: 1, 5, 5, 128>}, {transform_indices = @transform_1, window_bounds = array<i64: 1, 5, 5, 128>}, {transform_indices = @transform_2, window_bounds = array<i64: 1, 5, 5, 128>}, {transform_indices = @transform_3, window_bounds = array<i64: 1, 5, 5, 128>}, {pipeline_mode = #tpu.pipeline_mode<synchronous>, transform_indices = @transform_4, window_bounds = array<i64: 3, 3, 128>}, {pipeline_mode = #tpu.pipeline_mode<synchronous>, transform_indices = @transform_5, window_bounds = array<i64: 1, 128>}, {transform_indices = @transform_6, window_bounds = array<i64: 1, 4, 4, 128>}]} {
    %c0 = arith.constant 0 : index
    %c0_0 = arith.constant 0 : index
    %c0_1 = arith.constant 0 : index
    %0 = vector.load %arg5[%c0, %c0_0, %c0_1] : memref<3x3x128xf32, #tpu.memory_space<vmem>>, vector<3x3x128xf32>
    %c0_2 = arith.constant 0 : index
    %c0_3 = arith.constant 0 : index
    %c0_4 = arith.constant 0 : index
    %c0_5 = arith.constant 0 : index
    %1 = vector.load %arg1[%c0_2, %c0_3, %c0_4, %c0_5] : memref<1x5x5x128xbf16, #tpu.memory_space<vmem>>, vector<1x5x5x128xbf16>
    %2 = arith.extf %1 : vector<1x5x5x128xbf16> to vector<1x5x5x128xf32>
    %c0_6 = arith.constant 0 : index
    %c0_7 = arith.constant 0 : index
    %c0_8 = arith.constant 0 : index
    %c0_9 = arith.constant 0 : index
    %3 = vector.load %arg2[%c0_6, %c0_7, %c0_8, %c0_9] : memref<1x5x5x128xbf16, #tpu.memory_space<vmem>>, vector<1x5x5x128xbf16>
    %4 = arith.extf %3 : vector<1x5x5x128xbf16> to vector<1x5x5x128xf32>
    %c0_10 = arith.constant 0 : index
    %c0_11 = arith.constant 0 : index
    %c0_12 = arith.constant 0 : index
    %c0_13 = arith.constant 0 : index
    %5 = vector.load %arg3[%c0_10, %c0_11, %c0_12, %c0_13] : memref<1x5x5x128xbf16, #tpu.memory_space<vmem>>, vector<1x5x5x128xbf16>
    %6 = arith.extf %5 : vector<1x5x5x128xbf16> to vector<1x5x5x128xf32>
    %c0_14 = arith.constant 0 : index
    %c0_15 = arith.constant 0 : index
    %c0_16 = arith.constant 0 : index
    %c0_17 = arith.constant 0 : index
    %7 = vector.load %arg4[%c0_14, %c0_15, %c0_16, %c0_17] : memref<1x5x5x128xbf16, #tpu.memory_space<vmem>>, vector<1x5x5x128xbf16>
    %8 = arith.extf %7 : vector<1x5x5x128xbf16> to vector<1x5x5x128xf32>
    %cst = arith.constant 0.000000e+00 : f32
    %9 = vector.broadcast %cst : f32 to vector<1x4x4x128xf32>
    %10 = vector.extract_strided_slice %2 {offsets = [0, 0, 0, 0], sizes = [1, 4, 4, 128], strides = [1, 1, 1, 1]} : vector<1x5x5x128xf32> to vector<1x4x4x128xf32>
    %11 = vector.extract_strided_slice %0 {offsets = [0, 0, 0], sizes = [1, 1, 128], strides = [1, 1, 1]} : vector<3x3x128xf32> to vector<1x1x128xf32>
    %12 = vector.shape_cast %11 : vector<1x1x128xf32> to vector<128xf32>
    %13 = vector.shape_cast %12 : vector<128xf32> to vector<1x1x1x128xf32>
    %14 = vector.broadcast %13 : vector<1x1x1x128xf32> to vector<1x4x4x128xf32>
    %15 = arith.mulf %10, %14 : vector<1x4x4x128xf32>
    %16 = arith.addf %9, %15 : vector<1x4x4x128xf32>
    %17 = vector.extract_strided_slice %4 {offsets = [0, 0, 0, 0], sizes = [1, 4, 4, 128], strides = [1, 1, 1, 1]} : vector<1x5x5x128xf32> to vector<1x4x4x128xf32>
    %18 = vector.extract_strided_slice %0 {offsets = [0, 1, 0], sizes = [1, 1, 128], strides = [1, 1, 1]} : vector<3x3x128xf32> to vector<1x1x128xf32>
    %19 = vector.shape_cast %18 : vector<1x1x128xf32> to vector<128xf32>
    %20 = vector.shape_cast %19 : vector<128xf32> to vector<1x1x1x128xf32>
    %21 = vector.broadcast %20 : vector<1x1x1x128xf32> to vector<1x4x4x128xf32>
    %22 = arith.mulf %17, %21 : vector<1x4x4x128xf32>
    %23 = arith.addf %16, %22 : vector<1x4x4x128xf32>
    %24 = vector.extract_strided_slice %2 {offsets = [0, 0, 1, 0], sizes = [1, 4, 4, 128], strides = [1, 1, 1, 1]} : vector<1x5x5x128xf32> to vector<1x4x4x128xf32>
    %25 = vector.extract_strided_slice %0 {offsets = [0, 2, 0], sizes = [1, 1, 128], strides = [1, 1, 1]} : vector<3x3x128xf32> to vector<1x1x128xf32>
    %26 = vector.shape_cast %25 : vector<1x1x128xf32> to vector<128xf32>
    %27 = vector.shape_cast %26 : vector<128xf32> to vector<1x1x1x128xf32>
    %28 = vector.broadcast %27 : vector<1x1x1x128xf32> to vector<1x4x4x128xf32>
    %29 = arith.mulf %24, %28 : vector<1x4x4x128xf32>
    %30 = arith.addf %23, %29 : vector<1x4x4x128xf32>
    %31 = vector.extract_strided_slice %6 {offsets = [0, 0, 0, 0], sizes = [1, 4, 4, 128], strides = [1, 1, 1, 1]} : vector<1x5x5x128xf32> to vector<1x4x4x128xf32>
    %32 = vector.extract_strided_slice %0 {offsets = [1, 0, 0], sizes = [1, 1, 128], strides = [1, 1, 1]} : vector<3x3x128xf32> to vector<1x1x128xf32>
    %33 = vector.shape_cast %32 : vector<1x1x128xf32> to vector<128xf32>
    %34 = vector.shape_cast %33 : vector<128xf32> to vector<1x1x1x128xf32>
    %35 = vector.broadcast %34 : vector<1x1x1x128xf32> to vector<1x4x4x128xf32>
    %36 = arith.mulf %31, %35 : vector<1x4x4x128xf32>
    %37 = arith.addf %30, %36 : vector<1x4x4x128xf32>
    %38 = vector.extract_strided_slice %8 {offsets = [0, 0, 0, 0], sizes = [1, 4, 4, 128], strides = [1, 1, 1, 1]} : vector<1x5x5x128xf32> to vector<1x4x4x128xf32>
    %39 = vector.extract_strided_slice %0 {offsets = [1, 1, 0], sizes = [1, 1, 128], strides = [1, 1, 1]} : vector<3x3x128xf32> to vector<1x1x128xf32>
    %40 = vector.shape_cast %39 : vector<1x1x128xf32> to vector<128xf32>
    %41 = vector.shape_cast %40 : vector<128xf32> to vector<1x1x1x128xf32>
    %42 = vector.broadcast %41 : vector<1x1x1x128xf32> to vector<1x4x4x128xf32>
    %43 = arith.mulf %38, %42 : vector<1x4x4x128xf32>
    %44 = arith.addf %37, %43 : vector<1x4x4x128xf32>
    %45 = vector.extract_strided_slice %6 {offsets = [0, 0, 1, 0], sizes = [1, 4, 4, 128], strides = [1, 1, 1, 1]} : vector<1x5x5x128xf32> to vector<1x4x4x128xf32>
    %46 = vector.extract_strided_slice %0 {offsets = [1, 2, 0], sizes = [1, 1, 128], strides = [1, 1, 1]} : vector<3x3x128xf32> to vector<1x1x128xf32>
    %47 = vector.shape_cast %46 : vector<1x1x128xf32> to vector<128xf32>
    %48 = vector.shape_cast %47 : vector<128xf32> to vector<1x1x1x128xf32>
    %49 = vector.broadcast %48 : vector<1x1x1x128xf32> to vector<1x4x4x128xf32>
    %50 = arith.mulf %45, %49 : vector<1x4x4x128xf32>
    %51 = arith.addf %44, %50 : vector<1x4x4x128xf32>
    %52 = vector.extract_strided_slice %2 {offsets = [0, 1, 0, 0], sizes = [1, 4, 4, 128], strides = [1, 1, 1, 1]} : vector<1x5x5x128xf32> to vector<1x4x4x128xf32>
    %53 = vector.extract_strided_slice %0 {offsets = [2, 0, 0], sizes = [1, 1, 128], strides = [1, 1, 1]} : vector<3x3x128xf32> to vector<1x1x128xf32>
    %54 = vector.shape_cast %53 : vector<1x1x128xf32> to vector<128xf32>
    %55 = vector.shape_cast %54 : vector<128xf32> to vector<1x1x1x128xf32>
    %56 = vector.broadcast %55 : vector<1x1x1x128xf32> to vector<1x4x4x128xf32>
    %57 = arith.mulf %52, %56 : vector<1x4x4x128xf32>
    %58 = arith.addf %51, %57 : vector<1x4x4x128xf32>
    %59 = vector.extract_strided_slice %4 {offsets = [0, 1, 0, 0], sizes = [1, 4, 4, 128], strides = [1, 1, 1, 1]} : vector<1x5x5x128xf32> to vector<1x4x4x128xf32>
    %60 = vector.extract_strided_slice %0 {offsets = [2, 1, 0], sizes = [1, 1, 128], strides = [1, 1, 1]} : vector<3x3x128xf32> to vector<1x1x128xf32>
    %61 = vector.shape_cast %60 : vector<1x1x128xf32> to vector<128xf32>
    %62 = vector.shape_cast %61 : vector<128xf32> to vector<1x1x1x128xf32>
    %63 = vector.broadcast %62 : vector<1x1x1x128xf32> to vector<1x4x4x128xf32>
    %64 = arith.mulf %59, %63 : vector<1x4x4x128xf32>
    %65 = arith.addf %58, %64 : vector<1x4x4x128xf32>
    %66 = vector.extract_strided_slice %2 {offsets = [0, 1, 1, 0], sizes = [1, 4, 4, 128], strides = [1, 1, 1, 1]} : vector<1x5x5x128xf32> to vector<1x4x4x128xf32>
    %67 = vector.extract_strided_slice %0 {offsets = [2, 2, 0], sizes = [1, 1, 128], strides = [1, 1, 1]} : vector<3x3x128xf32> to vector<1x1x128xf32>
    %68 = vector.shape_cast %67 : vector<1x1x128xf32> to vector<128xf32>
    %69 = vector.shape_cast %68 : vector<128xf32> to vector<1x1x1x128xf32>
    %70 = vector.broadcast %69 : vector<1x1x1x128xf32> to vector<1x4x4x128xf32>
    %71 = arith.mulf %66, %70 : vector<1x4x4x128xf32>
    %72 = arith.addf %65, %71 : vector<1x4x4x128xf32>
    %c0_18 = arith.constant 0 : index
    %c0_19 = arith.constant 0 : index
    %73 = vector.load %arg6[%c0_18, %c0_19] : memref<1x128xf32, #tpu.memory_space<vmem>>, vector<1x128xf32>
    %74 = vector.shape_cast %73 : vector<1x128xf32> to vector<1x1x1x128xf32>
    %75 = vector.broadcast %74 : vector<1x1x1x128xf32> to vector<1x4x4x128xf32>
    %76 = arith.addf %72, %75 : vector<1x4x4x128xf32>
    %cst_20 = arith.constant 0.000000e+00 : f32
    %77 = vector.broadcast %cst_20 : f32 to vector<1x4x4x128xf32>
    %78 = arith.maximumf %76, %77 : vector<1x4x4x128xf32>
    %79 = arith.truncf %78 : vector<1x4x4x128xf32> to vector<1x4x4x128xbf16>
    %c0_21 = arith.constant 0 : index
    %c0_22 = arith.constant 0 : index
    %c0_23 = arith.constant 0 : index
    %c0_24 = arith.constant 0 : index
    %80 = vector.load %arg7[%c0_21, %c0_22, %c0_23, %c0_24] : memref<1x4x4x128xbf16, #tpu.memory_space<vmem>>, vector<1x4x4x128xbf16>
    tpu.vector_store %arg7[%c0_21, %c0_22, %c0_23, %c0_24], %79 {strides = array<i32>} : memref<1x4x4x128xbf16, #tpu.memory_space<vmem>>, vector<1x4x4x128xbf16>,
    return
  }
  func.func @transform_0(%arg0: i32) -> (i32, i32, i32, i32) {
    %c0_i32 = arith.constant 0 : i32
    %c0_i32_0 = arith.constant 0 : i32
    %c0_i32_1 = arith.constant 0 : i32
    %c0_i32_2 = arith.constant 0 : i32
    return %arg0, %c0_i32, %c0_i32_0, %c0_i32_1 : i32, i32, i32, i32
  }
  func.func @transform_1(%arg0: i32) -> (i32, i32, i32, i32) {
    %c0_i32 = arith.constant 0 : i32
    %c0_i32_0 = arith.constant 0 : i32
    %c0_i32_1 = arith.constant 0 : i32
    %c0_i32_2 = arith.constant 0 : i32
    return %arg0, %c0_i32, %c0_i32_0, %c0_i32_1 : i32, i32, i32, i32
  }
  func.func @transform_2(%arg0: i32) -> (i32, i32, i32, i32) {
    %c0_i32 = arith.constant 0 : i32
    %c0_i32_0 = arith.constant 0 : i32
    %c0_i32_1 = arith.constant 0 : i32
    %c0_i32_2 = arith.constant 0 : i32
    return %arg0, %c0_i32, %c0_i32_0, %c0_i32_1 : i32, i32, i32, i32
  }
  func.func @transform_3(%arg0: i32) -> (i32, i32, i32, i32) {
    %c0_i32 = arith.constant 0 : i32
    %c0_i32_0 = arith.constant 0 : i32
    %c0_i32_1 = arith.constant 0 : i32
    %c0_i32_2 = arith.constant 0 : i32
    return %arg0, %c0_i32, %c0_i32_0, %c0_i32_1 : i32, i32, i32, i32
  }
  func.func @transform_4(%arg0: i32) -> (i32, i32, i32) {
    %c0_i32 = arith.constant 0 : i32
    %c0_i32_0 = arith.constant 0 : i32
    %c0_i32_1 = arith.constant 0 : i32
    %c0_i32_2 = arith.constant 0 : i32
    return %c0_i32, %c0_i32_0, %c0_i32_1 : i32, i32, i32
  }
  func.func @transform_5(%arg0: i32) -> (i32, i32) {
    %c0_i32 = arith.constant 0 : i32
    %c0_i32_0 = arith.constant 0 : i32
    %c0_i32_1 = arith.constant 0 : i32
    return %c0_i32, %c0_i32_0 : i32, i32
  }
  func.func @transform_6(%arg0: i32) -> (i32, i32, i32, i32) {
    %c0_i32 = arith.constant 0 : i32
    %c0_i32_0 = arith.constant 0 : i32
    %c0_i32_1 = arith.constant 0 : i32
    %c0_i32_2 = arith.constant 0 : i32
    return %arg0, %c0_i32, %c0_i32_0, %c0_i32_1 : i32, i32, i32, i32
  }
}

module attributes {stable_mosaic.version = 11 : i64} {
  func.func @gemm_kernel(%arg0: i32, %arg1: i32, %arg2: memref<32x128xbf16, #tpu.memory_space<vmem>>, %arg3: memref<128x128xbf16, #tpu.memory_space<vmem>>, %arg4: memref<1x128xf32, #tpu.memory_space<vmem>>, %arg5: memref<32x128xbf16, #tpu.memory_space<vmem>>, %arg6: memref<32x128xbf16, #tpu.memory_space<vmem>>) attributes {dimension_semantics = [#tpu.dimension_semantics<parallel>, #tpu.dimension_semantics<parallel>], iteration_bounds = array<i64: 1, 1>, scalar_prefetch = 0 : i64, scratch_operands = 0 : i64, tpu.core_type = #tpu.core_type<tc>, window_params = [{transform_indices = @transform_0, window_bounds = array<i64: 32, 128>}, {transform_indices = @transform_1, window_bounds = array<i64: 128, 128>}, {transform_indices = @transform_2, window_bounds = array<i64: 1, 128>}, {transform_indices = @transform_3, window_bounds = array<i64: 32, 128>}, {transform_indices = @transform_4, window_bounds = array<i64: 32, 128>}]} {
    %c0 = arith.constant 0 : index
    %c0_0 = arith.constant 0 : index
    %0 = vector.load %arg2[%c0, %c0_0] : memref<32x128xbf16, #tpu.memory_space<vmem>>, vector<32x128xbf16>
    %c0_1 = arith.constant 0 : index
    %c0_2 = arith.constant 0 : index
    %1 = vector.load %arg3[%c0_1, %c0_2] : memref<128x128xbf16, #tpu.memory_space<vmem>>, vector<128x128xbf16>
    %cst = arith.constant dense<0.000000e+00> : vector<32x128xf32>
    %2 = tpu.matmul %0, %1, %cst {dimension_numbers = #tpu.dot_dimension_numbers<[1], [0], [0], [1], [0, 0, 1, 1], [], []>} : vector<32x128xbf16>, vector<128x128xbf16>, vector<32x128xf32> -> vector<32x128xf32>
    %c0_3 = arith.constant 0 : index
    %c0_4 = arith.constant 0 : index
    %3 = vector.load %arg4[%c0_3, %c0_4] : memref<1x128xf32, #tpu.memory_space<vmem>>, vector<1x128xf32>
    %4 = vector.broadcast %3 : vector<1x128xf32> to vector<32x128xf32>
    %5 = arith.addf %2, %4 : vector<32x128xf32>
    %c0_5 = arith.constant 0 : index
    %c0_6 = arith.constant 0 : index
    %6 = vector.load %arg5[%c0_5, %c0_6] : memref<32x128xbf16, #tpu.memory_space<vmem>>, vector<32x128xbf16>
    %7 = arith.extf %6 : vector<32x128xbf16> to vector<32x128xf32>
    %8 = arith.addf %5, %7 : vector<32x128xf32>
    %cst_7 = arith.constant 0.000000e+00 : f32
    %9 = vector.broadcast %cst_7 : f32 to vector<32x128xf32>
    %10 = arith.maximumf %8, %9 : vector<32x128xf32>
    %11 = arith.truncf %10 : vector<32x128xf32> to vector<32x128xbf16>
    %c0_8 = arith.constant 0 : index
    %c0_9 = arith.constant 0 : index
    %12 = vector.load %arg6[%c0_8, %c0_9] : memref<32x128xbf16, #tpu.memory_space<vmem>>, vector<32x128xbf16>
    tpu.vector_store %arg6[%c0_8, %c0_9], %11 {strides = array<i32>} : memref<32x128xbf16, #tpu.memory_space<vmem>>, vector<32x128xbf16>,
    return
  }
  func.func @transform_0(%arg0: i32, %arg1: i32) -> (i32, i32) {
    %c0_i32 = arith.constant 0 : i32
    %c0_i32_0 = arith.constant 0 : i32
    return %arg0, %c0_i32 : i32, i32
  }
  func.func @transform_1(%arg0: i32, %arg1: i32) -> (i32, i32) {
    %c0_i32 = arith.constant 0 : i32
    %c0_i32_0 = arith.constant 0 : i32
    return %c0_i32, %arg1 : i32, i32
  }
  func.func @transform_2(%arg0: i32, %arg1: i32) -> (i32, i32) {
    %c0_i32 = arith.constant 0 : i32
    %c0_i32_0 = arith.constant 0 : i32
    return %c0_i32, %arg1 : i32, i32
  }
  func.func @transform_3(%arg0: i32, %arg1: i32) -> (i32, i32) {
    %c0_i32 = arith.constant 0 : i32
    return %arg0, %arg1 : i32, i32
  }
  func.func @transform_4(%arg0: i32, %arg1: i32) -> (i32, i32) {
    %c0_i32 = arith.constant 0 : i32
    return %arg0, %arg1 : i32, i32
  }
}

module attributes {stable_mosaic.version = 11 : i64} {
  func.func @gap_kernel(%arg0: i32, %arg1: memref<1x16x128xbf16, #tpu.memory_space<vmem>>, %arg2: memref<1x1x128xf32, #tpu.memory_space<vmem>>) attributes {dimension_semantics = [#tpu.dimension_semantics<parallel>], iteration_bounds = array<i64: 2>, scalar_prefetch = 0 : i64, scratch_operands = 0 : i64, tpu.core_type = #tpu.core_type<tc>, window_params = [{transform_indices = @transform_0, window_bounds = array<i64: 1, 16, 128>}, {transform_indices = @transform_1, window_bounds = array<i64: 1, 1, 128>}]} {
    %c0 = arith.constant 0 : index
    %c0_0 = arith.constant 0 : index
    %c0_1 = arith.constant 0 : index
    %0 = vector.load %arg1[%c0, %c0_0, %c0_1] : memref<1x16x128xbf16, #tpu.memory_space<vmem>>, vector<1x16x128xbf16>
    %1 = arith.extf %0 : vector<1x16x128xbf16> to vector<1x16x128xf32>
    %cst = arith.constant dense<0.000000e+00> : vector<1x128xf32>
    %2 = vector.multi_reduction <add>, %1, %cst [1] : vector<1x16x128xf32> to vector<1x128xf32>
    %3 = vector.shape_cast %2 : vector<1x128xf32> to vector<1x1x128xf32>
    %cst_2 = arith.constant 1.600000e+01 : f32
    %4 = vector.broadcast %cst_2 : f32 to vector<1x1x128xf32>
    %5 = arith.divf %3, %4 : vector<1x1x128xf32>
    %c0_3 = arith.constant 0 : index
    %c0_4 = arith.constant 0 : index
    %c0_5 = arith.constant 0 : index
    %6 = vector.load %arg2[%c0_3, %c0_4, %c0_5] : memref<1x1x128xf32, #tpu.memory_space<vmem>>, vector<1x1x128xf32>
    tpu.vector_store %arg2[%c0_3, %c0_4, %c0_5], %5 {strides = array<i32>} : memref<1x1x128xf32, #tpu.memory_space<vmem>>, vector<1x1x128xf32>,
    return
  }
  func.func @transform_0(%arg0: i32) -> (i32, i32, i32) {
    %c0_i32 = arith.constant 0 : i32
    %c0_i32_0 = arith.constant 0 : i32
    %c0_i32_1 = arith.constant 0 : i32
    return %arg0, %c0_i32, %c0_i32_0 : i32, i32, i32
  }
  func.func @transform_1(%arg0: i32) -> (i32, i32, i32) {
    %c0_i32 = arith.constant 0 : i32
    %c0_i32_0 = arith.constant 0 : i32
    %c0_i32_1 = arith.constant 0 : i32
    return %arg0, %c0_i32, %c0_i32_0 : i32, i32, i32
  }
}

module attributes {stable_mosaic.version = 11 : i64} {
  func.func @gemm_kernel(%arg0: i32, %arg1: i32, %arg2: memref<32x128xbf16, #tpu.memory_space<vmem>>, %arg3: memref<128x128xbf16, #tpu.memory_space<vmem>>, %arg4: memref<1x128xf32, #tpu.memory_space<vmem>>, %arg5: memref<32x128xbf16, #tpu.memory_space<vmem>>) attributes {dimension_semantics = [#tpu.dimension_semantics<parallel>, #tpu.dimension_semantics<parallel>], iteration_bounds = array<i64: 1, 1>, scalar_prefetch = 0 : i64, scratch_operands = 0 : i64, tpu.core_type = #tpu.core_type<tc>, window_params = [{transform_indices = @transform_0, window_bounds = array<i64: 32, 128>}, {transform_indices = @transform_1, window_bounds = array<i64: 128, 128>}, {transform_indices = @transform_2, window_bounds = array<i64: 1, 128>}, {transform_indices = @transform_3, window_bounds = array<i64: 32, 128>}]} {
    %c0 = arith.constant 0 : index
    %c0_0 = arith.constant 0 : index
    %0 = vector.load %arg2[%c0, %c0_0] : memref<32x128xbf16, #tpu.memory_space<vmem>>, vector<32x128xbf16>
    %c0_1 = arith.constant 0 : index
    %c0_2 = arith.constant 0 : index
    %1 = vector.load %arg3[%c0_1, %c0_2] : memref<128x128xbf16, #tpu.memory_space<vmem>>, vector<128x128xbf16>
    %cst = arith.constant dense<0.000000e+00> : vector<32x128xf32>
    %2 = tpu.matmul %0, %1, %cst {dimension_numbers = #tpu.dot_dimension_numbers<[1], [0], [0], [1], [0, 0, 1, 1], [], []>} : vector<32x128xbf16>, vector<128x128xbf16>, vector<32x128xf32> -> vector<32x128xf32>
    %c0_3 = arith.constant 0 : index
    %c0_4 = arith.constant 0 : index
    %3 = vector.load %arg4[%c0_3, %c0_4] : memref<1x128xf32, #tpu.memory_space<vmem>>, vector<1x128xf32>
    %4 = vector.broadcast %3 : vector<1x128xf32> to vector<32x128xf32>
    %5 = arith.addf %2, %4 : vector<32x128xf32>
    %cst_5 = arith.constant 0.000000e+00 : f32
    %6 = vector.broadcast %cst_5 : f32 to vector<32x128xf32>
    %7 = arith.maximumf %5, %6 : vector<32x128xf32>
    %8 = arith.truncf %7 : vector<32x128xf32> to vector<32x128xbf16>
    %c0_6 = arith.constant 0 : index
    %c0_7 = arith.constant 0 : index
    %9 = vector.load %arg5[%c0_6, %c0_7] : memref<32x128xbf16, #tpu.memory_space<vmem>>, vector<32x128xbf16>
    tpu.vector_store %arg5[%c0_6, %c0_7], %8 {strides = array<i32>} : memref<32x128xbf16, #tpu.memory_space<vmem>>, vector<32x128xbf16>,
    return
  }
  func.func @transform_0(%arg0: i32, %arg1: i32) -> (i32, i32) {
    %c0_i32 = arith.constant 0 : i32
    %c0_i32_0 = arith.constant 0 : i32
    return %arg0, %c0_i32 : i32, i32
  }
  func.func @transform_1(%arg0: i32, %arg1: i32) -> (i32, i32) {
    %c0_i32 = arith.constant 0 : i32
    %c0_i32_0 = arith.constant 0 : i32
    return %c0_i32, %arg1 : i32, i32
  }
  func.func @transform_2(%arg0: i32, %arg1: i32) -> (i32, i32) {
    %c0_i32 = arith.constant 0 : i32
    %c0_i32_0 = arith.constant 0 : i32
    return %c0_i32, %arg1 : i32, i32
  }
  func.func @transform_3(%arg0: i32, %arg1: i32) -> (i32, i32) {
    %c0_i32 = arith.constant 0 : i32
    return %arg0, %arg1 : i32, i32
  }
}

module attributes {stable_mosaic.version = 11 : i64} {
  func.func @dw3x3_s1_kernel(%arg0: i32, %arg1: i32, %arg2: memref<1x4x4x128xbf16, #tpu.memory_space<vmem>>, %arg3: memref<3x3x128xf32, #tpu.memory_space<vmem>>, %arg4: memref<1x128xf32, #tpu.memory_space<vmem>>, %arg5: memref<1x4x4x128xbf16, #tpu.memory_space<vmem>>, %arg6: memref<1x6x6x128xf32, #tpu.memory_space<vmem>>) attributes {dimension_semantics = [#tpu.dimension_semantics<parallel>, #tpu.dimension_semantics<arbitrary>], iteration_bounds = array<i64: 2, 1>, scalar_prefetch = 0 : i64, scratch_operands = 1 : i64, tpu.core_type = #tpu.core_type<tc>, window_params = [{transform_indices = @transform_0, window_bounds = array<i64: 1, 4, 4, 128>}, {pipeline_mode = #tpu.pipeline_mode<synchronous>, transform_indices = @transform_1, window_bounds = array<i64: 3, 3, 128>}, {pipeline_mode = #tpu.pipeline_mode<synchronous>, transform_indices = @transform_2, window_bounds = array<i64: 1, 128>}, {transform_indices = @transform_3, window_bounds = array<i64: 1, 4, 4, 128>}]} {
    %c0_i32 = arith.constant 0 : i32
    %0 = arith.cmpi eq, %arg1, %c0_i32 : i32
    %1 = arith.extui %0 : i1 to i32
    %c0_i32_0 = arith.constant 0 : i32
    %2 = arith.cmpi ne, %1, %c0_i32_0 : i32
    scf.if %2 {
      %cst_17 = arith.constant 0.000000e+00 : f32
      %83 = vector.broadcast %cst_17 : f32 to vector<1x6x6x128xf32>
      %c0_18 = arith.constant 0 : index
      %c0_19 = arith.constant 0 : index
      %c0_20 = arith.constant 0 : index
      %c0_21 = arith.constant 0 : index
      %84 = vector.load %arg6[%c0_18, %c0_19, %c0_20, %c0_21] : memref<1x6x6x128xf32, #tpu.memory_space<vmem>>, vector<1x6x6x128xf32>
      tpu.vector_store %arg6[%c0_18, %c0_19, %c0_20, %c0_21], %83 {strides = array<i32>} : memref<1x6x6x128xf32, #tpu.memory_space<vmem>>, vector<1x6x6x128xf32>,
      %c0_22 = arith.constant 0 : index
      %c0_23 = arith.constant 0 : index
      %c0_24 = arith.constant 0 : index
      %c0_25 = arith.constant 0 : index
      %85 = vector.load %arg2[%c0_22, %c0_23, %c0_24, %c0_25] : memref<1x4x4x128xbf16, #tpu.memory_space<vmem>>, vector<1x4x4x128xbf16>
      %86 = arith.extf %85 : vector<1x4x4x128xbf16> to vector<1x4x4x128xf32>
      %c0_26 = arith.constant 0 : index
      %c1_27 = arith.constant 1 : index
      %c1_28 = arith.constant 1 : index
      %c0_29 = arith.constant 0 : index
      %87 = vector.load %arg6[%c0_26, %c1_27, %c1_28, %c0_29] : memref<1x6x6x128xf32, #tpu.memory_space<vmem>>, vector<1x4x4x128xf32>
      tpu.vector_store %arg6[%c0_26, %c1_27, %c1_28, %c0_29], %86 {strides = array<i32>} : memref<1x6x6x128xf32, #tpu.memory_space<vmem>>, vector<1x4x4x128xf32>,
    } else {
    }
    %c0 = arith.constant 0 : index
    %c0_1 = arith.constant 0 : index
    %c0_2 = arith.constant 0 : index
    %3 = vector.load %arg3[%c0, %c0_1, %c0_2] : memref<3x3x128xf32, #tpu.memory_space<vmem>>, vector<3x3x128xf32>
    %c0_3 = arith.constant 0 : index
    %c0_4 = arith.constant 0 : index
    %4 = vector.load %arg4[%c0_3, %c0_4] : memref<1x128xf32, #tpu.memory_space<vmem>>, vector<1x128xf32>
    %5 = vector.shape_cast %4 : vector<1x128xf32> to vector<1x1x1x128xf32>
    %c4_i32 = arith.constant 4 : i32
    %6 = arith.muli %arg1, %c4_i32 : i32
    %cst = arith.constant 0.000000e+00 : f32
    %7 = vector.broadcast %cst : f32 to vector<1x4x4x128xf32>
    %c0_5 = arith.constant 0 : index
    %8 = arith.index_cast %6 : i32 to index
    %c0_6 = arith.constant 0 : index
    %c0_7 = arith.constant 0 : index
    %9 = vector.load %arg6[%c0_5, %8, %c0_6, %c0_7] : memref<1x6x6x128xf32, #tpu.memory_space<vmem>>, vector<1x6x4x128xf32>
    %10 = vector.extract_strided_slice %9 {offsets = [0, 0, 0, 0], sizes = [1, 4, 4, 128], strides = [1, 1, 1, 1]} : vector<1x6x4x128xf32> to vector<1x4x4x128xf32>
    %11 = vector.extract_strided_slice %3 {offsets = [0, 0, 0], sizes = [1, 1, 128], strides = [1, 1, 1]} : vector<3x3x128xf32> to vector<1x1x128xf32>
    %12 = vector.shape_cast %11 : vector<1x1x128xf32> to vector<128xf32>
    %13 = vector.shape_cast %12 : vector<128xf32> to vector<1x1x1x128xf32>
    %14 = vector.broadcast %13 : vector<1x1x1x128xf32> to vector<1x4x4x128xf32>
    %15 = arith.mulf %10, %14 : vector<1x4x4x128xf32>
    %16 = arith.addf %7, %15 : vector<1x4x4x128xf32>
    %17 = vector.extract_strided_slice %9 {offsets = [0, 1, 0, 0], sizes = [1, 4, 4, 128], strides = [1, 1, 1, 1]} : vector<1x6x4x128xf32> to vector<1x4x4x128xf32>
    %18 = vector.extract_strided_slice %3 {offsets = [1, 0, 0], sizes = [1, 1, 128], strides = [1, 1, 1]} : vector<3x3x128xf32> to vector<1x1x128xf32>
    %19 = vector.shape_cast %18 : vector<1x1x128xf32> to vector<128xf32>
    %20 = vector.shape_cast %19 : vector<128xf32> to vector<1x1x1x128xf32>
    %21 = vector.broadcast %20 : vector<1x1x1x128xf32> to vector<1x4x4x128xf32>
    %22 = arith.mulf %17, %21 : vector<1x4x4x128xf32>
    %23 = arith.addf %16, %22 : vector<1x4x4x128xf32>
    %24 = vector.extract_strided_slice %9 {offsets = [0, 2, 0, 0], sizes = [1, 4, 4, 128], strides = [1, 1, 1, 1]} : vector<1x6x4x128xf32> to vector<1x4x4x128xf32>
    %25 = vector.extract_strided_slice %3 {offsets = [2, 0, 0], sizes = [1, 1, 128], strides = [1, 1, 1]} : vector<3x3x128xf32> to vector<1x1x128xf32>
    %26 = vector.shape_cast %25 : vector<1x1x128xf32> to vector<128xf32>
    %27 = vector.shape_cast %26 : vector<128xf32> to vector<1x1x1x128xf32>
    %28 = vector.broadcast %27 : vector<1x1x1x128xf32> to vector<1x4x4x128xf32>
    %29 = arith.mulf %24, %28 : vector<1x4x4x128xf32>
    %30 = arith.addf %23, %29 : vector<1x4x4x128xf32>
    %c0_8 = arith.constant 0 : index
    %31 = arith.index_cast %6 : i32 to index
    %c1 = arith.constant 1 : index
    %c0_9 = arith.constant 0 : index
    %32 = vector.load %arg6[%c0_8, %31, %c1, %c0_9] : memref<1x6x6x128xf32, #tpu.memory_space<vmem>>, vector<1x6x4x128xf32>
    %33 = vector.extract_strided_slice %32 {offsets = [0, 0, 0, 0], sizes = [1, 4, 4, 128], strides = [1, 1, 1, 1]} : vector<1x6x4x128xf32> to vector<1x4x4x128xf32>
    %34 = vector.extract_strided_slice %3 {offsets = [0, 1, 0], sizes = [1, 1, 128], strides = [1, 1, 1]} : vector<3x3x128xf32> to vector<1x1x128xf32>
    %35 = vector.shape_cast %34 : vector<1x1x128xf32> to vector<128xf32>
    %36 = vector.shape_cast %35 : vector<128xf32> to vector<1x1x1x128xf32>
    %37 = vector.broadcast %36 : vector<1x1x1x128xf32> to vector<1x4x4x128xf32>
    %38 = arith.mulf %33, %37 : vector<1x4x4x128xf32>
    %39 = arith.addf %30, %38 : vector<1x4x4x128xf32>
    %40 = vector.extract_strided_slice %32 {offsets = [0, 1, 0, 0], sizes = [1, 4, 4, 128], strides = [1, 1, 1, 1]} : vector<1x6x4x128xf32> to vector<1x4x4x128xf32>
    %41 = vector.extract_strided_slice %3 {offsets = [1, 1, 0], sizes = [1, 1, 128], strides = [1, 1, 1]} : vector<3x3x128xf32> to vector<1x1x128xf32>
    %42 = vector.shape_cast %41 : vector<1x1x128xf32> to vector<128xf32>
    %43 = vector.shape_cast %42 : vector<128xf32> to vector<1x1x1x128xf32>
    %44 = vector.broadcast %43 : vector<1x1x1x128xf32> to vector<1x4x4x128xf32>
    %45 = arith.mulf %40, %44 : vector<1x4x4x128xf32>
    %46 = arith.addf %39, %45 : vector<1x4x4x128xf32>
    %47 = vector.extract_strided_slice %32 {offsets = [0, 2, 0, 0], sizes = [1, 4, 4, 128], strides = [1, 1, 1, 1]} : vector<1x6x4x128xf32> to vector<1x4x4x128xf32>
    %48 = vector.extract_strided_slice %3 {offsets = [2, 1, 0], sizes = [1, 1, 128], strides = [1, 1, 1]} : vector<3x3x128xf32> to vector<1x1x128xf32>
    %49 = vector.shape_cast %48 : vector<1x1x128xf32> to vector<128xf32>
    %50 = vector.shape_cast %49 : vector<128xf32> to vector<1x1x1x128xf32>
    %51 = vector.broadcast %50 : vector<1x1x1x128xf32> to vector<1x4x4x128xf32>
    %52 = arith.mulf %47, %51 : vector<1x4x4x128xf32>
    %53 = arith.addf %46, %52 : vector<1x4x4x128xf32>
    %c0_10 = arith.constant 0 : index
    %54 = arith.index_cast %6 : i32 to index
    %c2 = arith.constant 2 : index
    %c0_11 = arith.constant 0 : index
    %55 = vector.load %arg6[%c0_10, %54, %c2, %c0_11] : memref<1x6x6x128xf32, #tpu.memory_space<vmem>>, vector<1x6x4x128xf32>
    %56 = vector.extract_strided_slice %55 {offsets = [0, 0, 0, 0], sizes = [1, 4, 4, 128], strides = [1, 1, 1, 1]} : vector<1x6x4x128xf32> to vector<1x4x4x128xf32>
    %57 = vector.extract_strided_slice %3 {offsets = [0, 2, 0], sizes = [1, 1, 128], strides = [1, 1, 1]} : vector<3x3x128xf32> to vector<1x1x128xf32>
    %58 = vector.shape_cast %57 : vector<1x1x128xf32> to vector<128xf32>
    %59 = vector.shape_cast %58 : vector<128xf32> to vector<1x1x1x128xf32>
    %60 = vector.broadcast %59 : vector<1x1x1x128xf32> to vector<1x4x4x128xf32>
    %61 = arith.mulf %56, %60 : vector<1x4x4x128xf32>
    %62 = arith.addf %53, %61 : vector<1x4x4x128xf32>
    %63 = vector.extract_strided_slice %55 {offsets = [0, 1, 0, 0], sizes = [1, 4, 4, 128], strides = [1, 1, 1, 1]} : vector<1x6x4x128xf32> to vector<1x4x4x128xf32>
    %64 = vector.extract_strided_slice %3 {offsets = [1, 2, 0], sizes = [1, 1, 128], strides = [1, 1, 1]} : vector<3x3x128xf32> to vector<1x1x128xf32>
    %65 = vector.shape_cast %64 : vector<1x1x128xf32> to vector<128xf32>
    %66 = vector.shape_cast %65 : vector<128xf32> to vector<1x1x1x128xf32>
    %67 = vector.broadcast %66 : vector<1x1x1x128xf32> to vector<1x4x4x128xf32>
    %68 = arith.mulf %63, %67 : vector<1x4x4x128xf32>
    %69 = arith.addf %62, %68 : vector<1x4x4x128xf32>
    %70 = vector.extract_strided_slice %55 {offsets = [0, 2, 0, 0], sizes = [1, 4, 4, 128], strides = [1, 1, 1, 1]} : vector<1x6x4x128xf32> to vector<1x4x4x128xf32>
    %71 = vector.extract_strided_slice %3 {offsets = [2, 2, 0], sizes = [1, 1, 128], strides = [1, 1, 1]} : vector<3x3x128xf32> to vector<1x1x128xf32>
    %72 = vector.shape_cast %71 : vector<1x1x128xf32> to vector<128xf32>
    %73 = vector.shape_cast %72 : vector<128xf32> to vector<1x1x1x128xf32>
    %74 = vector.broadcast %73 : vector<1x1x1x128xf32> to vector<1x4x4x128xf32>
    %75 = arith.mulf %70, %74 : vector<1x4x4x128xf32>
    %76 = arith.addf %69, %75 : vector<1x4x4x128xf32>
    %77 = vector.broadcast %5 : vector<1x1x1x128xf32> to vector<1x4x4x128xf32>
    %78 = arith.addf %76, %77 : vector<1x4x4x128xf32>
    %cst_12 = arith.constant 0.000000e+00 : f32
    %79 = vector.broadcast %cst_12 : f32 to vector<1x4x4x128xf32>
    %80 = arith.maximumf %78, %79 : vector<1x4x4x128xf32>
    %81 = arith.truncf %80 : vector<1x4x4x128xf32> to vector<1x4x4x128xbf16>
    %c0_13 = arith.constant 0 : index
    %c0_14 = arith.constant 0 : index
    %c0_15 = arith.constant 0 : index
    %c0_16 = arith.constant 0 : index
    %82 = vector.load %arg5[%c0_13, %c0_14, %c0_15, %c0_16] : memref<1x4x4x128xbf16, #tpu.memory_space<vmem>>, vector<1x4x4x128xbf16>
    tpu.vector_store %arg5[%c0_13, %c0_14, %c0_15, %c0_16], %81 {strides = array<i32>} : memref<1x4x4x128xbf16, #tpu.memory_space<vmem>>, vector<1x4x4x128xbf16>,
    return
  }
  func.func @transform_0(%arg0: i32, %arg1: i32) -> (i32, i32, i32, i32) {
    %c0_i32 = arith.constant 0 : i32
    %c0_i32_0 = arith.constant 0 : i32
    %c0_i32_1 = arith.constant 0 : i32
    %c0_i32_2 = arith.constant 0 : i32
    return %arg0, %c0_i32, %c0_i32_0, %c0_i32_1 : i32, i32, i32, i32
  }
  func.func @transform_1(%arg0: i32, %arg1: i32) -> (i32, i32, i32) {
    %c0_i32 = arith.constant 0 : i32
    %c0_i32_0 = arith.constant 0 : i32
    %c0_i32_1 = arith.constant 0 : i32
    %c0_i32_2 = arith.constant 0 : i32
    return %c0_i32, %c0_i32_0, %c0_i32_1 : i32, i32, i32
  }
  func.func @transform_2(%arg0: i32, %arg1: i32) -> (i32, i32) {
    %c0_i32 = arith.constant 0 : i32
    %c0_i32_0 = arith.constant 0 : i32
    %c0_i32_1 = arith.constant 0 : i32
    return %c0_i32, %c0_i32_0 : i32, i32
  }
  func.func @transform_3(%arg0: i32, %arg1: i32) -> (i32, i32, i32, i32) {
    %c0_i32 = arith.constant 0 : i32
    %c0_i32_0 = arith.constant 0 : i32
    %c0_i32_1 = arith.constant 0 : i32
    return %arg0, %arg1, %c0_i32, %c0_i32_0 : i32, i32, i32, i32
  }
}

module attributes {stable_mosaic.version = 11 : i64} {
  func.func @gemm_kernel(%arg0: i32, %arg1: i32, %arg2: memref<8x128xbf16, #tpu.memory_space<vmem>>, %arg3: memref<128x128xbf16, #tpu.memory_space<vmem>>, %arg4: memref<1x128xf32, #tpu.memory_space<vmem>>, %arg5: memref<8x128xf32, #tpu.memory_space<vmem>>) attributes {dimension_semantics = [#tpu.dimension_semantics<parallel>, #tpu.dimension_semantics<parallel>], iteration_bounds = array<i64: 1, 1>, scalar_prefetch = 0 : i64, scratch_operands = 0 : i64, tpu.core_type = #tpu.core_type<tc>, window_params = [{transform_indices = @transform_0, window_bounds = array<i64: 8, 128>}, {transform_indices = @transform_1, window_bounds = array<i64: 128, 128>}, {transform_indices = @transform_2, window_bounds = array<i64: 1, 128>}, {transform_indices = @transform_3, window_bounds = array<i64: 8, 128>}]} {
    %c0 = arith.constant 0 : index
    %c0_0 = arith.constant 0 : index
    %0 = vector.load %arg2[%c0, %c0_0] : memref<8x128xbf16, #tpu.memory_space<vmem>>, vector<8x128xbf16>
    %c0_1 = arith.constant 0 : index
    %c0_2 = arith.constant 0 : index
    %1 = vector.load %arg3[%c0_1, %c0_2] : memref<128x128xbf16, #tpu.memory_space<vmem>>, vector<128x128xbf16>
    %cst = arith.constant dense<0.000000e+00> : vector<8x128xf32>
    %2 = tpu.matmul %0, %1, %cst {dimension_numbers = #tpu.dot_dimension_numbers<[1], [0], [0], [1], [0, 0, 1, 1], [], []>} : vector<8x128xbf16>, vector<128x128xbf16>, vector<8x128xf32> -> vector<8x128xf32>
    %c0_3 = arith.constant 0 : index
    %c0_4 = arith.constant 0 : index
    %3 = vector.load %arg4[%c0_3, %c0_4] : memref<1x128xf32, #tpu.memory_space<vmem>>, vector<1x128xf32>
    %4 = vector.broadcast %3 : vector<1x128xf32> to vector<8x128xf32>
    %5 = arith.addf %2, %4 : vector<8x128xf32>
    %c0_5 = arith.constant 0 : index
    %c0_6 = arith.constant 0 : index
    %6 = vector.load %arg5[%c0_5, %c0_6] : memref<8x128xf32, #tpu.memory_space<vmem>>, vector<8x128xf32>
    tpu.vector_store %arg5[%c0_5, %c0_6], %5 {strides = array<i32>} : memref<8x128xf32, #tpu.memory_space<vmem>>, vector<8x128xf32>,
    return
  }
  func.func @transform_0(%arg0: i32, %arg1: i32) -> (i32, i32) {
    %c0_i32 = arith.constant 0 : i32
    %c0_i32_0 = arith.constant 0 : i32
    return %arg0, %c0_i32 : i32, i32
  }
  func.func @transform_1(%arg0: i32, %arg1: i32) -> (i32, i32) {
    %c0_i32 = arith.constant 0 : i32
    %c0_i32_0 = arith.constant 0 : i32
    return %c0_i32, %arg1 : i32, i32
  }
  func.func @transform_2(%arg0: i32, %arg1: i32) -> (i32, i32) {
    %c0_i32 = arith.constant 0 : i32
    %c0_i32_0 = arith.constant 0 : i32
    return %c0_i32, %arg1 : i32, i32
  }
  func.func @transform_3(%arg0: i32, %arg1: i32) -> (i32, i32) {
    %c0_i32 = arith.constant 0 : i32
    return %arg0, %arg1 : i32, i32
  }
}

</mosaic_0001>

<bundles_post_ra>
// kernel: network_forward.14
= control target key start
LH: loop header
LB: loop body
LE: loop exit
PB: predicated region body
PF: predicated region fallthrough
CT: control target
= control target key end

     0   :  { %s1257_s12 = smov 0   ;;  %s1259_s13 = smov 0   ;;  %s1394_s0 = inlined_call_operand.vmem [shape: bf16[512,128], index: 0, kind: input, shape index: {}]   ;;  %s1395_s1 = inlined_call_operand.vmem [shape: bf16[128,128], index: 1, kind: input, shape index: {}]   ;;  %s1396_s2 = inlined_call_operand.vmem [shape: f32[1,128], index: 2, kind: input, shape index: {}]   ;;  %s1397_s3 = inlined_call_operand.vmem [shape: bf16[512,128], index: 3, kind: output, shape index: {}]  }
   0x1   :  { %s1261_s14 = smov 0  }
   0x2 LB: > { %s25_s15 = sadd.s32 1, %s1231_s13  ;;  %p886_p0 = scmp.ge.s32.totalorder %s1235_s14, 1  ;;  %s1235_s14 = sphi %s1261_s14, %s13_s14   ;;  %s1231_s13 = sphi %s1259_s13, %s1399_s13   ;;  %s1227_s12 = sphi %s1257_s12, %s1398_s12  }
   0x3   : > { %p27_p1 = scmp.ge.s32.totalorder %s25_s15, 2  ;;  %p169_p2 = scmp.lt.s32.totalorder %s1235_s14, 3 }
   0x5   : > { %s1401_s15 = smov (%p27_p1, %s25_s15), 0  ;;  %p170_p3 = pnand %p886_p0, %p169_p2 }
   0x6   : > { %v1189_v0 = vld [vmem:[%s1395_s1] sm:$0xff] (!%p170_p3)   ;;  %s887_s18 = sshll.u32 (!%p170_p3), %s1227_s12, 5  ;;  %v1190_v1 = vld [vmem:[%s1395_s1 + $0x8] sm:$0xff] (!%p170_p3)   ;;  %v1191_v2 = vld [vmem:[%s1395_s1 + $0x10] sm:$0xff] (!%p170_p3)  }
   0x7   : > { %173 = sbr.rel (%p170_p3) target bundleno = 285 (0x11d), region = 32  ;;  %p204_p4 = scmp.lt.s32.totalorder (!%p170_p3), %s887_s18, 63  ;;  %1101 = vmatprep.subr.bf16.mxu0 (!%p170_p3), %v1189_v0  ;;  %1149 = vmatprep.subr.bf16.mxu1 (!%p170_p3), %v1189_v0  ;;  %v1192_v3 = vld [vmem:[%s1395_s1 + $0x18] sm:$0xff] (!%p170_p3)   ;;  %v1193_v6 = vld [vmem:[%s1395_s1 + $0x20] sm:$0xff] (!%p170_p3)   ;;  %v1194_v7 = vld [vmem:[%s1395_s1 + $0x28] sm:$0xff] (!%p170_p3)  }
   0x8   : > { %1102 = vmatpush3.bf16.msra.mxu0 (!%p170_p3), %v1189_v0  ;;  %1157 = vmatpush3.bf16.msra.mxu1 (!%p170_p3), %v1189_v0  ;;  %v1195_v8 = vld [vmem:[%s1395_s1 + $0x30] sm:$0xff] (!%p170_p3)   ;;  %v1196_v9 = vld [vmem:[%s1395_s1 + $0x38] sm:$0xff] (!%p170_p3)   ;;  %v1328_v24 = vld [vmem:[%s1396_s2] ss:$0 sm:$0xff] (!%p170_p3) }
   0x9   : > { %1103 = vmatprep.subr.bf16.mxu0 (!%p170_p3), %v1190_v1  ;;  %1150 = vmatprep.subr.bf16.mxu1 (!%p170_p3), %v1190_v1 }
   0xc   : > { %1104 = vmatpush3.bf16.msra.mxu0 (!%p170_p3), %v1190_v1  ;;  %1158 = vmatpush3.bf16.msra.mxu1 (!%p170_p3), %v1190_v1 }
   0xd   : > { %1105 = vmatprep.subr.bf16.mxu0 (!%p170_p3), %v1191_v2  ;;  %1151 = vmatprep.subr.bf16.mxu1 (!%p170_p3), %v1191_v2 }
   0xe   : > { %s1403_s18 = smov (!%p204_p4, %s887_s18), 63 }
   0xf   : > { %s888_s23 = sshll.u32 %s1403_s18, 2 }
  0x10   : > { %s1292_s26 = scalar_lea.vmem %s1394_s0, %s888_s23  ;;  %1106 = vmatpush3.bf16.msra.mxu0 %v1191_v2  ;;  %1159 = vmatpush3.bf16.msra.mxu1 %v1191_v2  ;;  %s1343_s17 = scalar_lea.vmem %s1397_s3, %s888_s23 }
  0x11   : > { %v1197_v4 = vld [vmem:[%s1292_s26] sm:$0xff]   ;;  %1107 = vmatprep.subr.bf16.mxu0 %v1192_v3  ;;  %1152 = vmatprep.subr.bf16.mxu1 %v1192_v3  ;;  %v1199_v10 = vld [vmem:[%s1292_s26 + $0x8] sm:$0xff]   ;;  %v1201_v12 = vld [vmem:[%s1292_s26 + $0x10] sm:$0xff]  }
  0x12   : > { %v1198_v5 = vld [vmem:[%s1292_s26 + $0x40] sm:$0xff]   ;;  %1117 = vmatprep.mubr.bf16.mxu0 %v1197_v4  ;;  %v1200_v11 = vld [vmem:[%s1292_s26 + $0x48] sm:$0xff]   ;;  %v1202_v13 = vld [vmem:[%s1292_s26 + $0x50] sm:$0xff]  }
  0x13   : > { %1133 = vmatprep.mubr.bf16.mxu1 %v1198_v5  ;;  %v1203_v14 = vld [vmem:[%s1292_s26 + $0x18] sm:$0xff]   ;;  %v1205_v16 = vld [vmem:[%s1292_s26 + $0x20] sm:$0xff]   ;;  %v1207_v18 = vld [vmem:[%s1292_s26 + $0x28] sm:$0xff]  }
  0x14   : > { %1108 = vmatpush3.bf16.msra.mxu0 %v1192_v3  ;;  %1160 = vmatpush3.bf16.msra.mxu1 %v1192_v3  ;;  %v1204_v15 = vld [vmem:[%s1292_s26 + $0x58] sm:$0xff]   ;;  %v1206_v17 = vld [vmem:[%s1292_s26 + $0x60] sm:$0xff]   ;;  %v1208_v19 = vld [vmem:[%s1292_s26 + $0x68] sm:$0xff]  }
  0x15   : > { %1109 = vmatprep.subr.bf16.mxu0 %v1193_v6  ;;  %1153 = vmatprep.subr.bf16.mxu1 %v1193_v6  ;;  %v1209_v20 = vld [vmem:[%s1292_s26 + $0x30] sm:$0xff]   ;;  %v1211_v22 = vld [vmem:[%s1292_s26 + $0x38] sm:$0xff]  }
  0x16   : > { %v1210_v21 = vld [vmem:[%s1292_s26 + $0x70] sm:$0xff]   ;;  %v1212_v23 = vld [vmem:[%s1292_s26 + $0x78] sm:$0xff]  }
  0x18   : > { %1110 = vmatpush3.bf16.msra.mxu0 %v1193_v6  ;;  %1161 = vmatpush3.bf16.msra.mxu1 %v1193_v6 }
  0x19   : > { %1111 = vmatprep.subr.bf16.mxu0 %v1194_v7  ;;  %1154 = vmatprep.subr.bf16.mxu1 %v1194_v7 }
  0x1c   : > { %1112 = vmatpush3.bf16.msra.mxu0 %v1194_v7  ;;  %1162 = vmatpush3.bf16.msra.mxu1 %v1194_v7 }
  0x1d   : > { %1113 = vmatprep.subr.bf16.mxu0 %v1195_v8  ;;  %1155 = vmatprep.subr.bf16.mxu1 %v1195_v8 }
  0x20   : > { %1114 = vmatpush3.bf16.msra.mxu0 %v1195_v8  ;;  %1163 = vmatpush3.bf16.msra.mxu1 %v1195_v8 }
  0x21   : > { %1115 = vmatprep.subr.bf16.mxu0 %v1196_v9  ;;  %1156 = vmatprep.subr.bf16.mxu1 %v1196_v9 }
  0x24   : > { %1116 = vmatpush3.bf16.msra.mxu0 %v1196_v9  ;;  %1164 = vmatpush3.bf16.msra.mxu1 %v1196_v9 }
  0x27   : > { %1118 = vmatmul.mubr.bf16.vlgmr.msra.gmra.mrb[0].mxu0 %v1199_v10  ;;  %1134 = vmatmul.mubr.bf16.vlgmr.msra.gmra.mrb[0].mxu1 %v1200_v11 }
  0x28   : > { %1121 = vmatprep.mubr.bf16.mxu0 %v1201_v12  ;;  %1137 = vmatprep.mubr.bf16.mxu1 %v1202_v13 }
  0x2f   : > { %1122 = vmatmul.mubr.bf16.gmra.mrb[4].mxu0 %v1203_v14  ;;  %1138 = vmatmul.mubr.bf16.gmra.mrb[4].mxu1 %v1204_v15 }
  0x30   : > { %1125 = vmatprep.mubr.bf16.mxu0 %v1205_v16  ;;  %1141 = vmatprep.mubr.bf16.mxu1 %v1206_v17 }
  0x37   : > { %1126 = vmatmul.mubr.bf16.gmra.mrb[8].mxu0 %v1207_v18  ;;  %1142 = vmatmul.mubr.bf16.gmra.mrb[8].mxu1 %v1208_v19 }
  0x38   : > { %1129 = vmatprep.mubr.bf16.mxu0 %v1209_v20  ;;  %1145 = vmatprep.mubr.bf16.mxu1 %v1210_v21 }
  0x3f   : > { %1130 = vmatmul.mubr.bf16.gmra.mrb[12].mxu0 %v1211_v22  ;;  %1146 = vmatmul.mubr.bf16.gmra.mrb[12].mxu1 %v1212_v23 }
  0xfa   : > { %v1119_v25 = vpop.f32.mrb[0].mxu0  ;;  %v1135_v26 = vpop.f32.mrb[0].mxu1 }
  0xfb   : > { %v468_v27 = vadd.f32 %v1119_v25, %v1328_v24  ;;  %v532_v28 = vadd.f32 %v1135_v26, %v1328_v24  ;;  %v459_v29 = vpop.f32.mrb[1].mxu0  ;;  %v523_v30 = vpop.f32.mrb[1].mxu1 }
  0xfc   : > { %v460_v31 = vadd.f32 %v1328_v24, %v459_v29  ;;  %v524_v32 = vadd.f32 %v1328_v24, %v523_v30  ;;  %v1120_v33 = vpop.f32.mrb[2].mxu0  ;;  %v1136_v34 = vpop.f32.mrb[2].mxu1 }
  0xfd   : > { %v471_v35 = vadd.f32 %v1120_v33, %v1328_v24  ;;  %v535_v36 = vadd.f32 %v1136_v34, %v1328_v24  ;;  %v462_v37 = vpop.f32.mrb[3].mxu0  ;;  %v526_v38 = vpop.f32.mrb[3].mxu1  ;;  %v588_v41 = vmax.f32 %v468_v27, 0.0  ;;  %v604_v42 = vmax.f32 %v532_v28, 0.0 }
  0xfe   : > { %v463_v39 = vadd.f32 %v1328_v24, %v462_v37  ;;  %v527_v40 = vadd.f32 %v1328_v24, %v526_v38  ;;  %v586_v45 = vmax.f32 %v460_v31, 0.0  ;;  %v602_v46 = vmax.f32 %v524_v32, 0.0 }
  0xff   : > { %v589_v43 = vmax.f32 %v471_v35, 0.0  ;;  %v605_v44 = vmax.f32 %v535_v36, 0.0 }
 0x100   : > { %v587_v47 = vmax.f32 %v463_v39, 0.0  ;;  %v603_v48 = vmax.f32 %v527_v40, 0.0 }
 0x101   : > { %v990_v49 = vpack.c.bf16 %v589_v43, %v588_v41  ;;  %v1030_v50 = vpack.c.bf16 %v605_v44, %v604_v42 }
 0x102   : > { %v985_v51 = vpack.c.bf16 %v587_v47, %v586_v45  ;;  %v1025_v52 = vpack.c.bf16 %v603_v48, %v602_v46  ;;  %v1123_v53 = vpop.f32.mrb[4].mxu0  ;;  %v1139_v54 = vpop.f32.mrb[4].mxu1 }
 0x103   : > { %1062 = vst [vmem:[%s1343_s17 + $0x8] sm:$0xff] %v990_v49   ;;  %1070 = vst [vmem:[%s1343_s17 + $0x48] sm:$0xff] %v1030_v50   ;;  %v484_v55 = vadd.f32 %v1123_v53, %v1328_v24  ;;  %v548_v56 = vadd.f32 %v1139_v54, %v1328_v24  ;;  %v475_v57 = vpop.f32.mrb[5].mxu0  ;;  %v539_v58 = vpop.f32.mrb[5].mxu1 }
 0x104   : > { %986 = vst [vmem:[%s1343_s17] sm:$0xff] %v985_v51   ;;  %1069 = vst [vmem:[%s1343_s17 + $0x40] sm:$0xff] %v1025_v52   ;;  %v476_v59 = vadd.f32 %v1328_v24, %v475_v57  ;;  %v540_v60 = vadd.f32 %v1328_v24, %v539_v58  ;;  %v1124_v61 = vpop.f32.mrb[6].mxu0  ;;  %v1140_v62 = vpop.f32.mrb[6].mxu1 }
 0x105   : > { %v487_v63 = vadd.f32 %v1124_v61, %v1328_v24  ;;  %v551_v0 = vadd.f32 %v1140_v62, %v1328_v24  ;;  %v478_v1 = vpop.f32.mrb[7].mxu0  ;;  %v542_v2 = vpop.f32.mrb[7].mxu1  ;;  %v592_v5 = vmax.f32 %v484_v55, 0.0  ;;  %v608_v6 = vmax.f32 %v548_v56, 0.0 }
 0x106   : > { %v479_v3 = vadd.f32 %v1328_v24, %v478_v1  ;;  %v543_v4 = vadd.f32 %v1328_v24, %v542_v2  ;;  %v590_v9 = vmax.f32 %v476_v59, 0.0  ;;  %v606_v10 = vmax.f32 %v540_v60, 0.0 }
 0x107   : > { %v593_v7 = vmax.f32 %v487_v63, 0.0  ;;  %v609_v8 = vmax.f32 %v551_v0, 0.0 }
 0x108   : > { %v591_v11 = vmax.f32 %v479_v3, 0.0  ;;  %v607_v12 = vmax.f32 %v543_v4, 0.0 }
 0x109   : > { %v1000_v13 = vpack.c.bf16 %v593_v7, %v592_v5  ;;  %v1040_v14 = vpack.c.bf16 %v609_v8, %v608_v6 }
 0x10a   : > { %v995_v15 = vpack.c.bf16 %v591_v11, %v590_v9  ;;  %v1035_v16 = vpack.c.bf16 %v607_v12, %v606_v10  ;;  %v1127_v17 = vpop.f32.mrb[8].mxu0  ;;  %v1143_v18 = vpop.f32.mrb[8].mxu1 }
 0x10b   : > { %1064 = vst [vmem:[%s1343_s17 + $0x18] sm:$0xff] %v1000_v13   ;;  %1072 = vst [vmem:[%s1343_s17 + $0x58] sm:$0xff] %v1040_v14   ;;  %v500_v19 = vadd.f32 %v1127_v17, %v1328_v24  ;;  %v564_v20 = vadd.f32 %v1143_v18, %v1328_v24  ;;  %v491_v21 = vpop.f32.mrb[9].mxu0  ;;  %v555_v22 = vpop.f32.mrb[9].mxu1 }
 0x10c   : > { %1063 = vst [vmem:[%s1343_s17 + $0x10] sm:$0xff] %v995_v15   ;;  %1071 = vst [vmem:[%s1343_s17 + $0x50] sm:$0xff] %v1035_v16   ;;  %v492_v23 = vadd.f32 %v1328_v24, %v491_v21  ;;  %v556_v25 = vadd.f32 %v1328_v24, %v555_v22  ;;  %v1128_v26 = vpop.f32.mrb[10].mxu0  ;;  %v1144_v27 = vpop.f32.mrb[10].mxu1 }
 0x10d   : > { %v503_v28 = vadd.f32 %v1128_v26, %v1328_v24  ;;  %v567_v29 = vadd.f32 %v1144_v27, %v1328_v24  ;;  %v494_v30 = vpop.f32.mrb[11].mxu0  ;;  %v558_v31 = vpop.f32.mrb[11].mxu1  ;;  %v596_v34 = vmax.f32 %v500_v19, 0.0  ;;  %v612_v35 = vmax.f32 %v564_v20, 0.0 }
 0x10e   : > { %v495_v32 = vadd.f32 %v1328_v24, %v494_v30  ;;  %v559_v33 = vadd.f32 %v1328_v24, %v558_v31  ;;  %v594_v38 = vmax.f32 %v492_v23, 0.0  ;;  %v610_v39 = vmax.f32 %v556_v25, 0.0 }
 0x10f   : > { %v597_v36 = vmax.f32 %v503_v28, 0.0  ;;  %v613_v37 = vmax.f32 %v567_v29, 0.0 }
 0x110   : > { %v595_v40 = vmax.f32 %v495_v32, 0.0  ;;  %v611_v41 = vmax.f32 %v559_v33, 0.0 }
 0x111   : > { %v1010_v42 = vpack.c.bf16 %v597_v36, %v596_v34  ;;  %v1050_v43 = vpack.c.bf16 %v613_v37, %v612_v35 }
 0x112   : > { %v1005_v44 = vpack.c.bf16 %v595_v40, %v594_v38  ;;  %v1045_v45 = vpack.c.bf16 %v611_v41, %v610_v39  ;;  %v1131_v46 = vpop.f32.mrb[12].mxu0  ;;  %v1147_v47 = vpop.f32.mrb[12].mxu1 }
 0x113   : > { %1066 = vst [vmem:[%s1343_s17 + $0x28] sm:$0xff] %v1010_v42   ;;  %1074 = vst [vmem:[%s1343_s17 + $0x68] sm:$0xff] %v1050_v43   ;;  %v516_v48 = vadd.f32 %v1131_v46, %v1328_v24  ;;  %v580_v49 = vadd.f32 %v1147_v47, %v1328_v24  ;;  %v507_v50 = vpop.f32.mrb[13].mxu0  ;;  %v571_v51 = vpop.f32.mrb[13].mxu1 }
 0x114   : > { %1065 = vst [vmem:[%s1343_s17 + $0x20] sm:$0xff] %v1005_v44   ;;  %1073 = vst [vmem:[%s1343_s17 + $0x60] sm:$0xff] %v1045_v45   ;;  %v508_v52 = vadd.f32 %v1328_v24, %v507_v50  ;;  %v572_v53 = vadd.f32 %v1328_v24, %v571_v51  ;;  %v1132_v54 = vpop.f32.mrb[14].mxu0  ;;  %v1148_v55 = vpop.f32.mrb[14].mxu1 }
 0x115   : > { %v519_v56 = vadd.f32 %v1132_v54, %v1328_v24  ;;  %v583_v57 = vadd.f32 %v1148_v55, %v1328_v24  ;;  %v510_v58 = vpop.f32.mrb[15].mxu0  ;;  %v574_v59 = vpop.f32.mrb[15].mxu1  ;;  %v600_v62 = vmax.f32 %v516_v48, 0.0  ;;  %v616_v63 = vmax.f32 %v580_v49, 0.0 }
 0x116   : > { %v511_v60 = vadd.f32 %v1328_v24, %v510_v58  ;;  %v575_v61 = vadd.f32 %v1328_v24, %v574_v59  ;;  %v598_v2 = vmax.f32 %v508_v52, 0.0  ;;  %v614_v3 = vmax.f32 %v572_v53, 0.0 }
 0x117   : > { %v601_v0 = vmax.f32 %v519_v56, 0.0  ;;  %v617_v1 = vmax.f32 %v583_v57, 0.0 }
 0x118   : > { %v599_v4 = vmax.f32 %v511_v60, 0.0  ;;  %v615_v5 = vmax.f32 %v575_v61, 0.0 }
 0x119   : > { %v1020_v6 = vpack.c.bf16 %v601_v0, %v600_v62  ;;  %v1060_v7 = vpack.c.bf16 %v617_v1, %v616_v63 }
 0x11a   : > { %v1015_v8 = vpack.c.bf16 %v599_v4, %v598_v2  ;;  %v1055_v9 = vpack.c.bf16 %v615_v5, %v614_v3 }
 0x11b   : > { %1068 = vst [vmem:[%s1343_s17 + $0x38] sm:$0xff] %v1020_v6   ;;  %1076 = vst [vmem:[%s1343_s17 + $0x78] sm:$0xff] %v1060_v7  }
 0x11c   : > { %1067 = vst [vmem:[%s1343_s17 + $0x30] sm:$0xff] %v1015_v8   ;;  %1075 = vst [vmem:[%s1343_s17 + $0x70] sm:$0xff] %v1055_v9  }
 0x11d PF: > { %s13_s14 = sadd.s32 1, %s1235_s14   ;;  %s1398_s12 = smov %s1231_s13 }
 0x11e   : > { %p10_p5 = scmp.ge.s32.totalorder %s13_s14, 4   ;;  %s1399_s13 = smov %s1401_s15 }
 0x120   :  { %12 = sbr.rel (!%p10_p5) target bundleno = 2 (0x2), region = 68 }

// kernel: network_forward.16
= control target key start
LH: loop header
LB: loop body
LE: loop exit
PB: predicated region body
PF: predicated region fallthrough
CT: control target
= control target key end

     0   :  { %s618_s1 = inlined_call_operand.vmem [shape: bf16[128,128], index: 1, kind: input, shape index: {}]   ;;  %s619_s0 = inlined_call_operand.vmem [shape: bf16[128,128], index: 0, kind: input, shape index: {}]   ;;  %s620_s2 = inlined_call_operand.vmem [shape: f32[1,128], index: 2, kind: input, shape index: {}]   ;;  %s621_s3 = inlined_call_operand.vmem [shape: bf16[128,128], index: 3, kind: output, shape index: {}]  }
   0x1   :  { %v507_v0 = vld [vmem:[%s618_s1] sm:$0xff]   ;;  %v508_v1 = vld [vmem:[%s618_s1 + $0x8] sm:$0xff]   ;;  %v509_v2 = vld [vmem:[%s618_s1 + $0x10] sm:$0xff]  }
   0x2   :  { %459 = vmatprep.subr.bf16.mxu0 %v507_v0  ;;  %491 = vmatprep.subr.bf16.mxu1 %v507_v0  ;;  %v510_v3 = vld [vmem:[%s618_s1 + $0x18] sm:$0xff]   ;;  %v515_v4 = vld [vmem:[%s619_s0] sm:$0xff]   ;;  %v512_v7 = vld [vmem:[%s618_s1 + $0x28] sm:$0xff]  }
   0x3   :  { %460 = vmatpush3.bf16.msra.mxu0 %v507_v0  ;;  %499 = vmatpush3.bf16.msra.mxu1 %v507_v0  ;;  %v516_v5 = vld [vmem:[%s619_s0 + $0x20] sm:$0xff]   ;;  %v513_v8 = vld [vmem:[%s618_s1 + $0x30] sm:$0xff]   ;;  %v514_v9 = vld [vmem:[%s618_s1 + $0x38] sm:$0xff]  }
   0x4   :  { %461 = vmatprep.subr.bf16.mxu0 %v508_v1  ;;  %492 = vmatprep.subr.bf16.mxu1 %v508_v1  ;;  %v511_v6 = vld [vmem:[%s618_s1 + $0x20] sm:$0xff]   ;;  %v517_v10 = vld [vmem:[%s619_s0 + $0x8] sm:$0xff]   ;;  %v519_v12 = vld [vmem:[%s619_s0 + $0x10] sm:$0xff]  }
   0x5   :  { %475 = vmatprep.mubr.bf16.mxu0 %v515_v4  ;;  %483 = vmatprep.mubr.bf16.mxu1 %v516_v5  ;;  %v518_v11 = vld [vmem:[%s619_s0 + $0x28] sm:$0xff]   ;;  %v520_v13 = vld [vmem:[%s619_s0 + $0x30] sm:$0xff]   ;;  %v521_v14 = vld [vmem:[%s619_s0 + $0x18] sm:$0xff]  }
   0x6   :  { %v522_v15 = vld [vmem:[%s619_s0 + $0x38] sm:$0xff]   ;;  %v347_v16 = vld [vmem:[%s620_s2] ss:$0 sm:$0xff] }
   0x7   :  { %462 = vmatpush3.bf16.msra.mxu0 %v508_v1  ;;  %500 = vmatpush3.bf16.msra.mxu1 %v508_v1 }
   0x8   :  { %463 = vmatprep.subr.bf16.mxu0 %v509_v2  ;;  %493 = vmatprep.subr.bf16.mxu1 %v509_v2 }
   0xb   :  { %464 = vmatpush3.bf16.msra.mxu0 %v509_v2  ;;  %501 = vmatpush3.bf16.msra.mxu1 %v509_v2 }
   0xc   :  { %465 = vmatprep.subr.bf16.mxu0 %v510_v3  ;;  %494 = vmatprep.subr.bf16.mxu1 %v510_v3 }
   0xf   :  { %466 = vmatpush3.bf16.msra.mxu0 %v510_v3  ;;  %502 = vmatpush3.bf16.msra.mxu1 %v510_v3 }
  0x10   :  { %467 = vmatprep.subr.bf16.mxu0 %v511_v6  ;;  %495 = vmatprep.subr.bf16.mxu1 %v511_v6 }
  0x13   :  { %468 = vmatpush3.bf16.msra.mxu0 %v511_v6  ;;  %503 = vmatpush3.bf16.msra.mxu1 %v511_v6 }
  0x14   :  { %469 = vmatprep.subr.bf16.mxu0 %v512_v7  ;;  %496 = vmatprep.subr.bf16.mxu1 %v512_v7 }
  0x17   :  { %470 = vmatpush3.bf16.msra.mxu0 %v512_v7  ;;  %504 = vmatpush3.bf16.msra.mxu1 %v512_v7 }
  0x18   :  { %471 = vmatprep.subr.bf16.mxu0 %v513_v8  ;;  %497 = vmatprep.subr.bf16.mxu1 %v513_v8 }
  0x1b   :  { %472 = vmatpush3.bf16.msra.mxu0 %v513_v8  ;;  %505 = vmatpush3.bf16.msra.mxu1 %v513_v8 }
  0x1c   :  { %473 = vmatprep.subr.bf16.mxu0 %v514_v9  ;;  %498 = vmatprep.subr.bf16.mxu1 %v514_v9 }
  0x1f   :  { %474 = vmatpush3.bf16.msra.mxu0 %v514_v9  ;;  %506 = vmatpush3.bf16.msra.mxu1 %v514_v9 }
  0x22   :  { %476 = vmatmul.mubr.bf16.vlgmr.msra.gmra.mrb[0].mxu0 %v517_v10  ;;  %484 = vmatmul.mubr.bf16.vlgmr.msra.gmra.mrb[0].mxu1 %v518_v11 }
  0x23   :  { %479 = vmatprep.mubr.bf16.mxu0 %v519_v12  ;;  %487 = vmatprep.mubr.bf16.mxu1 %v520_v13 }
  0x2a   :  { %480 = vmatmul.mubr.bf16.gmra.mrb[4].mxu0 %v521_v14  ;;  %488 = vmatmul.mubr.bf16.gmra.mrb[4].mxu1 %v522_v15 }
  0xf5   :  { %v477_v17 = vpop.f32.mrb[0].mxu0  ;;  %v485_v18 = vpop.f32.mrb[0].mxu1 }
  0xf6   :  { %v193_v19 = vadd.f32 %v477_v17, %v347_v16  ;;  %v225_v20 = vadd.f32 %v485_v18, %v347_v16  ;;  %v184_v21 = vpop.f32.mrb[1].mxu0  ;;  %v216_v22 = vpop.f32.mrb[1].mxu1 }
  0xf7   :  { %v185_v23 = vadd.f32 %v347_v16, %v184_v21  ;;  %v217_v24 = vadd.f32 %v347_v16, %v216_v22  ;;  %v478_v25 = vpop.f32.mrb[2].mxu0  ;;  %v486_v26 = vpop.f32.mrb[2].mxu1 }
  0xf8   :  { %v196_v27 = vadd.f32 %v478_v25, %v347_v16  ;;  %v228_v28 = vadd.f32 %v486_v26, %v347_v16  ;;  %v187_v29 = vpop.f32.mrb[3].mxu0  ;;  %v219_v30 = vpop.f32.mrb[3].mxu1  ;;  %v249_v33 = vmax.f32 %v193_v19, 0.0  ;;  %v257_v34 = vmax.f32 %v225_v20, 0.0 }
  0xf9   :  { %v188_v31 = vadd.f32 %v347_v16, %v187_v29  ;;  %v220_v32 = vadd.f32 %v347_v16, %v219_v30  ;;  %v247_v37 = vmax.f32 %v185_v23, 0.0  ;;  %v255_v38 = vmax.f32 %v217_v24, 0.0 }
  0xfa   :  { %v250_v35 = vmax.f32 %v196_v27, 0.0  ;;  %v258_v36 = vmax.f32 %v228_v28, 0.0 }
  0xfb   :  { %v248_v39 = vmax.f32 %v188_v31, 0.0  ;;  %v256_v40 = vmax.f32 %v220_v32, 0.0 }
  0xfc   :  { %v404_v41 = vpack.c.bf16 %v250_v35, %v249_v33  ;;  %v424_v42 = vpack.c.bf16 %v258_v36, %v257_v34 }
  0xfd   :  { %v399_v43 = vpack.c.bf16 %v248_v39, %v247_v37  ;;  %v419_v44 = vpack.c.bf16 %v256_v40, %v255_v38  ;;  %v481_v45 = vpop.f32.mrb[4].mxu0  ;;  %v489_v46 = vpop.f32.mrb[4].mxu1 }
  0xfe   :  { %436 = vst [vmem:[%s621_s3 + $0x8] sm:$0xff] %v404_v41   ;;  %440 = vst [vmem:[%s621_s3 + $0x28] sm:$0xff] %v424_v42   ;;  %v209_v47 = vadd.f32 %v481_v45, %v347_v16  ;;  %v241_v48 = vadd.f32 %v489_v46, %v347_v16  ;;  %v200_v49 = vpop.f32.mrb[5].mxu0  ;;  %v232_v50 = vpop.f32.mrb[5].mxu1 }
  0xff   :  { %400 = vst [vmem:[%s621_s3] sm:$0xff] %v399_v43   ;;  %439 = vst [vmem:[%s621_s3 + $0x20] sm:$0xff] %v419_v44   ;;  %v201_v51 = vadd.f32 %v347_v16, %v200_v49  ;;  %v233_v52 = vadd.f32 %v347_v16, %v232_v50  ;;  %v482_v53 = vpop.f32.mrb[6].mxu0  ;;  %v490_v54 = vpop.f32.mrb[6].mxu1 }
 0x100   :  { %v212_v55 = vadd.f32 %v482_v53, %v347_v16  ;;  %v244_v56 = vadd.f32 %v490_v54, %v347_v16  ;;  %v203_v57 = vpop.f32.mrb[7].mxu0  ;;  %v235_v58 = vpop.f32.mrb[7].mxu1  ;;  %v253_v61 = vmax.f32 %v209_v47, 0.0  ;;  %v261_v62 = vmax.f32 %v241_v48, 0.0 }
 0x101   :  { %v204_v59 = vadd.f32 %v347_v16, %v203_v57  ;;  %v236_v60 = vadd.f32 %v347_v16, %v235_v58  ;;  %v251_v1 = vmax.f32 %v201_v51, 0.0  ;;  %v259_v2 = vmax.f32 %v233_v52, 0.0 }
 0x102   :  { %v254_v63 = vmax.f32 %v212_v55, 0.0  ;;  %v262_v0 = vmax.f32 %v244_v56, 0.0 }
 0x103   :  { %v252_v3 = vmax.f32 %v204_v59, 0.0  ;;  %v260_v4 = vmax.f32 %v236_v60, 0.0 }
 0x104   :  { %v414_v5 = vpack.c.bf16 %v254_v63, %v253_v61  ;;  %v434_v6 = vpack.c.bf16 %v262_v0, %v261_v62 }
 0x105   :  { %v409_v7 = vpack.c.bf16 %v252_v3, %v251_v1  ;;  %v429_v8 = vpack.c.bf16 %v260_v4, %v259_v2 }
 0x106   :  { %438 = vst [vmem:[%s621_s3 + $0x18] sm:$0xff] %v414_v5   ;;  %442 = vst [vmem:[%s621_s3 + $0x38] sm:$0xff] %v434_v6  }
 0x107   :  { %437 = vst [vmem:[%s621_s3 + $0x10] sm:$0xff] %v409_v7   ;;  %441 = vst [vmem:[%s621_s3 + $0x30] sm:$0xff] %v429_v8  }

// kernel: network_forward.18
= control target key start
LH: loop header
LB: loop body
LE: loop exit
PB: predicated region body
PF: predicated region fallthrough
CT: control target
= control target key end

     0   :  { %s771_s1 = inlined_call_operand.vmem [shape: bf16[128,128], index: 1, kind: input, shape index: {}]   ;;  %s772_s0 = inlined_call_operand.vmem [shape: bf16[128,128], index: 0, kind: input, shape index: {}]   ;;  %s773_s3 = inlined_call_operand.vmem [shape: bf16[128,128], index: 3, kind: input, shape index: {}]   ;;  %s774_s2 = inlined_call_operand.vmem [shape: f32[1,128], index: 2, kind: input, shape index: {}]   ;;  %s775_s4 = inlined_call_operand.vmem [shape: bf16[128,128], index: 4, kind: output, shape index: {}]  }
   0x1   :  { %v597_v0 = vld [vmem:[%s771_s1] sm:$0xff]   ;;  %v598_v1 = vld [vmem:[%s771_s1 + $0x8] sm:$0xff]   ;;  %v599_v2 = vld [vmem:[%s771_s1 + $0x10] sm:$0xff]  }
   0x2   :  { %549 = vmatprep.subr.bf16.mxu0 %v597_v0  ;;  %581 = vmatprep.subr.bf16.mxu1 %v597_v0  ;;  %v600_v3 = vld [vmem:[%s771_s1 + $0x18] sm:$0xff]   ;;  %v605_v4 = vld [vmem:[%s772_s0] sm:$0xff]   ;;  %v602_v7 = vld [vmem:[%s771_s1 + $0x28] sm:$0xff]  }
   0x3   :  { %550 = vmatpush3.bf16.msra.mxu0 %v597_v0  ;;  %589 = vmatpush3.bf16.msra.mxu1 %v597_v0  ;;  %v606_v5 = vld [vmem:[%s772_s0 + $0x20] sm:$0xff]   ;;  %v603_v8 = vld [vmem:[%s771_s1 + $0x30] sm:$0xff]   ;;  %v604_v9 = vld [vmem:[%s771_s1 + $0x38] sm:$0xff]  }
   0x4   :  { %551 = vmatprep.subr.bf16.mxu0 %v598_v1  ;;  %582 = vmatprep.subr.bf16.mxu1 %v598_v1  ;;  %v601_v6 = vld [vmem:[%s771_s1 + $0x20] sm:$0xff]   ;;  %v607_v10 = vld [vmem:[%s772_s0 + $0x8] sm:$0xff]   ;;  %v609_v12 = vld [vmem:[%s772_s0 + $0x10] sm:$0xff]  }
   0x5   :  { %565 = vmatprep.mubr.bf16.mxu0 %v605_v4  ;;  %573 = vmatprep.mubr.bf16.mxu1 %v606_v5  ;;  %v608_v11 = vld [vmem:[%s772_s0 + $0x28] sm:$0xff]   ;;  %v610_v13 = vld [vmem:[%s772_s0 + $0x30] sm:$0xff]   ;;  %v611_v14 = vld [vmem:[%s772_s0 + $0x18] sm:$0xff]  }
   0x6   :  { %v612_v15 = vld [vmem:[%s772_s0 + $0x38] sm:$0xff]   ;;  %v519_v16 = vld [vmem:[%s773_s3 + $0x8] sm:$0xff]   ;;  %v448_v18 = vld [vmem:[%s773_s3] sm:$0xff]  }
   0x7   :  { %552 = vmatpush3.bf16.msra.mxu0 %v598_v1  ;;  %590 = vmatpush3.bf16.msra.mxu1 %v598_v1  ;;  %v523_v17 = vld [vmem:[%s773_s3 + $0x28] sm:$0xff]   ;;  %v522_v19 = vld [vmem:[%s773_s3 + $0x20] sm:$0xff]   ;;  %v706_v21 = vld [vmem:[%s773_s3 + $0x18] sm:$0xff]   ;;  %v453_v23 = vunpack.c.l.bf16 %v519_v16  ;;  %v449_v25 = vunpack.c.l.bf16 %v448_v18  ;;  %v454_v31 = vunpack.c.h.bf16 %v519_v16  ;;  %v450_v33 = vunpack.c.h.bf16 %v448_v18 }
   0x8   :  { %553 = vmatprep.subr.bf16.mxu0 %v599_v2  ;;  %583 = vmatprep.subr.bf16.mxu1 %v599_v2  ;;  %v701_v20 = vld [vmem:[%s774_s2] ss:$0 sm:$0xff]  ;;  %v711_v22 = vld [vmem:[%s773_s3 + $0x38] sm:$0xff]   ;;  %v469_v24 = vunpack.c.l.bf16 %v523_v17  ;;  %v465_v26 = vunpack.c.l.bf16 %v522_v19  ;;  %v716_v27 = vld [vmem:[%s773_s3 + $0x10] sm:$0xff]   ;;  %v470_v32 = vunpack.c.h.bf16 %v523_v17  ;;  %v466_v34 = vunpack.c.h.bf16 %v522_v19 }
   0x9   :  { %v721_v28 = vld [vmem:[%s773_s3 + $0x30] sm:$0xff]   ;;  %v461_v39 = vunpack.c.l.bf16 %v706_v21  ;;  %v477_v40 = vunpack.c.l.bf16 %v711_v22  ;;  %v457_v45 = vunpack.c.l.bf16 %v716_v27  ;;  %v462_v59 = vunpack.c.h.bf16 %v706_v21 }
   0xa   :  { %v473_v46 = vunpack.c.l.bf16 %v721_v28  ;;  %v478_v60 = vunpack.c.h.bf16 %v711_v22  ;;  %v458_v63 = vunpack.c.h.bf16 %v716_v27  ;;  %v474_v0 = vunpack.c.h.bf16 %v721_v28 }
   0xb   :  { %554 = vmatpush3.bf16.msra.mxu0 %v599_v2  ;;  %591 = vmatpush3.bf16.msra.mxu1 %v599_v2 }
   0xc   :  { %555 = vmatprep.subr.bf16.mxu0 %v600_v3  ;;  %584 = vmatprep.subr.bf16.mxu1 %v600_v3 }
   0xf   :  { %556 = vmatpush3.bf16.msra.mxu0 %v600_v3  ;;  %592 = vmatpush3.bf16.msra.mxu1 %v600_v3 }
  0x10   :  { %557 = vmatprep.subr.bf16.mxu0 %v601_v6  ;;  %585 = vmatprep.subr.bf16.mxu1 %v601_v6 }
  0x13   :  { %558 = vmatpush3.bf16.msra.mxu0 %v601_v6  ;;  %593 = vmatpush3.bf16.msra.mxu1 %v601_v6 }
  0x14   :  { %559 = vmatprep.subr.bf16.mxu0 %v602_v7  ;;  %586 = vmatprep.subr.bf16.mxu1 %v602_v7 }
  0x17   :  { %560 = vmatpush3.bf16.msra.mxu0 %v602_v7  ;;  %594 = vmatpush3.bf16.msra.mxu1 %v602_v7 }
  0x18   :  { %561 = vmatprep.subr.bf16.mxu0 %v603_v8  ;;  %587 = vmatprep.subr.bf16.mxu1 %v603_v8 }
  0x1b   :  { %562 = vmatpush3.bf16.msra.mxu0 %v603_v8  ;;  %595 = vmatpush3.bf16.msra.mxu1 %v603_v8 }
  0x1c   :  { %563 = vmatprep.subr.bf16.mxu0 %v604_v9  ;;  %588 = vmatprep.subr.bf16.mxu1 %v604_v9 }
  0x1f   :  { %564 = vmatpush3.bf16.msra.mxu0 %v604_v9  ;;  %596 = vmatpush3.bf16.msra.mxu1 %v604_v9 }
  0x22   :  { %566 = vmatmul.mubr.bf16.vlgmr.msra.gmra.mrb[0].mxu0 %v607_v10  ;;  %574 = vmatmul.mubr.bf16.vlgmr.msra.gmra.mrb[0].mxu1 %v608_v11 }
  0x23   :  { %569 = vmatprep.mubr.bf16.mxu0 %v609_v12  ;;  %577 = vmatprep.mubr.bf16.mxu1 %v610_v13 }
  0x2a   :  { %570 = vmatmul.mubr.bf16.gmra.mrb[4].mxu0 %v611_v14  ;;  %578 = vmatmul.mubr.bf16.gmra.mrb[4].mxu1 %v612_v15 }
  0xf5   :  { %v567_v29 = vpop.f32.mrb[0].mxu0  ;;  %v575_v30 = vpop.f32.mrb[0].mxu1 }
  0xf6   :  { %v196_v35 = vadd.f32 %v567_v29, %v701_v20  ;;  %v228_v36 = vadd.f32 %v575_v30, %v701_v20  ;;  %v187_v37 = vpop.f32.mrb[1].mxu0  ;;  %v219_v38 = vpop.f32.mrb[1].mxu1 }
  0xf7   :  { %v188_v41 = vadd.f32 %v701_v20, %v187_v37  ;;  %v220_v42 = vadd.f32 %v701_v20, %v219_v38  ;;  %v568_v43 = vpop.f32.mrb[2].mxu0  ;;  %v576_v44 = vpop.f32.mrb[2].mxu1 }
  0xf8   :  { %v284_v47 = vadd.f32 %v453_v23, %v196_v35  ;;  %v292_v48 = vadd.f32 %v469_v24, %v228_v36  ;;  %v199_v49 = vadd.f32 %v568_v43, %v701_v20  ;;  %v231_v50 = vadd.f32 %v576_v44, %v701_v20  ;;  %v190_v51 = vpop.f32.mrb[3].mxu0  ;;  %v222_v52 = vpop.f32.mrb[3].mxu1 }
  0xf9   :  { %v282_v53 = vadd.f32 %v449_v25, %v188_v41  ;;  %v290_v54 = vadd.f32 %v465_v26, %v220_v42  ;;  %v191_v55 = vadd.f32 %v701_v20, %v190_v51  ;;  %v223_v56 = vadd.f32 %v701_v20, %v222_v52 }
  0xfa   :  { %v285_v57 = vadd.f32 %v454_v31, %v199_v49  ;;  %v293_v58 = vadd.f32 %v470_v32, %v231_v50  ;;  %v300_v1 = vmax.f32 %v284_v47, 0.0  ;;  %v308_v2 = vmax.f32 %v292_v48, 0.0 }
  0xfb   :  { %v283_v61 = vadd.f32 %v450_v33, %v191_v55  ;;  %v291_v62 = vadd.f32 %v466_v34, %v223_v56  ;;  %v298_v5 = vmax.f32 %v282_v53, 0.0  ;;  %v306_v6 = vmax.f32 %v290_v54, 0.0 }
  0xfc   :  { %v301_v3 = vmax.f32 %v285_v57, 0.0  ;;  %v309_v4 = vmax.f32 %v293_v58, 0.0 }
  0xfd   :  { %v299_v7 = vmax.f32 %v283_v61, 0.0  ;;  %v307_v8 = vmax.f32 %v291_v62, 0.0  ;;  %v571_v9 = vpop.f32.mrb[4].mxu0  ;;  %v579_v10 = vpop.f32.mrb[4].mxu1 }
  0xfe   :  { %v487_v11 = vpack.c.bf16 %v301_v3, %v300_v1  ;;  %v507_v12 = vpack.c.bf16 %v309_v4, %v308_v2  ;;  %v212_v13 = vadd.f32 %v571_v9, %v701_v20  ;;  %v244_v14 = vadd.f32 %v579_v10, %v701_v20  ;;  %v203_v15 = vpop.f32.mrb[5].mxu0  ;;  %v235_v16 = vpop.f32.mrb[5].mxu1 }
  0xff   :  { %v482_v17 = vpack.c.bf16 %v299_v7, %v298_v5  ;;  %v502_v18 = vpack.c.bf16 %v307_v8, %v306_v6  ;;  %v204_v19 = vadd.f32 %v701_v20, %v203_v15  ;;  %v236_v21 = vadd.f32 %v701_v20, %v235_v16  ;;  %v572_v22 = vpop.f32.mrb[6].mxu0  ;;  %v580_v23 = vpop.f32.mrb[6].mxu1 }
 0x100   :  { %526 = vst [vmem:[%s775_s4 + $0x8] sm:$0xff] %v487_v11   ;;  %530 = vst [vmem:[%s775_s4 + $0x28] sm:$0xff] %v507_v12   ;;  %v288_v24 = vadd.f32 %v461_v39, %v212_v13  ;;  %v296_v25 = vadd.f32 %v477_v40, %v244_v14  ;;  %v215_v26 = vadd.f32 %v572_v22, %v701_v20  ;;  %v206_v28 = vpop.f32.mrb[7].mxu0  ;;  %v238_v29 = vpop.f32.mrb[7].mxu1 }
 0x101   :  { %v247_v27 = vadd.f32 %v580_v23, %v701_v20  ;;  %483 = vst [vmem:[%s775_s4] sm:$0xff] %v482_v17   ;;  %529 = vst [vmem:[%s775_s4 + $0x20] sm:$0xff] %v502_v18   ;;  %v286_v30 = vadd.f32 %v457_v45, %v204_v19  ;;  %v294_v31 = vadd.f32 %v473_v46, %v236_v21 }
 0x102   :  { %v207_v32 = vadd.f32 %v701_v20, %v206_v28  ;;  %v239_v33 = vadd.f32 %v701_v20, %v238_v29  ;;  %v289_v34 = vadd.f32 %v462_v59, %v215_v26  ;;  %v304_v38 = vmax.f32 %v288_v24, 0.0 }
 0x103   :  { %v297_v35 = vadd.f32 %v478_v60, %v247_v27  ;;  %v312_v39 = vmax.f32 %v296_v25, 0.0  ;;  %v302_v42 = vmax.f32 %v286_v30, 0.0  ;;  %v310_v43 = vmax.f32 %v294_v31, 0.0 }
 0x104   :  { %v287_v36 = vadd.f32 %v458_v63, %v207_v32  ;;  %v295_v37 = vadd.f32 %v474_v0, %v239_v33  ;;  %v305_v40 = vmax.f32 %v289_v34, 0.0 }
 0x105   :  { %v313_v41 = vmax.f32 %v297_v35, 0.0 }
 0x106   :  { %v303_v44 = vmax.f32 %v287_v36, 0.0  ;;  %v311_v47 = vmax.f32 %v295_v37, 0.0  ;;  %v497_v48 = vpack.c.bf16 %v305_v40, %v304_v38 }
 0x107   :  { %v517_v49 = vpack.c.bf16 %v313_v41, %v312_v39 }
 0x108   :  { %v492_v45 = vpack.c.bf16 %v303_v44, %v302_v42  ;;  %v512_v46 = vpack.c.bf16 %v311_v47, %v310_v43  ;;  %528 = vst [vmem:[%s775_s4 + $0x18] sm:$0xff] %v497_v48  }
 0x109   :  { %532 = vst [vmem:[%s775_s4 + $0x38] sm:$0xff] %v517_v49  }
 0x10a   :  { %527 = vst [vmem:[%s775_s4 + $0x10] sm:$0xff] %v492_v45   ;;  %531 = vst [vmem:[%s775_s4 + $0x30] sm:$0xff] %v512_v46  }

// kernel: network_forward.17
= control target key start
LH: loop header
LB: loop body
LE: loop exit
PB: predicated region body
PF: predicated region fallthrough
CT: control target
= control target key end

     0   :  { %s707_s12 = smov 0   ;;  %s709_s13 = smov 0   ;;  %s942_s0 = inlined_call_operand.vmem [shape: bf16[2,8,8,128], index: 0, kind: input, shape index: {}]   ;;  %s943_s1 = inlined_call_operand.vmem [shape: f32[3,3,128], index: 1, kind: input, shape index: {}]   ;;  %s944_s2 = inlined_call_operand.vmem [shape: f32[1,128], index: 2, kind: input, shape index: {}]   ;;  %s945_s3 = inlined_call_operand.vmem [shape: bf16[2,8,8,128], index: 3, kind: output, shape index: {}]  }
   0x1   :  { %s711_s14 = smov 0  }
   0x2 LB: > { %s25_s15 = sadd.s32 1, %s680_s13  ;;  %p585_p0 = scmp.ge.s32.totalorder %s684_s14, 1  ;;  %s684_s14 = sphi %s711_s14, %s13_s14   ;;  %s680_s13 = sphi %s709_s13, %s951_s13   ;;  %s676_s12 = sphi %s707_s12, %s950_s12  }
   0x3   : > { %p27_p1 = scmp.ge.s32.totalorder %s25_s15, 2  ;;  %p151_p2 = scmp.lt.s32.totalorder %s684_s14, 3 }
   0x5   : > { %s953_s15 = smov (%p27_p1, %s25_s15), 0  ;;  %p152_p3 = pnand %p585_p0, %p151_p2 }
   0x7   : > { %155 = sbr.rel (%p152_p3) target bundleno = 78 (0x4e), region = 32 }
   0xe   : > { %p179_p4 = scmp.lt.s32.totalorder %s676_s12, 1  ;;  %v260_v0 = vlaneseq  ;;  %v686_v1 = vmov 0.0   ;;  %v243_v3 = vld [vmem:[%s943_s1] sm:$0x7]  ;;  %v244_v6 = vld [vmem:[%s943_s1 + $0x4] sm:$0x7] }
   0xf   : > { %200 = vst [vmem:[#allocation2 + $0x10] sm:$0xff] %v686_v1  ;;  %198 = vst [vmem:[#allocation2] sm:$0xff] %v686_v1  ;;  %v245_v18 = vld [vmem:[%s943_s1 + $0x8] sm:$0x7] }
  0x10   : > { %199 = vst [vmem:[#allocation2 + $0x8] sm:$0x3] %v686_v1  ;;  %201 = vst [vmem:[#allocation2 + $0x18] sm:$0x3] %v686_v1  ;;  %s955_s12 = smov (!%p179_p4, %s676_s12), 1  ;;  %v261_v2 = vshrl.u32 %v260_v0, 7 }
  0x11   : > { %202 = vst [vmem:[#allocation2 + $0x20] sm:$0xff] %v686_v1  ;;  %203 = vst [vmem:[#allocation2 + $0x28] sm:$0x3] %v686_v1  ;;  %s593_s18 = sshll.u32 %s955_s12, 5 }
  0x12   : > { %204 = vst [vmem:[#allocation2 + $0x30] sm:$0xff] %v686_v1  ;;  %205 = vst [vmem:[#allocation2 + $0x38] sm:$0x3] %v686_v1  ;;  %v262_v4 = vsub.s32 0, %v261_v2  ;;  %v332_v5 = vsub.s32 1, %v261_v2  ;;  %s183_s21 = scalar_lea.vmem %s942_s0, %s593_s18  ;;  %v402_v12 = vsub.s32 2, %v261_v2  ;;  %s901_s30 = scalar_lea.vmem %s945_s3, %s593_s18 }
  0x13   : > { %206 = vst [vmem:[#allocation2 + $0x40] sm:$0xff] %v686_v1  ;;  %207 = vst [vmem:[#allocation2 + $0x48] sm:$0x3] %v686_v1  ;;  %v596_v7 = vld [vmem:[%s183_s21] sm:$0xff]   ;;  %v631_v8 = vld [vmem:[%s183_s21 + $0x8] sm:$0xff]  }
  0x14   : > { %208 = vst [vmem:[#allocation2 + $0x50] sm:$0xff] %v686_v1  ;;  %209 = vst [vmem:[#allocation2 + $0x58] sm:$0x3] %v686_v1  ;;  %v632_v9 = vld [vmem:[%s183_s21 + $0x10] sm:$0xff]   ;;  %v745_v10 = vrot.slane %v243_v3, %v262_v4  ;;  %v333_v11 = vrot.slane %v243_v3, %v332_v5  ;;  %v597_v13 = vunpack.c.l.bf16 %v596_v7  ;;  %v598_v14 = vunpack.c.h.bf16 %v596_v7  ;;  %v633_v17 = vld [vmem:[%s183_s21 + $0x18] sm:$0xff]  }
  0x15   : > { %210 = vst [vmem:[#allocation2 + $0x60] sm:$0xff] %v686_v1  ;;  %211 = vst [vmem:[#allocation2 + $0x68] sm:$0x3] %v686_v1  ;;  %v601_v15 = vunpack.c.l.bf16 %v631_v8  ;;  %v602_v16 = vunpack.c.h.bf16 %v631_v8  ;;  %v605_v19 = vunpack.c.l.bf16 %v632_v9  ;;  %v606_v20 = vunpack.c.h.bf16 %v632_v9 }
  0x16   : > { %212 = vst [vmem:[#allocation2 + $0x70] sm:$0xff] %v686_v1  ;;  %213 = vst [vmem:[#allocation2 + $0x78] sm:$0x3] %v686_v1  ;;  %v750_v21 = vunpack.c.l.bf16 %v633_v17  ;;  %v752_v22 = vunpack.c.h.bf16 %v633_v17  ;;  %v754_v24 = vrot.slane %v244_v6, %v262_v4  ;;  %v756_v25 = vrot.slane %v244_v6, %v332_v5 }
  0x17   : > { %214 = vst [vmem:[#allocation2 + $0x80] sm:$0xff] %v686_v1  ;;  %215 = vst [vmem:[#allocation2 + $0x88] sm:$0x3] %v686_v1  ;;  %v320_v23 = vld [vmem:[#allocation2 + $0x1] sm:$0xff]  ;;  %v264_v26 = vmul.f32 0.0, %v745_v10  ;;  %v761_v27 = vrot.slane %v245_v18, %v262_v4  ;;  %v763_v29 = vrot.slane %v245_v18, %v332_v5  ;;  %v335_v31 = vmul.f32 %v597_v13, %v333_v11 }
  0x18   : > { %216 = vst [vmem:[#allocation2 + $0x90] sm:$0xff] %v686_v1  ;;  %217 = vst [vmem:[#allocation2 + $0x98] sm:$0x3] %v686_v1  ;;  %v334_v28 = vmul.f32 %v333_v11, %v320_v23  ;;  %v390_v30 = vld [vmem:[#allocation2 + $0x2] sm:$0xff]  ;;  %v765_v32 = vrot.slane %v243_v3, %v402_v12  ;;  %v767_v33 = vrot.slane %v244_v6, %v402_v12 }
  0x19   : > { %235 = vst [vmem:[#allocation2 + $0x11] sm:$0xff] %v597_v13  ;;  %236 = vst [vmem:[#allocation2 + $0x21] sm:$0xff] %v598_v14  ;;  %v769_v34 = vrot.slane %v245_v18, %v402_v12  ;;  %v772_v35 = vmul.f32 %v597_v13, %v756_v25  ;;  %v775_v36 = vmul.f32 %v598_v14, %v756_v25  ;;  %v820_v55 = vmul.f32 0.0, %v761_v27 }
  0x1a   : > { %237 = vst [vmem:[#allocation2 + $0x31] sm:$0xff] %v601_v15  ;;  %238 = vst [vmem:[#allocation2 + $0x41] sm:$0xff] %v602_v16  ;;  %v777_v37 = vmul.f32 %v598_v14, %v333_v11  ;;  %v779_v38 = vmul.f32 %v601_v15, %v333_v11  ;;  %v782_v39 = vmul.f32 %v598_v14, %v763_v29 }
  0x1b   : > { %239 = vst [vmem:[#allocation2 + $0x51] sm:$0xff] %v605_v19  ;;  %240 = vst [vmem:[#allocation2 + $0x61] sm:$0xff] %v606_v20  ;;  %v785_v40 = vmul.f32 %v601_v15, %v763_v29  ;;  %v788_v41 = vmul.f32 %v765_v32, %v390_v30  ;;  %v791_v42 = vmul.f32 %v601_v15, %v756_v25 }
  0x1c   : > { %241 = vst [vmem:[#allocation2 + $0x71] sm:$0xff] %v750_v21  ;;  %242 = vst [vmem:[#allocation2 + $0x81] sm:$0xff] %v752_v22  ;;  %v794_v43 = vmul.f32 %v602_v16, %v756_v25  ;;  %v797_v44 = vmul.f32 %v602_v16, %v763_v29  ;;  %v800_v45 = vmul.f32 %v605_v19, %v763_v29 }
  0x1d   : > { %948 = vst [vmem:[#allocation3_spill] sm:$0xff] %v763_v29  ;;  %v802_v46 = vmul.f32 %v602_v16, %v333_v11  ;;  %v804_v47 = vmul.f32 %v605_v19, %v333_v11  ;;  %v807_v48 = vmul.f32 %v605_v19, %v756_v25  ;;  %v810_v49 = vmul.f32 %v606_v20, %v756_v25 }
  0x1e   : > { %v813_v50 = vmul.f32 %v606_v20, %v763_v29  ;;  %v817_v54 = vmul.f32 %v750_v21, %v763_v29  ;;  %v822_v56 = vmul.f32 %v606_v20, %v333_v11  ;;  %v825_v57 = vmul.f32 %v750_v21, %v333_v11 }
  0x20   : > { %v251_v51 = vld [vmem:[#allocation2 + $0x10] sm:$0xff]  ;;  %v252_v52 = vld [vmem:[#allocation2 + $0x20] sm:$0xff] }
  0x21   : > { %v253_v53 = vld [vmem:[#allocation2 + $0x30] sm:$0xff]  ;;  %v265_v58 = vmul.f32 %v745_v10, %v251_v51  ;;  %v284_v59 = vmul.f32 %v754_v24, %v251_v51  ;;  %v285_v60 = vmul.f32 %v754_v24, %v252_v52  ;;  %v304_v61 = vmul.f32 %v761_v27, %v252_v52  ;;  %v392_v63 = vld [vmem:[#allocation2 + $0x22] sm:$0xff] }
  0x22   : > { %v391_v62 = vld [vmem:[#allocation2 + $0x12] sm:$0xff]  ;;  %v305_v1 = vmul.f32 %v761_v27, %v253_v53  ;;  %v425_v4 = vmul.f32 %v767_v33, %v392_v63  ;;  %v254_v5 = vld [vmem:[#allocation2 + $0x40] sm:$0xff]  ;;  %v444_v9 = vmul.f32 %v769_v34, %v392_v63  ;;  %v266_v12 = vmul.f32 %v745_v10, %v252_v52 }
  0x23   : > { %v393_v0 = vld [vmem:[#allocation2 + $0x32] sm:$0xff]  ;;  %v405_v2 = vmul.f32 %v765_v32, %v391_v62  ;;  %v424_v3 = vmul.f32 %v767_v33, %v391_v62  ;;  %v292_v7 = vadd.f32 %v284_v59, %v264_v26  ;;  %v293_v8 = vadd.f32 %v285_v60, %v265_v58  ;;  %v394_v16 = vld [vmem:[#allocation2 + $0x42] sm:$0xff] }
  0x24   : > { %v255_v6 = vld [vmem:[#allocation2 + $0x50] sm:$0xff]  ;;  %v445_v11 = vmul.f32 %v769_v34, %v393_v0  ;;  %v267_v13 = vmul.f32 %v745_v10, %v253_v53  ;;  %v286_v14 = vmul.f32 %v754_v24, %v253_v53  ;;  %v287_v15 = vmul.f32 %v754_v24, %v254_v5  ;;  %v256_v62 = vld [vmem:[#allocation2 + $0x60] sm:$0xff] }
  0x25   : > { %v312_v17 = vadd.f32 %v304_v61, %v292_v7  ;;  %v313_v18 = vadd.f32 %v305_v1, %v293_v8  ;;  %v306_v19 = vmul.f32 %v761_v27, %v254_v5  ;;  %v307_v20 = vmul.f32 %v761_v27, %v255_v6  ;;  %v395_v23 = vld [vmem:[#allocation2 + $0x52] sm:$0xff] }
  0x26   : > { %v294_v26 = vadd.f32 %v286_v14, %v266_v12  ;;  %v295_v30 = vadd.f32 %v287_v15, %v267_v13  ;;  %v406_v51 = vmul.f32 %v765_v32, %v392_v63  ;;  %v407_v52 = vmul.f32 %v765_v32, %v393_v0  ;;  %v257_v29 = vld [vmem:[#allocation2 + $0x70] sm:$0xff] }
  0x27   : > { %v342_v58 = vadd.f32 %v334_v28, %v312_v17  ;;  %v343_v59 = vadd.f32 %v335_v31, %v313_v18  ;;  %v426_v53 = vmul.f32 %v767_v33, %v393_v0  ;;  %v427_v60 = vmul.f32 %v767_v33, %v394_v16 }
  0x28   : > { %v314_v61 = vadd.f32 %v306_v19, %v294_v26  ;;  %v315_v1 = vadd.f32 %v307_v20, %v295_v30  ;;  %v446_v7 = vmul.f32 %v769_v34, %v394_v16  ;;  %v447_v8 = vmul.f32 %v769_v34, %v395_v23  ;;  %v863_v26 = vld [vmem:[#allocation2 + $0x62] sm:$0xff] }
  0x29   : > { %v362_v12 = vadd.f32 %v772_v35, %v342_v58  ;;  %v363_v63 = vadd.f32 %v775_v36, %v343_v59  ;;  %v268_v13 = vmul.f32 %v745_v10, %v254_v5  ;;  %v269_v28 = vmul.f32 %v745_v10, %v255_v6 }
  0x2a   : > { %v344_v31 = vadd.f32 %v777_v37, %v314_v61  ;;  %v345_v0 = vadd.f32 %v779_v38, %v315_v1  ;;  %v288_v14 = vmul.f32 %v754_v24, %v255_v6  ;;  %v289_v15 = vmul.f32 %v754_v24, %v256_v62 }
  0x2b   : > { %v382_v17 = vadd.f32 %v782_v39, %v362_v12  ;;  %v383_v18 = vadd.f32 %v785_v40, %v363_v63  ;;  %v308_v35 = vmul.f32 %v761_v27, %v256_v62  ;;  %v309_v36 = vmul.f32 %v761_v27, %v257_v29 }
  0x2c   : > { %v364_v5 = vadd.f32 %v791_v42, %v344_v31  ;;  %v365_v19 = vadd.f32 %v794_v43, %v345_v0  ;;  %v296_v20 = vadd.f32 %v288_v14, %v268_v13  ;;  %v297_v37 = vadd.f32 %v289_v15, %v269_v28  ;;  %v870_v42 = vld [vmem:[#allocation2 + $0x72] sm:$0xff] }
  0x2d   : > { %v412_v38 = vadd.f32 %v788_v41, %v382_v17  ;;  %v413_v6 = vadd.f32 %v405_v2, %v383_v18  ;;  %v408_v30 = vmul.f32 %v765_v32, %v394_v16  ;;  %v409_v39 = vmul.f32 %v765_v32, %v395_v23  ;;  %v878_v2 = vld [vmem:[%s944_s2] ss:$0 sm:$0xff] }
  0x2e   : > { %v384_v40 = vadd.f32 %v797_v44, %v364_v5  ;;  %v385_v58 = vadd.f32 %v800_v45, %v365_v19  ;;  %v316_v59 = vadd.f32 %v308_v35, %v296_v20  ;;  %v317_v61 = vadd.f32 %v309_v36, %v297_v37  ;;  %v329_v20 = vld [vmem:[#allocation2 + $0x91] sm:$0xff] }
  0x2f   : > { %v432_v43 = vadd.f32 %v424_v3, %v412_v38  ;;  %v433_v1 = vadd.f32 %v425_v4, %v413_v6  ;;  %v428_v12 = vmul.f32 %v767_v33, %v395_v23  ;;  %v429_v41 = vmul.f32 %v767_v33, %v863_v26 }
  0x30   : > { %v414_v16 = vadd.f32 %v406_v51, %v384_v40  ;;  %v415_v44 = vadd.f32 %v407_v52, %v385_v58  ;;  %v346_v45 = vadd.f32 %v802_v46, %v316_v59  ;;  %v347_v63 = vadd.f32 %v804_v47, %v317_v61  ;;  %v258_v52 = vld [vmem:[#allocation2 + $0x80] sm:$0xff] }
  0x31   : > { %v452_v13 = vadd.f32 %v444_v9, %v432_v43  ;;  %v453_v28 = vadd.f32 %v445_v11, %v433_v1  ;;  %v448_v3 = vmul.f32 %v769_v34, %v863_v26  ;;  %v449_v4 = vmul.f32 %v769_v34, %v870_v42  ;;  %v949_v61 = vld [vmem:[#allocation3_spill] sm:$0xff] }
  0x32   : > { %v434_v23 = vadd.f32 %v426_v53, %v414_v16  ;;  %v435_v31 = vadd.f32 %v427_v60, %v415_v44  ;;  %v366_v0 = vadd.f32 %v807_v48, %v346_v45  ;;  %v367_v51 = vadd.f32 %v810_v49, %v347_v63  ;;  %v398_v44 = vld [vmem:[#allocation2 + $0x82] sm:$0xff] }
  0x33   : > { %v466_v46 = vadd.f32 %v878_v2, %v452_v13  ;;  %v467_v47 = vadd.f32 %v878_v2, %v453_v28  ;;  %v270_v9 = vmul.f32 %v745_v10, %v256_v62  ;;  %v271_v11 = vmul.f32 %v745_v10, %v257_v29  ;;  %v399_v13 = vld [vmem:[#allocation2 + $0x92] sm:$0xff] }
  0x34   : > { %v454_v14 = vadd.f32 %v446_v7, %v434_v23  ;;  %v455_v15 = vadd.f32 %v447_v8, %v435_v31  ;;  %v386_v17 = vadd.f32 %v813_v50, %v366_v0  ;;  %v387_v53 = vadd.f32 %v817_v54, %v367_v51 }
  0x35   : > { %v474_v60 = vmax.f32 %v466_v46, 0.0  ;;  %v475_v18 = vmax.f32 %v467_v47, 0.0  ;;  %v290_v48 = vmul.f32 %v754_v24, %v257_v29  ;;  %v291_v49 = vmul.f32 %v754_v24, %v258_v52 }
  0x36   : > { %v468_v10 = vadd.f32 %v878_v2, %v454_v14  ;;  %v469_v62 = vadd.f32 %v878_v2, %v455_v15  ;;  %v416_v50 = vadd.f32 %v408_v30, %v386_v17  ;;  %v417_v7 = vadd.f32 %v409_v39, %v387_v53 }
  0x37   : > { %v614_v54 = vpack.c.bf16 %v475_v18, %v474_v60  ;;  %v298_v8 = vadd.f32 %v290_v48, %v270_v9  ;;  %v299_v35 = vadd.f32 %v291_v49, %v271_v11  ;;  %v310_v29 = vmul.f32 %v761_v27, %v258_v52 }
  0x38   : > { %v476_v36 = vmax.f32 %v468_v10, 0.0  ;;  %v477_v24 = vmax.f32 %v469_v62, 0.0  ;;  %v436_v5 = vadd.f32 %v428_v12, %v416_v50  ;;  %v437_v19 = vadd.f32 %v429_v41, %v417_v7 }
  0x39   : > { %615 = vst [vmem:[%s901_s30] sm:$0xff] %v614_v54   ;;  %v318_v37 = vadd.f32 %v310_v29, %v298_v8  ;;  %v319_v38 = vadd.f32 %v820_v55, %v299_v35  ;;  %v360_v6 = vmul.f32 %v750_v21, %v756_v25  ;;  %v361_v30 = vmul.f32 %v752_v22, %v756_v25 }
  0x3a   : > { %v619_v39 = vpack.c.bf16 %v477_v24, %v476_v36  ;;  %v456_v40 = vadd.f32 %v448_v3, %v436_v5  ;;  %v457_v58 = vadd.f32 %v449_v4, %v437_v19  ;;  %v380_v43 = vmul.f32 %v752_v22, %v949_v61 }
  0x3b   : > { %v348_v27 = vadd.f32 %v822_v56, %v318_v37  ;;  %v349_v59 = vadd.f32 %v825_v57, %v319_v38  ;;  %v381_v1 = vmul.f32 %v949_v61, %v329_v20  ;;  %v410_v57 = vmul.f32 %v765_v32, %v863_v26 }
  0x3c   : > { %634 = vst [vmem:[%s901_s30 + $0x8] sm:$0xff] %v619_v39   ;;  %v470_v55 = vadd.f32 %v878_v2, %v456_v40  ;;  %v471_v21 = vadd.f32 %v878_v2, %v457_v58  ;;  %v411_v22 = vmul.f32 %v765_v32, %v870_v42  ;;  %v430_v4 = vmul.f32 %v767_v33, %v870_v42 }
  0x3d   : > { %v368_v12 = vadd.f32 %v360_v6, %v348_v27  ;;  %v369_v25 = vadd.f32 %v361_v30, %v349_v59  ;;  %v431_v23 = vmul.f32 %v767_v33, %v398_v44  ;;  %v450_v51 = vmul.f32 %v769_v34, %v398_v44 }
  0x3e   : > { %v478_v41 = vmax.f32 %v470_v55, 0.0  ;;  %v479_v16 = vmax.f32 %v471_v21, 0.0  ;;  %v451_v26 = vmul.f32 %v769_v34, %v399_v13 }
  0x3f   : > { %v388_v45 = vadd.f32 %v380_v43, %v368_v12  ;;  %v389_v56 = vadd.f32 %v381_v1, %v369_v25 }
  0x40   : > { %v624_v63 = vpack.c.bf16 %v479_v16, %v478_v41 }
  0x41   : > { %v418_v28 = vadd.f32 %v410_v57, %v388_v45  ;;  %v419_v3 = vadd.f32 %v411_v22, %v389_v56 }
  0x42   : > { %635 = vst [vmem:[%s901_s30 + $0x10] sm:$0xff] %v624_v63  }
  0x43   : > { %v438_v31 = vadd.f32 %v430_v4, %v418_v28  ;;  %v439_v0 = vadd.f32 %v431_v23, %v419_v3 }
  0x45   : > { %v458_v52 = vadd.f32 %v450_v51, %v438_v31  ;;  %v459_v46 = vadd.f32 %v451_v26, %v439_v0 }
  0x47   : > { %v472_v32 = vadd.f32 %v878_v2, %v458_v52  ;;  %v473_v47 = vadd.f32 %v878_v2, %v459_v46 }
  0x49   : > { %v480_v9 = vmax.f32 %v472_v32, 0.0  ;;  %v481_v11 = vmax.f32 %v473_v47, 0.0 }
  0x4b   : > { %v629_v14 = vpack.c.bf16 %v481_v11, %v480_v9 }
  0x4d   : > { %636 = vst [vmem:[%s901_s30 + $0x18] sm:$0xff] %v629_v14  }
  0x4e PF: > { %s13_s14 = sadd.s32 1, %s684_s14   ;;  %s950_s12 = smov %s680_s13 }
  0x4f   : > { %p10_p5 = scmp.ge.s32.totalorder %s13_s14, 4   ;;  %s951_s13 = smov %s953_s15 }
  0x51   :  { %12 = sbr.rel (!%p10_p5) target bundleno = 2 (0x2), region = 68 }

// kernel: network_forward.15
= control target key start
LH: loop header
LB: loop body
LE: loop exit
PB: predicated region body
PF: predicated region fallthrough
CT: control target
= control target key end

     0   :  { %s2926_s1 = inlined_call_operand.vmem [shape: bf16[1152,128], index: 1, kind: input, shape index: {}]   ;;  %s2927_s0 = inlined_call_operand.vmem [shape: bf16[128,1152], index: 0, kind: input, shape index: {}]   ;;  %s2928_s2 = inlined_call_operand.vmem [shape: f32[1,128], index: 2, kind: input, shape index: {}]   ;;  %s2929_s3 = inlined_call_operand.vmem [shape: bf16[128,128], index: 3, kind: output, shape index: {}]  }
   0x1   :  { %v2175_v0 = vld [vmem:[%s2926_s1 + $0x40] sm:$0xff]   ;;  %v2179_v4 = vld [vmem:[%s2926_s1 + $0x48] sm:$0xff]   ;;  %v2183_v8 = vld [vmem:[%s2926_s1 + $0x50] sm:$0xff]  }
   0x2   :  { %v2176_v1 = vld [vmem:[%s2926_s1 + $0xc0] sm:$0xff]   ;;  %1855 = vmatprep.subr.bf16.mxu0 %v2175_v0  ;;  %v2180_v5 = vld [vmem:[%s2926_s1 + $0xc8] sm:$0xff]   ;;  %v2184_v9 = vld [vmem:[%s2926_s1 + $0xd0] sm:$0xff]  }
   0x3   :  { %v2177_v2 = vld [vmem:[%s2926_s1] sm:$0xff]   ;;  %1919 = vmatprep.subr.bf16.mxu1 %v2176_v1  ;;  %v2181_v6 = vld [vmem:[%s2926_s1 + $0x8] sm:$0xff]   ;;  %v2185_v10 = vld [vmem:[%s2926_s1 + $0x10] sm:$0xff]  }
   0x4   :  { %v2178_v3 = vld [vmem:[%s2926_s1 + $0x80] sm:$0xff]   ;;  %1856 = vmatpush3.bf16.msra.mxu0 %v2177_v2  ;;  %v2182_v7 = vld [vmem:[%s2926_s1 + $0x88] sm:$0xff]   ;;  %v2186_v11 = vld [vmem:[%s2926_s1 + $0x90] sm:$0xff]  }
   0x5   :  { %1920 = vmatpush3.bf16.msra.mxu1 %v2178_v3  ;;  %1857 = vmatprep.subr.bf16.mxu0 %v2179_v4  ;;  %v2187_v12 = vld [vmem:[%s2926_s1 + $0x58] sm:$0xff]   ;;  %v2191_v16 = vld [vmem:[%s2926_s1 + $0x60] sm:$0xff]   ;;  %v2195_v20 = vld [vmem:[%s2926_s1 + $0x68] sm:$0xff]  }
   0x6   :  { %1921 = vmatprep.subr.bf16.mxu1 %v2180_v5  ;;  %v2188_v13 = vld [vmem:[%s2926_s1 + $0xd8] sm:$0xff]   ;;  %v2192_v17 = vld [vmem:[%s2926_s1 + $0xe0] sm:$0xff]   ;;  %v2196_v21 = vld [vmem:[%s2926_s1 + $0xe8] sm:$0xff]  }
   0x7   :  { %v2189_v14 = vld [vmem:[%s2926_s1 + $0x18] sm:$0xff]   ;;  %v2193_v18 = vld [vmem:[%s2926_s1 + $0x20] sm:$0xff]   ;;  %v2197_v22 = vld [vmem:[%s2926_s1 + $0x28] sm:$0xff]  }
   0x8   :  { %1858 = vmatpush3.bf16.msra.mxu0 %v2181_v6  ;;  %v2190_v15 = vld [vmem:[%s2926_s1 + $0x98] sm:$0xff]   ;;  %v2194_v19 = vld [vmem:[%s2926_s1 + $0xa0] sm:$0xff]   ;;  %v2198_v23 = vld [vmem:[%s2926_s1 + $0xa8] sm:$0xff]  }
   0x9   :  { %1922 = vmatpush3.bf16.msra.mxu1 %v2182_v7  ;;  %1859 = vmatprep.subr.bf16.mxu0 %v2183_v8  ;;  %v2199_v24 = vld [vmem:[%s2926_s1 + $0x70] sm:$0xff]   ;;  %v2203_v28 = vld [vmem:[%s2926_s1 + $0x78] sm:$0xff]   ;;  %v2207_v32 = vld [vmem:[%s2927_s0] ss:$36 sps:$4 sm:$0xff]  }
   0xa   :  { %1923 = vmatprep.subr.bf16.mxu1 %v2184_v9  ;;  %v2200_v25 = vld [vmem:[%s2926_s1 + $0xf0] sm:$0xff]   ;;  %v2204_v29 = vld [vmem:[%s2926_s1 + $0xf8] sm:$0xff]   ;;  %v2209_v33 = vld [vmem:[%s2927_s0 + $0x4] ss:$36 sps:$4 sm:$0xff]  }
   0xb   :  { %v2201_v26 = vld [vmem:[%s2926_s1 + $0x30] sm:$0xff]   ;;  %v2205_v30 = vld [vmem:[%s2926_s1 + $0x38] sm:$0xff]   ;;  %v2210_v34 = vld [vmem:[%s2927_s0 + $0x8] ss:$36 sps:$4 sm:$0xff]   ;;  %1078 = vmatprep.mubr.bf16.mxu0 %v2209_v33 }
   0xc   :  { %1860 = vmatpush3.bf16.msra.mxu0 %v2185_v10  ;;  %v2202_v27 = vld [vmem:[%s2926_s1 + $0xb0] sm:$0xff]   ;;  %v2206_v31 = vld [vmem:[%s2926_s1 + $0xb8] sm:$0xff]   ;;  %v2213_v36 = vld [vmem:[%s2926_s1 + $0x140] sm:$0xff]  }
   0xd   :  { %1924 = vmatpush3.bf16.msra.mxu1 %v2186_v11  ;;  %1861 = vmatprep.subr.bf16.mxu0 %v2187_v12  ;;  %v2212_v35 = vld [vmem:[%s2927_s0 + $0xc] ss:$36 sps:$4 sm:$0xff]   ;;  %v2214_v37 = vld [vmem:[%s2926_s1 + $0x1c0] sm:$0xff]   ;;  %v2219_v41 = vld [vmem:[%s2927_s0 + $0x54] ss:$36 sps:$4 sm:$0xff]  }
   0xe   :  { %1925 = vmatprep.subr.bf16.mxu1 %v2188_v13  ;;  %1175 = vmatprep.mubr.bf16.mxu1 %v2212_v35  ;;  %v2215_v38 = vld [vmem:[%s2926_s1 + $0x100] sm:$0xff]   ;;  %v2217_v40 = vld [vmem:[%s2927_s0 + $0x4c] ss:$36 sps:$4 sm:$0xff]   ;;  %v2227_v48 = vld [vmem:[%s2927_s0 + $0x94] ss:$36 sps:$4 sm:$0xff]  }
   0xf   :  { %v2216_v39 = vld [vmem:[%s2926_s1 + $0x180] sm:$0xff]   ;;  %v2221_v42 = vld [vmem:[%s2927_s0 + $0x48] ss:$36 sps:$4 sm:$0xff]   ;;  %v2222_v43 = vld [vmem:[%s2927_s0 + $0x50] ss:$36 sps:$4 sm:$0xff]  }
  0x10   :  { %1862 = vmatpush3.bf16.msra.mxu0 %v2189_v14  ;;  %v2223_v44 = vld [vmem:[%s2926_s1 + $0x148] sm:$0xff]   ;;  %v2229_v49 = vld [vmem:[%s2927_s0 + $0x9c] ss:$36 sps:$4 sm:$0xff]   ;;  %v2231_v50 = vld [vmem:[%s2927_s0 + $0x90] ss:$36 sps:$4 sm:$0xff]  }
  0x11   :  { %1926 = vmatpush3.bf16.msra.mxu1 %v2190_v15  ;;  %1863 = vmatprep.subr.bf16.mxu0 %v2191_v16  ;;  %v2224_v45 = vld [vmem:[%s2926_s1 + $0x1c8] sm:$0xff]   ;;  %v2232_v51 = vld [vmem:[%s2927_s0 + $0x98] ss:$36 sps:$4 sm:$0xff]   ;;  %v2233_v52 = vld [vmem:[%s2926_s1 + $0x150] sm:$0xff]  }
  0x12   :  { %1927 = vmatprep.subr.bf16.mxu1 %v2192_v17  ;;  %v2225_v46 = vld [vmem:[%s2926_s1 + $0x108] sm:$0xff]   ;;  %v2234_v53 = vld [vmem:[%s2926_s1 + $0x1d0] sm:$0xff]   ;;  %v2237_v56 = vld [vmem:[%s2927_s0 + $0xdc] ss:$36 sps:$4 sm:$0xff]  }
  0x13   :  { %v2226_v47 = vld [vmem:[%s2926_s1 + $0x188] sm:$0xff]   ;;  %v2235_v54 = vld [vmem:[%s2926_s1 + $0x110] sm:$0xff]   ;;  %v2241_v58 = vld [vmem:[%s2927_s0 + $0xd8] ss:$36 sps:$4 sm:$0xff]  }
  0x14   :  { %1864 = vmatpush3.bf16.msra.mxu0 %v2193_v18  ;;  %v2236_v55 = vld [vmem:[%s2926_s1 + $0x190] sm:$0xff]   ;;  %v2239_v57 = vld [vmem:[%s2927_s0 + $0xe4] ss:$36 sps:$4 sm:$0xff]   ;;  %v2243_v60 = vld [vmem:[%s2926_s1 + $0x158] sm:$0xff]  }
  0x15   :  { %1928 = vmatpush3.bf16.msra.mxu1 %v2194_v19  ;;  %1865 = vmatprep.subr.bf16.mxu0 %v2195_v20  ;;  %v2242_v59 = vld [vmem:[%s2927_s0 + $0xe0] ss:$36 sps:$4 sm:$0xff]   ;;  %v2244_v61 = vld [vmem:[%s2926_s1 + $0x1d8] sm:$0xff]   ;;  %v2249_v1 = vld [vmem:[%s2927_s0 + $0x12c] ss:$36 sps:$4 sm:$0xff]  }
  0x16   :  { %1929 = vmatprep.subr.bf16.mxu1 %v2196_v21  ;;  %v2245_v62 = vld [vmem:[%s2926_s1 + $0x118] sm:$0xff]   ;;  %v2247_v0 = vld [vmem:[%s2927_s0 + $0x124] ss:$36 sps:$4 sm:$0xff]   ;;  %v2257_v8 = vld [vmem:[%s2927_s0 + $0x16c] ss:$36 sps:$4 sm:$0xff]  }
  0x17   :  { %v2246_v63 = vld [vmem:[%s2926_s1 + $0x198] sm:$0xff]   ;;  %v2251_v2 = vld [vmem:[%s2927_s0 + $0x120] ss:$36 sps:$4 sm:$0xff]   ;;  %v2252_v4 = vld [vmem:[%s2927_s0 + $0x128] ss:$36 sps:$4 sm:$0xff]  }
  0x18   :  { %1866 = vmatpush3.bf16.msra.mxu0 %v2197_v22  ;;  %v2253_v3 = vld [vmem:[%s2926_s1 + $0x160] sm:$0xff]   ;;  %v2259_v9 = vld [vmem:[%s2927_s0 + $0x174] ss:$36 sps:$4 sm:$0xff]   ;;  %v2263_v10 = vld [vmem:[%s2926_s1 + $0x168] sm:$0xff]  }
  0x19   :  { %1930 = vmatpush3.bf16.msra.mxu1 %v2198_v23  ;;  %1867 = vmatprep.subr.bf16.mxu0 %v2199_v24  ;;  %v2254_v5 = vld [vmem:[%s2926_s1 + $0x1e0] sm:$0xff]   ;;  %v2264_v11 = vld [vmem:[%s2926_s1 + $0x1e8] sm:$0xff]   ;;  %v2262_v15 = vld [vmem:[%s2927_s0 + $0x170] ss:$36 sps:$4 sm:$0xff]  }
  0x1a   :  { %1931 = vmatprep.subr.bf16.mxu1 %v2200_v25  ;;  %v2255_v6 = vld [vmem:[%s2926_s1 + $0x120] sm:$0xff]   ;;  %v2261_v12 = vld [vmem:[%s2927_s0 + $0x168] ss:$36 sps:$4 sm:$0xff]   ;;  %v2267_v16 = vld [vmem:[%s2927_s0 + $0x1b4] ss:$36 sps:$4 sm:$0xff]  }
  0x1b   :  { %v2256_v7 = vld [vmem:[%s2926_s1 + $0x1a0] sm:$0xff]   ;;  %v2265_v13 = vld [vmem:[%s2926_s1 + $0x128] sm:$0xff]   ;;  %v2273_v18 = vld [vmem:[%s2926_s1 + $0x170] sm:$0xff]  }
  0x1c   :  { %1868 = vmatpush3.bf16.msra.mxu0 %v2201_v26  ;;  %v2266_v14 = vld [vmem:[%s2926_s1 + $0x1a8] sm:$0xff]   ;;  %v2269_v17 = vld [vmem:[%s2927_s0 + $0x1bc] ss:$36 sps:$4 sm:$0xff]   ;;  %v2274_v19 = vld [vmem:[%s2926_s1 + $0x1f0] sm:$0xff]  }
  0x1d   :  { %1932 = vmatpush3.bf16.msra.mxu1 %v2202_v27  ;;  %1869 = vmatprep.subr.bf16.mxu0 %v2203_v28  ;;  %v2275_v20 = vld [vmem:[%s2926_s1 + $0x130] sm:$0xff]   ;;  %v2272_v23 = vld [vmem:[%s2927_s0 + $0x1b8] ss:$36 sps:$4 sm:$0xff]   ;;  %v2279_v25 = vld [vmem:[%s2927_s0 + $0x204] ss:$36 sps:$4 sm:$0xff]  }
  0x1e   :  { %1933 = vmatprep.subr.bf16.mxu1 %v2204_v29  ;;  %v2276_v21 = vld [vmem:[%s2926_s1 + $0x1b0] sm:$0xff]   ;;  %v2277_v24 = vld [vmem:[%s2927_s0 + $0x1fc] ss:$36 sps:$4 sm:$0xff]  }
  0x1f   :  { %v2271_v22 = vld [vmem:[%s2927_s0 + $0x1b0] ss:$36 sps:$4 sm:$0xff]   ;;  %v2283_v26 = vld [vmem:[%s2926_s1 + $0x178] sm:$0xff]  }
  0x20   :  { %1870 = vmatpush3.bf16.msra.mxu0 %v2205_v30  ;;  %v2284_v27 = vld [vmem:[%s2926_s1 + $0x1f8] sm:$0xff]   ;;  %v2287_v35 = vld [vmem:[%s2927_s0 + $0x10] ss:$36 sps:$4 sm:$0xff]  }
  0x21   :  { %1934 = vmatpush3.bf16.msra.mxu1 %v2206_v31  ;;  %1983 = vmatprep.subr.bf16.mxu0 %v2213_v36  ;;  %v2285_v28 = vld [vmem:[%s2926_s1 + $0x138] sm:$0xff]   ;;  %v2282_v31 = vld [vmem:[%s2927_s0 + $0x200] ss:$36 sps:$4 sm:$0xff]  }
  0x22   :  { %2047 = vmatprep.subr.bf16.mxu1 %v2214_v37  ;;  %v2286_v29 = vld [vmem:[%s2926_s1 + $0x1b8] sm:$0xff]  }
  0x23   :  { %1079 = vmatmul.mubr.bf16.vlgmr.msra.gmra.mrb[0].mxu0 %v2207_v32  ;;  %v2281_v30 = vld [vmem:[%s2927_s0 + $0x1f8] ss:$36 sps:$4 sm:$0xff]   ;;  %v2293_v32 = vld [vmem:[%s2926_s1 + $0x200] sm:$0xff]  }
  0x24   :  { %1176 = vmatmul.mubr.bf16.vlgmr.msra.gmra.mrb[0].mxu1 %v2210_v34  ;;  %1984 = vmatpush3.bf16.msra.mxu0 %v2215_v38  ;;  %v2289_v33 = vld [vmem:[%s2927_s0 + $0x14] ss:$36 sps:$4 sm:$0xff]   ;;  %v2292_v34 = vld [vmem:[%s2927_s0 + $0x1c] ss:$36 sps:$4 sm:$0xff]   ;;  %v2296_v38 = vld [vmem:[%s2927_s0 + $0x64] ss:$36 sps:$4 sm:$0xff]  }
  0x25   :  { %2048 = vmatpush3.bf16.msra.mxu1 %v2216_v39  ;;  %1086 = vmatprep.mubr.bf16.mxu0 %v2217_v40  ;;  %v2290_v36 = vld [vmem:[%s2927_s0 + $0x18] ss:$36 sps:$4 sm:$0xff]   ;;  %v2300_v39 = vld [vmem:[%s2926_s1 + $0x208] sm:$0xff]   ;;  %v2307_v40 = vld [vmem:[%s2926_s1 + $0x210] sm:$0xff]  }
  0x26   :  { %1183 = vmatprep.mubr.bf16.mxu1 %v2219_v41  ;;  %1985 = vmatprep.subr.bf16.mxu0 %v2223_v44  ;;  %v2294_v37 = vld [vmem:[%s2927_s0 + $0x5c] ss:$36 sps:$4 sm:$0xff]   ;;  %v2303_v44 = vld [vmem:[%s2927_s0 + $0xac] ss:$36 sps:$4 sm:$0xff]  }
  0x27   :  { %2049 = vmatprep.subr.bf16.mxu1 %v2224_v45  ;;  %v2298_v41 = vld [vmem:[%s2927_s0 + $0x58] ss:$36 sps:$4 sm:$0xff]  }
  0x28   :  { %1986 = vmatpush3.bf16.msra.mxu0 %v2225_v46  ;;  %v2314_v45 = vld [vmem:[%s2926_s1 + $0x218] sm:$0xff]   ;;  %v2321_v46 = vld [vmem:[%s2926_s1 + $0x220] sm:$0xff]  }
  0x29   :  { %2050 = vmatpush3.bf16.msra.mxu1 %v2226_v47  ;;  %1987 = vmatprep.subr.bf16.mxu0 %v2233_v52  ;;  %v2305_v47 = vld [vmem:[%s2927_s0 + $0xa0] ss:$36 sps:$4 sm:$0xff]   ;;  %v2312_v52 = vld [vmem:[%s2927_s0 + $0xe8] ss:$36 sps:$4 sm:$0xff]  }
  0x2a   :  { %2051 = vmatprep.subr.bf16.mxu1 %v2234_v53  ;;  %v2335_v53 = vld [vmem:[%s2926_s1 + $0x230] sm:$0xff]  }
  0x2b   :  { %1087 = vmatmul.mubr.bf16.gmra.mrb[4].mxu0 %v2221_v42  ;;  %v2299_v42 = vld [vmem:[%s2927_s0 + $0x60] ss:$36 sps:$4 sm:$0xff]  }
  0x2c   :  { %1184 = vmatmul.mubr.bf16.gmra.mrb[4].mxu1 %v2222_v43  ;;  %1094 = vmatprep.mubr.bf16.mxu0 %v2227_v48  ;;  %v2301_v43 = vld [vmem:[%s2927_s0 + $0xa4] ss:$36 sps:$4 sm:$0xff]  }
  0x2d   :  { %1191 = vmatprep.mubr.bf16.mxu1 %v2229_v49  ;;  %1988 = vmatpush3.bf16.msra.mxu0 %v2235_v54  ;;  %v2306_v48 = vld [vmem:[%s2927_s0 + $0xa8] ss:$36 sps:$4 sm:$0xff]   ;;  %v2313_v54 = vld [vmem:[%s2927_s0 + $0xf0] ss:$36 sps:$4 sm:$0xff]  }
  0x2e   :  { %2052 = vmatpush3.bf16.msra.mxu1 %v2236_v55  ;;  %1989 = vmatprep.subr.bf16.mxu0 %v2243_v60  ;;  %v2308_v49 = vld [vmem:[%s2927_s0 + $0xec] ss:$36 sps:$4 sm:$0xff]   ;;  %v2315_v55 = vld [vmem:[%s2927_s0 + $0x134] ss:$36 sps:$4 sm:$0xff]   ;;  %v2322_v60 = vld [vmem:[%s2927_s0 + $0x17c] ss:$36 sps:$4 sm:$0xff]  }
  0x2f   :  { %2053 = vmatprep.subr.bf16.mxu1 %v2244_v61  ;;  %v2324_v61 = vld [vmem:[%s2927_s0 + $0x184] ss:$36 sps:$4 sm:$0xff]  }
  0x31   :  { %1990 = vmatpush3.bf16.msra.mxu0 %v2245_v62  ;;  %v2326_v62 = vld [vmem:[%s2927_s0 + $0x178] ss:$36 sps:$4 sm:$0xff]  }
  0x32   :  { %2054 = vmatpush3.bf16.msra.mxu1 %v2246_v63  ;;  %1991 = vmatprep.subr.bf16.mxu0 %v2253_v3  ;;  %v2327_v63 = vld [vmem:[%s2927_s0 + $0x180] ss:$36 sps:$4 sm:$0xff]   ;;  %v2334_v3 = vld [vmem:[%s2927_s0 + $0x1c8] ss:$36 sps:$4 sm:$0xff]  }
  0x33   :  { %1095 = vmatmul.mubr.bf16.gmra.mrb[8].mxu0 %v2231_v50  ;;  %2055 = vmatprep.subr.bf16.mxu1 %v2254_v5  ;;  %v2310_v50 = vld [vmem:[%s2927_s0 + $0xf4] ss:$36 sps:$4 sm:$0xff]  }
  0x34   :  { %1192 = vmatmul.mubr.bf16.gmra.mrb[8].mxu1 %v2232_v51  ;;  %1102 = vmatprep.mubr.bf16.mxu0 %v2237_v56  ;;  %v2328_v51 = vld [vmem:[%s2926_s1 + $0x228] sm:$0xff]   ;;  %v2317_v56 = vld [vmem:[%s2927_s0 + $0x13c] ss:$36 sps:$4 sm:$0xff]   ;;  %v2338_v5 = vld [vmem:[%s2927_s0 + $0x214] ss:$36 sps:$4 sm:$0xff]  }
  0x35   :  { %1199 = vmatprep.mubr.bf16.mxu1 %v2239_v57  ;;  %1992 = vmatpush3.bf16.msra.mxu0 %v2255_v6  ;;  %v2342_v57 = vld [vmem:[%s2926_s1 + $0x238] sm:$0xff]   ;;  %v2340_v6 = vld [vmem:[%s2927_s0 + $0x208] ss:$36 sps:$4 sm:$0xff]  }
  0x36   :  { %2056 = vmatpush3.bf16.msra.mxu1 %v2256_v7  ;;  %1993 = vmatprep.subr.bf16.mxu0 %v2263_v10  ;;  %v2341_v7 = vld [vmem:[%s2927_s0 + $0x210] ss:$36 sps:$4 sm:$0xff]   ;;  %v2345_v10 = vld [vmem:[%s2927_s0 + $0x68] ss:$36 sps:$4 sm:$0xff]  }
  0x37   :  { %2057 = vmatprep.subr.bf16.mxu1 %v2264_v11  ;;  %v2346_v11 = vld [vmem:[%s2927_s0 + $0x188] ss:$36 sps:$4 sm:$0xff]  }
  0x39   :  { %1994 = vmatpush3.bf16.msra.mxu0 %v2265_v13  ;;  %v2348_v13 = vld [vmem:[%s2927_s0 + $0x1d0] ss:$36 sps:$4 sm:$0xff]  }
  0x3a   :  { %2058 = vmatpush3.bf16.msra.mxu1 %v2266_v14  ;;  %1995 = vmatprep.subr.bf16.mxu0 %v2273_v18  ;;  %v2349_v14 = vld [vmem:[%s2927_s0 + $0xf8] ss:$36 sps:$4 sm:$0xff]   ;;  %v2806_v18 = vld [vmem:[%s2928_s2] ss:$0 sm:$0xff] }
  0x3b   :  { %1103 = vmatmul.mubr.bf16.gmra.mrb[12].mxu0 %v2241_v58  ;;  %2059 = vmatprep.subr.bf16.mxu1 %v2274_v19  ;;  %v2319_v58 = vld [vmem:[%s2927_s0 + $0x130] ss:$36 sps:$4 sm:$0xff]  }
  0x3c   :  { %1200 = vmatmul.mubr.bf16.gmra.mrb[12].mxu1 %v2242_v59  ;;  %1110 = vmatprep.mubr.bf16.mxu0 %v2247_v0  ;;  %v2320_v59 = vld [vmem:[%s2927_s0 + $0x138] ss:$36 sps:$4 sm:$0xff]   ;;  %v2329_v0 = vld [vmem:[%s2927_s0 + $0x1c4] ss:$36 sps:$4 sm:$0xff]  }
  0x3d   :  { %1207 = vmatprep.mubr.bf16.mxu1 %v2249_v1  ;;  %1996 = vmatpush3.bf16.msra.mxu0 %v2275_v20  ;;  %v2331_v1 = vld [vmem:[%s2927_s0 + $0x1cc] ss:$36 sps:$4 sm:$0xff]  }
  0x3e   :  { %2060 = vmatpush3.bf16.msra.mxu1 %v2276_v21  ;;  %1997 = vmatprep.subr.bf16.mxu0 %v2283_v26 }
  0x3f   :  { %2061 = vmatprep.subr.bf16.mxu1 %v2284_v27 }
  0x41   :  { %1998 = vmatpush3.bf16.msra.mxu0 %v2285_v28 }
  0x42   :  { %2062 = vmatpush3.bf16.msra.mxu1 %v2286_v29  ;;  %2127 = vmatprep.subr.bf16.mxu0 %v2293_v32 }
  0x43   :  { %1111 = vmatmul.mubr.bf16.gmra.mrb[16].mxu0 %v2251_v2  ;;  %2159 = vmatprep.subr.bf16.mxu1 %v2293_v32  ;;  %v2333_v2 = vld [vmem:[%s2927_s0 + $0x1c0] ss:$36 sps:$4 sm:$0xff]  }
  0x44   :  { %1208 = vmatmul.mubr.bf16.gmra.mrb[16].mxu1 %v2252_v4  ;;  %1118 = vmatprep.mubr.bf16.mxu0 %v2257_v8  ;;  %v2336_v4 = vld [vmem:[%s2927_s0 + $0x20c] ss:$36 sps:$4 sm:$0xff]   ;;  %v2343_v8 = vld [vmem:[%s2927_s0 + $0x20] ss:$36 sps:$4 sm:$0xff]  }
  0x45   :  { %1215 = vmatprep.mubr.bf16.mxu1 %v2259_v9  ;;  %v2344_v9 = vld [vmem:[%s2927_s0 + $0x140] ss:$36 sps:$4 sm:$0xff]  }
  0x4b   :  { %1119 = vmatmul.mubr.bf16.gmra.mrb[20].mxu0 %v2261_v12  ;;  %v2347_v12 = vld [vmem:[%s2927_s0 + $0xb0] ss:$36 sps:$4 sm:$0xff]  }
  0x4c   :  { %1216 = vmatmul.mubr.bf16.gmra.mrb[20].mxu1 %v2262_v15  ;;  %1126 = vmatprep.mubr.bf16.mxu0 %v2267_v16  ;;  %v2350_v15 = vld [vmem:[%s2927_s0 + $0x218] ss:$36 sps:$4 sm:$0xff]  }
  0x4d   :  { %1223 = vmatprep.mubr.bf16.mxu1 %v2269_v17 }
  0x53   :  { %1127 = vmatmul.mubr.bf16.gmra.mrb[24].mxu0 %v2271_v22 }
  0x54   :  { %1224 = vmatmul.mubr.bf16.gmra.mrb[24].mxu1 %v2272_v23  ;;  %1134 = vmatprep.mubr.bf16.mxu0 %v2277_v24 }
  0x55   :  { %1231 = vmatprep.mubr.bf16.mxu1 %v2279_v25 }
  0x5b   :  { %1135 = vmatmul.mubr.bf16.gmra.mrb[28].mxu0 %v2281_v30 }
  0x5c   :  { %1232 = vmatmul.mubr.bf16.gmra.mrb[28].mxu1 %v2282_v31  ;;  %1272 = vmatprep.mubr.bf16.mxu0 %v2289_v33 }
  0x5d   :  { %1369 = vmatprep.mubr.bf16.mxu1 %v2292_v34 }
  0x63   :  { %1273 = vmatmul.mubr.bf16.vlgmr.msra.gmra.mrb[32].mxu0 %v2287_v35 }
  0x64   :  { %1370 = vmatmul.mubr.bf16.vlgmr.msra.gmra.mrb[32].mxu1 %v2290_v36  ;;  %2128 = vmatpush3.bf16.msra.mxu0 %v2293_v32 }
  0x65   :  { %2167 = vmatpush3.bf16.msra.mxu1 %v2293_v32  ;;  %1280 = vmatprep.mubr.bf16.mxu0 %v2294_v37 }
  0x66   :  { %1377 = vmatprep.mubr.bf16.mxu1 %v2296_v38  ;;  %2129 = vmatprep.subr.bf16.mxu0 %v2300_v39 }
  0x67   :  { %2160 = vmatprep.subr.bf16.mxu1 %v2300_v39 }
  0x68   :  { %2130 = vmatpush3.bf16.msra.mxu0 %v2300_v39 }
  0x69   :  { %2168 = vmatpush3.bf16.msra.mxu1 %v2300_v39  ;;  %2131 = vmatprep.subr.bf16.mxu0 %v2307_v40 }
  0x6a   :  { %2161 = vmatprep.subr.bf16.mxu1 %v2307_v40 }
  0x6b   :  { %1281 = vmatmul.mubr.bf16.gmra.mrb[36].mxu0 %v2298_v41 }
  0x6c   :  { %1378 = vmatmul.mubr.bf16.gmra.mrb[36].mxu1 %v2299_v42  ;;  %1288 = vmatprep.mubr.bf16.mxu0 %v2301_v43 }
  0x6d   :  { %1385 = vmatprep.mubr.bf16.mxu1 %v2303_v44  ;;  %2132 = vmatpush3.bf16.msra.mxu0 %v2307_v40 }
  0x6e   :  { %2169 = vmatpush3.bf16.msra.mxu1 %v2307_v40  ;;  %2133 = vmatprep.subr.bf16.mxu0 %v2314_v45 }
  0x6f   :  { %2162 = vmatprep.subr.bf16.mxu1 %v2314_v45 }
  0x71   :  { %2134 = vmatpush3.bf16.msra.mxu0 %v2314_v45 }
  0x72   :  { %2170 = vmatpush3.bf16.msra.mxu1 %v2314_v45  ;;  %2135 = vmatprep.subr.bf16.mxu0 %v2321_v46 }
  0x73   :  { %1289 = vmatmul.mubr.bf16.gmra.mrb[40].mxu0 %v2305_v47  ;;  %2163 = vmatprep.subr.bf16.mxu1 %v2321_v46 }
  0x74   :  { %1386 = vmatmul.mubr.bf16.gmra.mrb[40].mxu1 %v2306_v48  ;;  %1296 = vmatprep.mubr.bf16.mxu0 %v2308_v49 }
  0x75   :  { %1393 = vmatprep.mubr.bf16.mxu1 %v2310_v50  ;;  %2136 = vmatpush3.bf16.msra.mxu0 %v2321_v46 }
  0x76   :  { %2171 = vmatpush3.bf16.msra.mxu1 %v2321_v46  ;;  %2137 = vmatprep.subr.bf16.mxu0 %v2328_v51 }
  0x77   :  { %2164 = vmatprep.subr.bf16.mxu1 %v2328_v51 }
  0x79   :  { %2138 = vmatpush3.bf16.msra.mxu0 %v2328_v51 }
  0x7a   :  { %2172 = vmatpush3.bf16.msra.mxu1 %v2328_v51  ;;  %2139 = vmatprep.subr.bf16.mxu0 %v2335_v53 }
  0x7b   :  { %1297 = vmatmul.mubr.bf16.gmra.mrb[44].mxu0 %v2312_v52  ;;  %2165 = vmatprep.subr.bf16.mxu1 %v2335_v53 }
  0x7c   :  { %1394 = vmatmul.mubr.bf16.gmra.mrb[44].mxu1 %v2313_v54  ;;  %1304 = vmatprep.mubr.bf16.mxu0 %v2315_v55 }
  0x7d   :  { %1401 = vmatprep.mubr.bf16.mxu1 %v2317_v56  ;;  %2140 = vmatpush3.bf16.msra.mxu0 %v2335_v53 }
  0x7e   :  { %2173 = vmatpush3.bf16.msra.mxu1 %v2335_v53  ;;  %2141 = vmatprep.subr.bf16.mxu0 %v2342_v57 }
  0x7f   :  { %2166 = vmatprep.subr.bf16.mxu1 %v2342_v57 }
  0x81   :  { %2142 = vmatpush3.bf16.msra.mxu0 %v2342_v57 }
  0x82   :  { %2174 = vmatpush3.bf16.msra.mxu1 %v2342_v57 }
  0x83   :  { %1305 = vmatmul.mubr.bf16.gmra.mrb[48].mxu0 %v2319_v58 }
  0x84   :  { %1402 = vmatmul.mubr.bf16.gmra.mrb[48].mxu1 %v2320_v59  ;;  %1312 = vmatprep.mubr.bf16.mxu0 %v2322_v60 }
  0x85   :  { %1409 = vmatprep.mubr.bf16.mxu1 %v2324_v61 }
  0x8b   :  { %1313 = vmatmul.mubr.bf16.gmra.mrb[52].mxu0 %v2326_v62 }
  0x8c   :  { %1410 = vmatmul.mubr.bf16.gmra.mrb[52].mxu1 %v2327_v63  ;;  %1320 = vmatprep.mubr.bf16.mxu0 %v2329_v0 }
  0x8d   :  { %1417 = vmatprep.mubr.bf16.mxu1 %v2331_v1 }
  0x93   :  { %1321 = vmatmul.mubr.bf16.gmra.mrb[56].mxu0 %v2333_v2 }
  0x94   :  { %1418 = vmatmul.mubr.bf16.gmra.mrb[56].mxu1 %v2334_v3  ;;  %1328 = vmatprep.mubr.bf16.mxu0 %v2336_v4 }
  0x95   :  { %1425 = vmatprep.mubr.bf16.mxu1 %v2338_v5 }
  0x9b   :  { %1329 = vmatmul.mubr.bf16.gmra.mrb[60].mxu0 %v2340_v6 }
  0x9c   :  { %1426 = vmatmul.mubr.bf16.gmra.mrb[60].mxu1 %v2341_v7  ;;  %2143 = vmatprep.mubr.bf16.mxu0 %v2343_v8 }
  0x9d   :  { %2151 = vmatprep.mubr.bf16.mxu1 %v2344_v9 }
  0xa3   :  { %2144 = vmatmul.mubr.bf16.vlgmr.msra.gmra.mrb[64].mxu0 %v2345_v10 }
  0xa4   :  { %2152 = vmatmul.mubr.bf16.vlgmr.msra.gmra.mrb[64].mxu1 %v2346_v11  ;;  %2147 = vmatprep.mubr.bf16.mxu0 %v2347_v12 }
  0xa5   :  { %2155 = vmatprep.mubr.bf16.mxu1 %v2348_v13 }
  0xab   :  { %2148 = vmatmul.mubr.bf16.gmra.mrb[68].mxu0 %v2349_v14 }
  0xac   :  { %2156 = vmatmul.mubr.bf16.gmra.mrb[68].mxu1 %v2350_v15 }
  0xf6   :  { %v1871_v16 = vpop.f32.mrb[0].mxu0 }
  0xf7   :  { %v1935_v17 = vpop.f32.mrb[0].mxu1  ;;  %v1872_v19 = vpop.f32.mrb[1].mxu0 }
  0xf8   :  { %v1873_v20 = vadd.f32 %v1872_v19, %v1871_v16  ;;  %v1936_v21 = vpop.f32.mrb[1].mxu1  ;;  %v1874_v22 = vpop.f32.mrb[2].mxu0 }
  0xf9   :  { %v1937_v23 = vadd.f32 %v1936_v21, %v1935_v17  ;;  %v1938_v24 = vpop.f32.mrb[2].mxu1  ;;  %v1875_v25 = vpop.f32.mrb[3].mxu0 }
  0xfa   :  { %v1081_v26 = vadd.f32 %v1873_v20, %v2806_v18  ;;  %v1876_v27 = vadd.f32 %v1875_v25, %v1874_v22  ;;  %v1939_v28 = vpop.f32.mrb[3].mxu1 }
  0xfb   :  { %v1940_v29 = vadd.f32 %v1939_v28, %v1938_v24 }
  0xfc   :  { %v2809_v30 = vadd.f32 %v1937_v23, %v1081_v26  ;;  %v1084_v31 = vadd.f32 %v1876_v27, %v2806_v18 }
  0xfe   :  { %v2812_v32 = vadd.f32 %v1940_v29, %v1084_v31  ;;  %v1877_v33 = vpop.f32.mrb[4].mxu0 }
  0xff   :  { %v1941_v34 = vpop.f32.mrb[4].mxu1  ;;  %v1878_v35 = vpop.f32.mrb[5].mxu0 }
 0x100   :  { %v1879_v36 = vadd.f32 %v1878_v35, %v1877_v33  ;;  %v1942_v37 = vpop.f32.mrb[5].mxu1  ;;  %v1880_v38 = vpop.f32.mrb[6].mxu0 }
 0x101   :  { %v1943_v39 = vadd.f32 %v1942_v37, %v1941_v34  ;;  %v1944_v40 = vpop.f32.mrb[6].mxu1  ;;  %v1881_v41 = vpop.f32.mrb[7].mxu0 }
 0x102   :  { %v1089_v42 = vadd.f32 %v1879_v36, %v2806_v18  ;;  %v1882_v43 = vadd.f32 %v1881_v41, %v1880_v38  ;;  %v1945_v44 = vpop.f32.mrb[7].mxu1 }
 0x103   :  { %v1946_v45 = vadd.f32 %v1945_v44, %v1944_v40 }
 0x104   :  { %v2815_v46 = vadd.f32 %v1943_v39, %v1089_v42  ;;  %v1092_v47 = vadd.f32 %v1882_v43, %v2806_v18 }
 0x106   :  { %v2818_v48 = vadd.f32 %v1946_v45, %v1092_v47  ;;  %v1883_v49 = vpop.f32.mrb[8].mxu0 }
 0x107   :  { %v1947_v50 = vpop.f32.mrb[8].mxu1  ;;  %v1884_v51 = vpop.f32.mrb[9].mxu0 }
 0x108   :  { %v1885_v52 = vadd.f32 %v1884_v51, %v1883_v49  ;;  %v1948_v53 = vpop.f32.mrb[9].mxu1  ;;  %v1886_v54 = vpop.f32.mrb[10].mxu0 }
 0x109   :  { %v1949_v55 = vadd.f32 %v1948_v53, %v1947_v50  ;;  %v1950_v56 = vpop.f32.mrb[10].mxu1  ;;  %v1887_v57 = vpop.f32.mrb[11].mxu0 }
 0x10a   :  { %v1097_v58 = vadd.f32 %v1885_v52, %v2806_v18  ;;  %v1888_v59 = vadd.f32 %v1887_v57, %v1886_v54  ;;  %v1951_v60 = vpop.f32.mrb[11].mxu1 }
 0x10b   :  { %v1952_v61 = vadd.f32 %v1951_v60, %v1950_v56 }
 0x10c   :  { %v2821_v62 = vadd.f32 %v1949_v55, %v1097_v58  ;;  %v1100_v63 = vadd.f32 %v1888_v59, %v2806_v18 }
 0x10e   :  { %v2824_v0 = vadd.f32 %v1952_v61, %v1100_v63  ;;  %v1889_v1 = vpop.f32.mrb[12].mxu0 }
 0x10f   :  { %v1953_v2 = vpop.f32.mrb[12].mxu1  ;;  %v1890_v3 = vpop.f32.mrb[13].mxu0 }
 0x110   :  { %v1891_v4 = vadd.f32 %v1890_v3, %v1889_v1  ;;  %v1954_v5 = vpop.f32.mrb[13].mxu1  ;;  %v1892_v6 = vpop.f32.mrb[14].mxu0 }
 0x111   :  { %v1955_v7 = vadd.f32 %v1954_v5, %v1953_v2  ;;  %v1956_v8 = vpop.f32.mrb[14].mxu1  ;;  %v1893_v9 = vpop.f32.mrb[15].mxu0 }
 0x112   :  { %v1105_v10 = vadd.f32 %v1891_v4, %v2806_v18  ;;  %v1894_v11 = vadd.f32 %v1893_v9, %v1892_v6  ;;  %v1957_v12 = vpop.f32.mrb[15].mxu1 }
 0x113   :  { %v1958_v13 = vadd.f32 %v1957_v12, %v1956_v8 }
 0x114   :  { %v2827_v14 = vadd.f32 %v1955_v7, %v1105_v10  ;;  %v1108_v15 = vadd.f32 %v1894_v11, %v2806_v18 }
 0x116   :  { %v2830_v16 = vadd.f32 %v1958_v13, %v1108_v15  ;;  %v1895_v17 = vpop.f32.mrb[16].mxu0 }
 0x117   :  { %v1959_v19 = vpop.f32.mrb[16].mxu1  ;;  %v1896_v20 = vpop.f32.mrb[17].mxu0 }
 0x118   :  { %v1897_v21 = vadd.f32 %v1896_v20, %v1895_v17  ;;  %v1960_v22 = vpop.f32.mrb[17].mxu1  ;;  %v1898_v23 = vpop.f32.mrb[18].mxu0 }
 0x119   :  { %v1961_v24 = vadd.f32 %v1960_v22, %v1959_v19  ;;  %v1962_v25 = vpop.f32.mrb[18].mxu1  ;;  %v1899_v26 = vpop.f32.mrb[19].mxu0 }
 0x11a   :  { %v1113_v27 = vadd.f32 %v1897_v21, %v2806_v18  ;;  %v1900_v28 = vadd.f32 %v1899_v26, %v1898_v23  ;;  %v1963_v29 = vpop.f32.mrb[19].mxu1 }
 0x11b   :  { %v1964_v31 = vadd.f32 %v1963_v29, %v1962_v25 }
 0x11c   :  { %v2833_v33 = vadd.f32 %v1961_v24, %v1113_v27  ;;  %v1116_v34 = vadd.f32 %v1900_v28, %v2806_v18 }
 0x11e   :  { %v2836_v35 = vadd.f32 %v1964_v31, %v1116_v34  ;;  %v1901_v36 = vpop.f32.mrb[20].mxu0 }
 0x11f   :  { %v1965_v37 = vpop.f32.mrb[20].mxu1  ;;  %v1902_v38 = vpop.f32.mrb[21].mxu0 }
 0x120   :  { %v1903_v39 = vadd.f32 %v1902_v38, %v1901_v36  ;;  %v1966_v40 = vpop.f32.mrb[21].mxu1  ;;  %v1904_v41 = vpop.f32.mrb[22].mxu0 }
 0x121   :  { %v1967_v42 = vadd.f32 %v1966_v40, %v1965_v37  ;;  %v1968_v43 = vpop.f32.mrb[22].mxu1  ;;  %v1905_v44 = vpop.f32.mrb[23].mxu0 }
 0x122   :  { %v1121_v45 = vadd.f32 %v1903_v39, %v2806_v18  ;;  %v1906_v47 = vadd.f32 %v1905_v44, %v1904_v41  ;;  %v1969_v49 = vpop.f32.mrb[23].mxu1 }
 0x123   :  { %v1970_v50 = vadd.f32 %v1969_v49, %v1968_v43 }
 0x124   :  { %v2839_v51 = vadd.f32 %v1967_v42, %v1121_v45  ;;  %v1124_v52 = vadd.f32 %v1906_v47, %v2806_v18 }
 0x126   :  { %v2842_v53 = vadd.f32 %v1970_v50, %v1124_v52  ;;  %v1907_v54 = vpop.f32.mrb[24].mxu0 }
 0x127   :  { %v1971_v55 = vpop.f32.mrb[24].mxu1  ;;  %v1908_v56 = vpop.f32.mrb[25].mxu0 }
 0x128   :  { %v1909_v57 = vadd.f32 %v1908_v56, %v1907_v54  ;;  %v1972_v58 = vpop.f32.mrb[25].mxu1  ;;  %v1910_v59 = vpop.f32.mrb[26].mxu0 }
 0x129   :  { %v1973_v60 = vadd.f32 %v1972_v58, %v1971_v55  ;;  %v1974_v61 = vpop.f32.mrb[26].mxu1  ;;  %v1911_v63 = vpop.f32.mrb[27].mxu0 }
 0x12a   :  { %v1129_v1 = vadd.f32 %v1909_v57, %v2806_v18  ;;  %v1912_v2 = vadd.f32 %v1911_v63, %v1910_v59  ;;  %v1975_v3 = vpop.f32.mrb[27].mxu1 }
 0x12b   :  { %v1976_v4 = vadd.f32 %v1975_v3, %v1974_v61 }
 0x12c   :  { %v2845_v5 = vadd.f32 %v1973_v60, %v1129_v1  ;;  %v1132_v6 = vadd.f32 %v1912_v2, %v2806_v18 }
 0x12e   :  { %v2848_v7 = vadd.f32 %v1976_v4, %v1132_v6  ;;  %v1913_v8 = vpop.f32.mrb[28].mxu0 }
 0x12f   :  { %v1977_v9 = vpop.f32.mrb[28].mxu1  ;;  %v1914_v10 = vpop.f32.mrb[29].mxu0 }
 0x130   :  { %v1915_v11 = vadd.f32 %v1914_v10, %v1913_v8  ;;  %v1978_v12 = vpop.f32.mrb[29].mxu1  ;;  %v1916_v13 = vpop.f32.mrb[30].mxu0 }
 0x131   :  { %v1979_v15 = vadd.f32 %v1978_v12, %v1977_v9  ;;  %v1980_v17 = vpop.f32.mrb[30].mxu1  ;;  %v1917_v19 = vpop.f32.mrb[31].mxu0 }
 0x132   :  { %v1137_v20 = vadd.f32 %v1915_v11, %v2806_v18  ;;  %v1918_v21 = vadd.f32 %v1917_v19, %v1916_v13  ;;  %v1981_v22 = vpop.f32.mrb[31].mxu1 }
 0x133   :  { %v1982_v23 = vadd.f32 %v1981_v22, %v1980_v17 }
 0x134   :  { %v2851_v24 = vadd.f32 %v1979_v15, %v1137_v20  ;;  %v1140_v25 = vadd.f32 %v1918_v21, %v2806_v18 }
 0x136   :  { %v2854_v26 = vadd.f32 %v1982_v23, %v1140_v25  ;;  %v1999_v27 = vpop.f32.mrb[32].mxu0 }
 0x137   :  { %v2063_v28 = vpop.f32.mrb[32].mxu1  ;;  %v2000_v29 = vpop.f32.mrb[33].mxu0 }
 0x138   :  { %v2001_v31 = vadd.f32 %v2000_v29, %v1999_v27  ;;  %v2064_v34 = vpop.f32.mrb[33].mxu1  ;;  %v2002_v36 = vpop.f32.mrb[34].mxu0 }
 0x139   :  { %v2065_v37 = vadd.f32 %v2064_v34, %v2063_v28  ;;  %v2066_v38 = vpop.f32.mrb[34].mxu1  ;;  %v2003_v39 = vpop.f32.mrb[35].mxu0 }
 0x13a   :  { %v1275_v40 = vadd.f32 %v2001_v31, %v2809_v30  ;;  %v2004_v41 = vadd.f32 %v2003_v39, %v2002_v36  ;;  %v2067_v42 = vpop.f32.mrb[35].mxu1 }
 0x13b   :  { %v2068_v43 = vadd.f32 %v2067_v42, %v2066_v38 }
 0x13c   :  { %v1278_v44 = vadd.f32 %v2004_v41, %v2812_v32  ;;  %v2858_v45 = vadd.f32 %v2065_v37, %v1275_v40 }
 0x13e   :  { %v2005_v18 = vpop.f32.mrb[36].mxu0  ;;  %v2860_v47 = vadd.f32 %v2068_v43, %v1278_v44 }
 0x13f   :  { %v2069_v49 = vpop.f32.mrb[36].mxu1  ;;  %v2006_v50 = vpop.f32.mrb[37].mxu0 }
 0x140   :  { %v2007_v52 = vadd.f32 %v2006_v50, %v2005_v18  ;;  %v2070_v54 = vpop.f32.mrb[37].mxu1  ;;  %v2008_v55 = vpop.f32.mrb[38].mxu0 }
 0x141   :  { %v2071_v56 = vadd.f32 %v2070_v54, %v2069_v49  ;;  %v2072_v57 = vpop.f32.mrb[38].mxu1  ;;  %v2009_v58 = vpop.f32.mrb[39].mxu0 }
 0x142   :  { %v1283_v30 = vadd.f32 %v2007_v52, %v2815_v46  ;;  %v2010_v59 = vadd.f32 %v2009_v58, %v2008_v55  ;;  %v2073_v60 = vpop.f32.mrb[39].mxu1 }
 0x143   :  { %v2074_v61 = vadd.f32 %v2073_v60, %v2072_v57 }
 0x144   :  { %v1286_v32 = vadd.f32 %v2010_v59, %v2818_v48  ;;  %v2864_v63 = vadd.f32 %v2071_v56, %v1283_v30 }
 0x146   :  { %v2011_v1 = vpop.f32.mrb[40].mxu0  ;;  %v2866_v2 = vadd.f32 %v2074_v61, %v1286_v32 }
 0x147   :  { %v2075_v3 = vpop.f32.mrb[40].mxu1  ;;  %v2012_v4 = vpop.f32.mrb[41].mxu0 }
 0x148   :  { %v2013_v6 = vadd.f32 %v2012_v4, %v2011_v1  ;;  %v2076_v8 = vpop.f32.mrb[41].mxu1  ;;  %v2014_v9 = vpop.f32.mrb[42].mxu0 }
 0x149   :  { %v2077_v10 = vadd.f32 %v2076_v8, %v2075_v3  ;;  %v2078_v11 = vpop.f32.mrb[42].mxu1  ;;  %v2015_v12 = vpop.f32.mrb[43].mxu0 }
 0x14a   :  { %v1291_v46 = vadd.f32 %v2013_v6, %v2821_v62  ;;  %v2016_v13 = vadd.f32 %v2015_v12, %v2014_v9  ;;  %v2079_v15 = vpop.f32.mrb[43].mxu1 }
 0x14b   :  { %v2080_v17 = vadd.f32 %v2079_v15, %v2078_v11 }
 0x14c   :  { %v1294_v48 = vadd.f32 %v2016_v13, %v2824_v0  ;;  %v2870_v19 = vadd.f32 %v2077_v10, %v1291_v46 }
 0x14e   :  { %v2017_v20 = vpop.f32.mrb[44].mxu0  ;;  %v2872_v21 = vadd.f32 %v2080_v17, %v1294_v48 }
 0x14f   :  { %v2081_v22 = vpop.f32.mrb[44].mxu1  ;;  %v2018_v23 = vpop.f32.mrb[45].mxu0 }
 0x150   :  { %v2019_v25 = vadd.f32 %v2018_v23, %v2017_v20  ;;  %v2082_v27 = vpop.f32.mrb[45].mxu1  ;;  %v2020_v28 = vpop.f32.mrb[46].mxu0 }
 0x151   :  { %v2083_v29 = vadd.f32 %v2082_v27, %v2081_v22  ;;  %v2084_v31 = vpop.f32.mrb[46].mxu1  ;;  %v2021_v34 = vpop.f32.mrb[47].mxu0 }
 0x152   :  { %v1299_v62 = vadd.f32 %v2019_v25, %v2827_v14  ;;  %v2022_v36 = vadd.f32 %v2021_v34, %v2020_v28  ;;  %v2085_v37 = vpop.f32.mrb[47].mxu1 }
 0x153   :  { %v2086_v38 = vadd.f32 %v2085_v37, %v2084_v31 }
 0x154   :  { %v1302_v0 = vadd.f32 %v2022_v36, %v2830_v16  ;;  %v2876_v39 = vadd.f32 %v2083_v29, %v1299_v62 }
 0x156   :  { %v2023_v40 = vpop.f32.mrb[48].mxu0  ;;  %v2878_v41 = vadd.f32 %v2086_v38, %v1302_v0 }
 0x157   :  { %v2087_v42 = vpop.f32.mrb[48].mxu1  ;;  %v2024_v43 = vpop.f32.mrb[49].mxu0 }
 0x158   :  { %v2025_v44 = vadd.f32 %v2024_v43, %v2023_v40  ;;  %v2088_v18 = vpop.f32.mrb[49].mxu1  ;;  %v2026_v49 = vpop.f32.mrb[50].mxu0 }
 0x159   :  { %v2089_v50 = vadd.f32 %v2088_v18, %v2087_v42  ;;  %v2090_v52 = vpop.f32.mrb[50].mxu1  ;;  %v2027_v54 = vpop.f32.mrb[51].mxu0 }
 0x15a   :  { %v1307_v14 = vadd.f32 %v2025_v44, %v2833_v33  ;;  %v2028_v55 = vadd.f32 %v2027_v54, %v2026_v49  ;;  %v2091_v56 = vpop.f32.mrb[51].mxu1 }
 0x15b   :  { %v2092_v57 = vadd.f32 %v2091_v56, %v2090_v52 }
 0x15c   :  { %v1310_v16 = vadd.f32 %v2028_v55, %v2836_v35  ;;  %v1404_v58 = vadd.f32 %v2089_v50, %v1307_v14 }
 0x15e   :  { %v2029_v30 = vpop.f32.mrb[52].mxu0  ;;  %v2882_v59 = vadd.f32 %v2092_v57, %v1310_v16 }
 0x15f   :  { %v2093_v60 = vpop.f32.mrb[52].mxu1  ;;  %v2030_v61 = vpop.f32.mrb[53].mxu0 }
 0x160   :  { %v2031_v32 = vadd.f32 %v2030_v61, %v2029_v30  ;;  %v2094_v1 = vpop.f32.mrb[53].mxu1  ;;  %v2032_v3 = vpop.f32.mrb[54].mxu0 }
 0x161   :  { %v2095_v4 = vadd.f32 %v2094_v1, %v2093_v60  ;;  %v2096_v6 = vpop.f32.mrb[54].mxu1  ;;  %v2033_v8 = vpop.f32.mrb[55].mxu0 }
 0x162   :  { %v1315_v9 = vadd.f32 %v2031_v32, %v2839_v51  ;;  %v2034_v33 = vadd.f32 %v2033_v8, %v2032_v3  ;;  %v2097_v10 = vpop.f32.mrb[55].mxu1 }
 0x163   :  { %v2098_v11 = vadd.f32 %v2097_v10, %v2096_v6 }
 0x164   :  { %v1318_v12 = vadd.f32 %v2034_v33, %v2842_v53  ;;  %v1412_v35 = vadd.f32 %v2095_v4, %v1315_v9 }
 0x166   :  { %v2035_v46 = vpop.f32.mrb[56].mxu0  ;;  %v1415_v13 = vadd.f32 %v2098_v11, %v1318_v12 }
 0x167   :  { %v2099_v15 = vpop.f32.mrb[56].mxu1  ;;  %v2036_v17 = vpop.f32.mrb[57].mxu0 }
 0x168   :  { %v2037_v48 = vadd.f32 %v2036_v17, %v2035_v46  ;;  %v2100_v20 = vpop.f32.mrb[57].mxu1  ;;  %v2038_v22 = vpop.f32.mrb[58].mxu0 }
 0x169   :  { %v2101_v23 = vadd.f32 %v2100_v20, %v2099_v15  ;;  %v2102_v25 = vpop.f32.mrb[58].mxu1  ;;  %v2039_v27 = vpop.f32.mrb[59].mxu0 }
 0x16a   :  { %v1323_v28 = vadd.f32 %v2037_v48, %v2845_v5  ;;  %v2040_v29 = vadd.f32 %v2039_v27, %v2038_v22  ;;  %v2103_v51 = vpop.f32.mrb[59].mxu1 }
 0x16b   :  { %v2104_v31 = vadd.f32 %v2103_v51, %v2102_v25 }
 0x16c   :  { %v1326_v34 = vadd.f32 %v2040_v29, %v2848_v7  ;;  %v1420_v62 = vadd.f32 %v2101_v23, %v1323_v28 }
 0x16e   :  { %v2041_v53 = vpop.f32.mrb[60].mxu0  ;;  %v2888_v36 = vadd.f32 %v2104_v31, %v1326_v34 }
 0x16f   :  { %v2105_v37 = vpop.f32.mrb[60].mxu1  ;;  %v2042_v38 = vpop.f32.mrb[61].mxu0 }
 0x170   :  { %v2043_v0 = vadd.f32 %v2042_v38, %v2041_v53  ;;  %v2106_v40 = vpop.f32.mrb[61].mxu1  ;;  %v2044_v42 = vpop.f32.mrb[62].mxu0 }
 0x171   :  { %v2107_v43 = vadd.f32 %v2106_v40, %v2105_v37  ;;  %v2108_v44 = vpop.f32.mrb[62].mxu1  ;;  %v2045_v18 = vpop.f32.mrb[63].mxu0 }
 0x172   :  { %v1331_v49 = vadd.f32 %v2043_v0, %v2851_v24  ;;  %v2046_v5 = vadd.f32 %v2045_v18, %v2044_v42  ;;  %v2109_v50 = vpop.f32.mrb[63].mxu1 }
 0x173   :  { %v2110_v52 = vadd.f32 %v2109_v50, %v2108_v44 }
 0x174   :  { %v1334_v54 = vadd.f32 %v2046_v5, %v2854_v26  ;;  %v1428_v7 = vadd.f32 %v2107_v43, %v1331_v49 }
 0x176   :  { %v2145_v14 = vpop.f32.mrb[64].mxu0  ;;  %v1431_v55 = vadd.f32 %v2110_v52, %v1334_v54 }
 0x177   :  { %v1477_v56 = vadd.f32 %v2145_v14, %v2864_v63  ;;  %v2153_v57 = vpop.f32.mrb[64].mxu1  ;;  %v1468_v16 = vpop.f32.mrb[65].mxu0 }
 0x178   :  { %v1509_v30 = vadd.f32 %v2153_v57, %v1412_v35  ;;  %v1469_v60 = vadd.f32 %v1468_v16, %v2858_v45  ;;  %v1500_v61 = vpop.f32.mrb[65].mxu1  ;;  %v2146_v32 = vpop.f32.mrb[66].mxu0 }
 0x179   :  { %v1501_v1 = vadd.f32 %v1500_v61, %v1404_v58  ;;  %v1480_v24 = vadd.f32 %v2146_v32, %v2866_v2  ;;  %v2154_v3 = vpop.f32.mrb[66].mxu1  ;;  %v1471_v4 = vpop.f32.mrb[67].mxu0  ;;  %v1533_v9 = vmax.f32 %v1477_v56, 0.0 }
 0x17a   :  { %v1512_v6 = vadd.f32 %v2154_v3, %v1415_v13  ;;  %v1472_v26 = vadd.f32 %v1471_v4, %v2860_v47  ;;  %v1503_v8 = vpop.f32.mrb[67].mxu1  ;;  %v1541_v10 = vmax.f32 %v1509_v30, 0.0  ;;  %v1531_v11 = vmax.f32 %v1469_v60, 0.0 }
 0x17b   :  { %v1534_v33 = vmax.f32 %v1480_v24, 0.0  ;;  %v1504_v63 = vadd.f32 %v1503_v8, %v2882_v59  ;;  %v1539_v45 = vmax.f32 %v1501_v1, 0.0 }
 0x17c   :  { %v1542_v12 = vmax.f32 %v1512_v6, 0.0  ;;  %v1532_v35 = vmax.f32 %v1472_v26, 0.0 }
 0x17d   :  { %v1816_v46 = vpack.c.bf16 %v1534_v33, %v1533_v9  ;;  %v1540_v15 = vmax.f32 %v1504_v63, 0.0 }
 0x17e   :  { %v1836_v58 = vpack.c.bf16 %v1542_v12, %v1541_v10  ;;  %v1811_v17 = vpack.c.bf16 %v1532_v35, %v1531_v11  ;;  %v2149_v2 = vpop.f32.mrb[68].mxu0 }
 0x17f   :  { %1848 = vst [vmem:[%s2929_s3 + $0x8] sm:$0xff] %v1816_v46   ;;  %v1831_v47 = vpack.c.bf16 %v1540_v15, %v1539_v45  ;;  %v1493_v13 = vadd.f32 %v2149_v2, %v2876_v39  ;;  %v2157_v48 = vpop.f32.mrb[68].mxu1  ;;  %v1484_v20 = vpop.f32.mrb[69].mxu0 }
 0x180   :  { %1852 = vst [vmem:[%s2929_s3 + $0x28] sm:$0xff] %v1836_v58   ;;  %1812 = vst [vmem:[%s2929_s3] sm:$0xff] %v1811_v17   ;;  %v1525_v59 = vadd.f32 %v2157_v48, %v1428_v7  ;;  %v1485_v22 = vadd.f32 %v1484_v20, %v2870_v19  ;;  %v1516_v23 = vpop.f32.mrb[69].mxu1  ;;  %v2150_v25 = vpop.f32.mrb[70].mxu0 }
 0x181   :  { %1851 = vst [vmem:[%s2929_s3 + $0x20] sm:$0xff] %v1831_v47   ;;  %v1517_v39 = vadd.f32 %v1516_v23, %v1420_v62  ;;  %v1496_v27 = vadd.f32 %v2150_v25, %v2878_v41  ;;  %v2158_v28 = vpop.f32.mrb[70].mxu1  ;;  %v1487_v29 = vpop.f32.mrb[71].mxu0  ;;  %v1537_v53 = vmax.f32 %v1493_v13, 0.0 }
 0x182   :  { %v1528_v51 = vadd.f32 %v2158_v28, %v1431_v55  ;;  %v1488_v31 = vadd.f32 %v1487_v29, %v2872_v21  ;;  %v1519_v34 = vpop.f32.mrb[71].mxu1  ;;  %v1545_v19 = vmax.f32 %v1525_v59, 0.0  ;;  %v1535_v0 = vmax.f32 %v1485_v22, 0.0 }
 0x183   :  { %v1538_v37 = vmax.f32 %v1496_v27, 0.0  ;;  %v1520_v38 = vadd.f32 %v1519_v34, %v2888_v36  ;;  %v1543_v43 = vmax.f32 %v1517_v39, 0.0 }
 0x184   :  { %v1546_v40 = vmax.f32 %v1528_v51, 0.0  ;;  %v1536_v42 = vmax.f32 %v1488_v31, 0.0 }
 0x185   :  { %v1826_v44 = vpack.c.bf16 %v1538_v37, %v1537_v53  ;;  %v1544_v18 = vmax.f32 %v1520_v38, 0.0 }
 0x186   :  { %v1846_v62 = vpack.c.bf16 %v1546_v40, %v1545_v19  ;;  %v1821_v49 = vpack.c.bf16 %v1536_v42, %v1535_v0 }
 0x187   :  { %1850 = vst [vmem:[%s2929_s3 + $0x18] sm:$0xff] %v1826_v44   ;;  %v1841_v41 = vpack.c.bf16 %v1544_v18, %v1543_v43 }
 0x188   :  { %1854 = vst [vmem:[%s2929_s3 + $0x38] sm:$0xff] %v1846_v62   ;;  %1849 = vst [vmem:[%s2929_s3 + $0x10] sm:$0xff] %v1821_v49  }
 0x189   :  { %1853 = vst [vmem:[%s2929_s3 + $0x30] sm:$0xff] %v1841_v41  }

// kernel: network_forward.21
= control target key start
LH: loop header
LB: loop body
LE: loop exit
PB: predicated region body
PF: predicated region fallthrough
CT: control target
= control target key end

     0   :  { %s672_s21 = smov 0   ;;  %s803_s0 = inlined_call_operand.vmem [shape: bf16[2,5,5,128], index: 0, kind: input, shape index: {}]   ;;  %s804_s1 = inlined_call_operand.vmem [shape: bf16[2,5,5,128], index: 1, kind: input, shape index: {}]   ;;  %s805_s2 = inlined_call_operand.vmem [shape: bf16[2,5,5,128], index: 2, kind: input, shape index: {}]   ;;  %s806_s3 = inlined_call_operand.vmem [shape: bf16[2,5,5,128], index: 3, kind: input, shape index: {}]   ;;  %s807_s4 = inlined_call_operand.vmem [shape: f32[3,3,128], index: 4, kind: input, shape index: {}]   ;;  %s808_s5 = inlined_call_operand.vmem [shape: f32[1,128], index: 5, kind: input, shape index: {}]   ;;  %s809_s6 = inlined_call_operand.vmem [shape: bf16[2,4,4,128], index: 6, kind: output, shape index: {}]  }
   0x1 LB: > { %s605_s22 = sadd.s32 4294967295, %s635_s21   ;;  %p609_p0 = scmp.ge.s32.totalorder %s635_s21, 1  ;;  %s635_s21 = sphi %s672_s21, %s16_s21  }
   0x2   : > { %p242_p1 = scmp.lt.s32.totalorder %s635_s21, 3 }
   0x4   : > { %p243_p2 = pnand %p609_p0, %p242_p1 }
   0x5   : > { %p287_p3 = scmp.lt.s32.totalorder (!%p243_p2), %s605_s22, 1  ;;  %v351_v0 = vlaneseq (!%p243_p2)  ;;  %v312_v2 = vld [vmem:[%s807_s4] sm:$0x7] (!%p243_p2)  ;;  %v313_v6 = vld [vmem:[%s807_s4 + $0x4] sm:$0x7] (!%p243_p2) }
   0x6   : > { %246 = sbr.rel (%p243_p2) target bundleno = 57 (0x39), region = 44  ;;  %v314_v24 = vld [vmem:[%s807_s4 + $0x8] sm:$0x7] (!%p243_p2) }
   0x7   : > { %v352_v1 = vshrl.u32 (!%p243_p2), %v351_v0, 7 }
   0x9   : > { %v353_v3 = vsub.s32 (!%p243_p2), 0, %v352_v1  ;;  %v365_v4 = vsub.s32 (!%p243_p2), 1, %v352_v1  ;;  %v377_v5 = vsub.s32 (!%p243_p2), 2, %v352_v1 }
   0xb   : > { %v699_v7 = vrot.slane (!%p243_p2), %v312_v2, %v353_v3  ;;  %v701_v8 = vrot.slane (!%p243_p2), %v312_v2, %v365_v4  ;;  %v703_v9 = vrot.slane (!%p243_p2), %v312_v2, %v377_v5  ;;  %v718_v13 = vrot.slane (!%p243_p2), %v313_v6, %v377_v5 }
   0xc   : > { %v723_v20 = vrot.slane (!%p243_p2), %v313_v6, %v353_v3  ;;  %v725_v23 = vrot.slane (!%p243_p2), %v313_v6, %v365_v4  ;;  %v740_v38 = vrot.slane (!%p243_p2), %v314_v24, %v377_v5  ;;  %v743_v40 = vrot.slane (!%p243_p2), %v314_v24, %v353_v3 }
   0xd   : > { %s811_s22 = smov (!%p287_p3, %s605_s22), 1  ;;  %v745_v41 = vrot.slane %v314_v24, %v365_v4 }
   0xe   : > { %s620_s25 = smul.u32 20, %s811_s22  ;;  %s619_s20 = sshll.u32 %s811_s22, 3 }
   0xf   : > { %s786_s22 = scalar_lea.vmem %s809_s6, %s619_s20 }
  0x10   : > { %s692_s30 = scalar_lea.vmem %s803_s0, %s620_s25  ;;  %s697_s9 = scalar_lea.vmem %s804_s1, %s620_s25 }
  0x11   : > { %s708_s12 = scalar_lea.vmem %s805_s2, %s620_s25  ;;  %s713_s15 = scalar_lea.vmem %s806_s3, %s620_s25  ;;  %v315_v10 = vld [vmem:[%s692_s30] sm:$0x7]  ;;  %v316_v11 = vld [vmem:[%s692_s30 + $0x4] sm:$0x7]  ;;  %v317_v29 = vld [vmem:[%s692_s30 + $0x8] sm:$0x7] }
  0x12   : > { %v325_v12 = vld [vmem:[%s697_s9] sm:$0x7]  ;;  %v320_v14 = vunpack.c.l.bf16 %v315_v10  ;;  %v321_v15 = vunpack.c.l.bf16 %v316_v11  ;;  %v326_v16 = vld [vmem:[%s697_s9 + $0x4] sm:$0x7]  ;;  %v327_v33 = vld [vmem:[%s697_s9 + $0x8] sm:$0x7]  ;;  %v322_v42 = vunpack.c.l.bf16 %v317_v29 }
  0x13   : > { %v330_v17 = vunpack.c.l.bf16 %v325_v12  ;;  %v335_v18 = vld [vmem:[%s708_s12] sm:$0x7]  ;;  %v331_v21 = vunpack.c.l.bf16 %v326_v16  ;;  %v336_v34 = vld [vmem:[%s708_s12 + $0x4] sm:$0x7]  ;;  %v332_v45 = vunpack.c.l.bf16 %v327_v33  ;;  %v318_v51 = vld [vmem:[%s692_s30 + $0xc] sm:$0x7] }
  0x14   : > { %v343_v19 = vld [vmem:[%s713_s15] sm:$0x7]  ;;  %v339_v22 = vunpack.c.l.bf16 %v335_v18  ;;  %v355_v26 = vmul.f32 %v699_v7, %v320_v14  ;;  %v379_v28 = vmul.f32 %v703_v9, %v320_v14  ;;  %v356_v30 = vmul.f32 %v699_v7, %v321_v15  ;;  %v344_v39 = vld [vmem:[%s713_s15 + $0x4] sm:$0x7]  ;;  %v751_v52 = vld [vmem:[%s697_s9 + $0xc] sm:$0x7] }
  0x15   : > { %v347_v25 = vunpack.c.l.bf16 %v343_v19  ;;  %v367_v27 = vmul.f32 %v701_v8, %v330_v17  ;;  %v368_v31 = vmul.f32 %v701_v8, %v331_v21  ;;  %v340_v46 = vunpack.c.l.bf16 %v336_v34  ;;  %v337_v57 = vld [vmem:[%s708_s12 + $0x8] sm:$0x7]  ;;  %v338_v24 = vld [vmem:[%s708_s12 + $0xc] sm:$0x7] }
  0x16   : > { %v427_v32 = vmul.f32 %v718_v13, %v339_v22  ;;  %v387_v36 = vrot.slane %v379_v28, 1  ;;  %v403_v37 = vmul.f32 %v723_v20, %v339_v22  ;;  %v348_v49 = vunpack.c.l.bf16 %v344_v39  ;;  %v345_v1 = vld [vmem:[%s713_s15 + $0x8] sm:$0x7]  ;;  %v346_v29 = vld [vmem:[%s713_s15 + $0xc] sm:$0x7] }
  0x17   : > { %v371_v35 = vadd.f32 %v367_v27, %v355_v26  ;;  %v415_v44 = vmul.f32 %v725_v23, %v347_v25  ;;  %v372_v47 = vadd.f32 %v368_v31, %v356_v30  ;;  %v380_v50 = vmul.f32 %v703_v9, %v321_v15 }
  0x18   : > { %v435_v48 = vrot.slane %v427_v32, 1  ;;  %v475_v54 = vmul.f32 %v740_v38, %v321_v15  ;;  %v357_v55 = vmul.f32 %v699_v7, %v322_v42  ;;  %v369_v56 = vmul.f32 %v701_v8, %v332_v45  ;;  %v616_v32 = vld [vmem:[%s808_s5] ss:$0 sm:$0xff] }
  0x19   : > { %v395_v43 = vadd.f32 %v387_v36, %v371_v35  ;;  %v388_v58 = vrot.slane %v380_v50, 1  ;;  %v404_v59 = vmul.f32 %v723_v20, %v340_v46  ;;  %v428_v60 = vmul.f32 %v718_v13, %v340_v46  ;;  %v319_v46 = vld [vmem:[%s692_s30 + $0x10] sm:$0x7] }
  0x1a   : > { %v451_v62 = vmul.f32 %v743_v40, %v321_v15  ;;  %v323_v63 = vunpack.c.l.bf16 %v318_v51  ;;  %v333_v0 = vunpack.c.l.bf16 %v751_v52  ;;  %v463_v2 = vmul.f32 %v745_v41, %v331_v21 }
  0x1b   : > { %v407_v53 = vadd.f32 %v403_v37, %v395_v43  ;;  %v396_v3 = vadd.f32 %v388_v58, %v372_v47  ;;  %v416_v4 = vmul.f32 %v725_v23, %v348_v49  ;;  %v341_v5 = vunpack.c.l.bf16 %v337_v57 }
  0x1c   : > { %v483_v10 = vrot.slane %v475_v54, 1  ;;  %v373_v11 = vadd.f32 %v369_v56, %v357_v55  ;;  %v452_v12 = vmul.f32 %v743_v40, %v322_v42  ;;  %v436_v16 = vrot.slane %v428_v60, 1  ;;  %v329_v54 = vld [vmem:[%s697_s9 + $0x10] sm:$0x7] }
  0x1d   : > { %v419_v61 = vadd.f32 %v415_v44, %v407_v53  ;;  %v408_v14 = vadd.f32 %v404_v59, %v396_v3  ;;  %v349_v15 = vunpack.c.l.bf16 %v345_v1  ;;  %v381_v17 = vmul.f32 %v703_v9, %v322_v42 }
  0x1e   : > { %v476_v19 = vmul.f32 %v740_v38, %v322_v42  ;;  %v358_v21 = vmul.f32 %v699_v7, %v323_v63  ;;  %v370_v22 = vmul.f32 %v701_v8, %v333_v0  ;;  %v405_v27 = vmul.f32 %v723_v20, %v341_v5 }
  0x1f   : > { %v443_v6 = vadd.f32 %v435_v48, %v419_v61  ;;  %v420_v25 = vadd.f32 %v416_v4, %v408_v14  ;;  %v389_v26 = vrot.slane %v381_v17, 1  ;;  %v429_v28 = vmul.f32 %v718_v13, %v341_v5 }
  0x20   : > { %v464_v31 = vmul.f32 %v745_v41, %v332_v45  ;;  %v417_v8 = vmul.f32 %v725_v23, %v349_v15  ;;  %v342_v34 = vunpack.c.l.bf16 %v338_v24  ;;  %v374_v36 = vadd.f32 %v370_v22, %v358_v21 }
  0x21   : > { %v455_v18 = vadd.f32 %v451_v62, %v443_v6  ;;  %v444_v33 = vadd.f32 %v436_v16, %v420_v25  ;;  %v397_v7 = vadd.f32 %v389_v26, %v373_v11  ;;  %v350_v37 = vunpack.c.l.bf16 %v346_v29 }
  0x22   : > { %v382_v39 = vmul.f32 %v703_v9, %v323_v63  ;;  %v484_v43 = vrot.slane %v476_v19, 1  ;;  %v437_v45 = vrot.slane %v429_v28, 1  ;;  %v406_v49 = vmul.f32 %v723_v20, %v342_v34 }
  0x23   : > { %v467_v30 = vadd.f32 %v463_v2, %v455_v18  ;;  %v456_v42 = vadd.f32 %v452_v12, %v444_v33  ;;  %v409_v44 = vadd.f32 %v405_v27, %v397_v7  ;;  %v430_v50 = vmul.f32 %v718_v13, %v342_v34 }
  0x24   : > { %v390_v48 = vrot.slane %v382_v39, 1  ;;  %v453_v9 = vmul.f32 %v743_v40, %v323_v63  ;;  %v477_v53 = vmul.f32 %v740_v38, %v323_v63  ;;  %v324_v56 = vunpack.c.l.bf16 %v319_v46 }
  0x25   : > { %v491_v35 = vadd.f32 %v483_v10, %v467_v30  ;;  %v468_v51 = vadd.f32 %v464_v31, %v456_v42  ;;  %v421_v52 = vadd.f32 %v417_v8, %v409_v44  ;;  %v418_v20 = vmul.f32 %v725_v23, %v350_v37 }
  0x26   : > { %v398_v57 = vadd.f32 %v390_v48, %v374_v36  ;;  %v465_v59 = vmul.f32 %v745_v41, %v333_v0  ;;  %v334_v60 = vunpack.c.l.bf16 %v329_v54  ;;  %v438_v62 = vrot.slane %v430_v50, 1 }
  0x27   : > { %v502_v47 = vadd.f32 %v616_v32, %v491_v35  ;;  %v492_v58 = vadd.f32 %v484_v43, %v468_v51  ;;  %v445_v13 = vadd.f32 %v437_v45, %v421_v52  ;;  %v485_v3 = vrot.slane %v477_v53, 1 }
  0x28   : > { %v410_v61 = vadd.f32 %v406_v49, %v398_v57  ;;  %v454_v4 = vmul.f32 %v743_v40, %v324_v56  ;;  %v478_v5 = vmul.f32 %v740_v38, %v324_v56  ;;  %v466_v11 = vmul.f32 %v745_v41, %v334_v60 }
  0x29   : > { %v506_v55 = vpack.c.bf16 %v502_v47, %v502_v47  ;;  %v503_v1 = vadd.f32 %v616_v32, %v492_v58  ;;  %v457_v2 = vadd.f32 %v453_v9, %v445_v13 }
  0x2a   : > { %v422_v63 = vadd.f32 %v418_v20, %v410_v61  ;;  %v486_v14 = vrot.slane %v478_v5, 1 }
  0x2b   : > { %510 = vst [vmem:[%s786_s22] sm:$0x3] %v506_v55  ;;  %v507_v23 = vpack.c.bf16 %v503_v1, %v503_v1  ;;  %v469_v6 = vadd.f32 %v465_v59, %v457_v2 }
  0x2c   : > { %v446_v10 = vadd.f32 %v438_v62, %v422_v63 }
  0x2d   : > { %511 = vst [vmem:[%s786_s22 + $0x2] sm:$0x3] %v507_v23  ;;  %v493_v0 = vadd.f32 %v485_v3, %v469_v6 }
  0x2e   : > { %v458_v12 = vadd.f32 %v454_v4, %v446_v10 }
  0x2f   : > { %v504_v16 = vadd.f32 %v616_v32, %v493_v0 }
  0x30   : > { %v470_v15 = vadd.f32 %v466_v11, %v458_v12 }
  0x31   : > { %v508_v17 = vpack.c.bf16 %v504_v16, %v504_v16 }
  0x32   : > { %v494_v18 = vadd.f32 %v486_v14, %v470_v15 }
  0x33   : > { %512 = vst [vmem:[%s786_s22 + $0x4] sm:$0x3] %v508_v17 }
  0x34   : > { %v505_v19 = vadd.f32 %v616_v32, %v494_v18 }
  0x36   : > { %v509_v21 = vpack.c.bf16 %v505_v19, %v505_v19 }
  0x38   : > { %513 = vst [vmem:[%s786_s22 + $0x6] sm:$0x3] %v509_v21 }
  0x39 PF: > { %s16_s21 = sadd.s32 1, %s635_s21  }
  0x3a   : > { %p13_p4 = scmp.ge.s32.totalorder %s16_s21, 4  }
  0x3c   :  { %15 = sbr.rel (!%p13_p4) target bundleno = 1 (0x1), region = 83 }

// kernel: network_forward.20
= control target key start
LH: loop header
LB: loop body
LE: loop exit
PB: predicated region body
PF: predicated region fallthrough
CT: control target
= control target key end

     0   :  { %s676_s21 = smov 0   ;;  %s807_s0 = inlined_call_operand.vmem [shape: bf16[2,5,5,128], index: 0, kind: input, shape index: {}]   ;;  %s808_s1 = inlined_call_operand.vmem [shape: bf16[2,5,5,128], index: 1, kind: input, shape index: {}]   ;;  %s809_s2 = inlined_call_operand.vmem [shape: bf16[2,5,5,128], index: 2, kind: input, shape index: {}]   ;;  %s810_s3 = inlined_call_operand.vmem [shape: bf16[2,5,5,128], index: 3, kind: input, shape index: {}]   ;;  %s811_s4 = inlined_call_operand.vmem [shape: f32[3,3,128], index: 4, kind: input, shape index: {}]   ;;  %s812_s5 = inlined_call_operand.vmem [shape: f32[1,128], index: 5, kind: input, shape index: {}]   ;;  %s813_s6 = inlined_call_operand.vmem [shape: bf16[2,4,4,128], index: 6, kind: output, shape index: {}]  }
   0x1 LB: > { %s609_s22 = sadd.s32 4294967295, %s639_s21   ;;  %p613_p0 = scmp.ge.s32.totalorder %s639_s21, 1  ;;  %s639_s21 = sphi %s676_s21, %s16_s21  }
   0x2   : > { %p242_p1 = scmp.lt.s32.totalorder %s639_s21, 3 }
   0x4   : > { %p243_p2 = pnand %p613_p0, %p242_p1 }
   0x5   : > { %p287_p3 = scmp.lt.s32.totalorder (!%p243_p2), %s609_s22, 1  ;;  %v351_v0 = vlaneseq (!%p243_p2)  ;;  %v312_v2 = vld [vmem:[%s811_s4] sm:$0x7] (!%p243_p2)  ;;  %v313_v6 = vld [vmem:[%s811_s4 + $0x4] sm:$0x7] (!%p243_p2) }
   0x6   : > { %246 = sbr.rel (%p243_p2) target bundleno = 59 (0x3b), region = 44  ;;  %v314_v24 = vld [vmem:[%s811_s4 + $0x8] sm:$0x7] (!%p243_p2) }
   0x7   : > { %v352_v1 = vshrl.u32 (!%p243_p2), %v351_v0, 7 }
   0x9   : > { %v353_v3 = vsub.s32 (!%p243_p2), 0, %v352_v1  ;;  %v365_v4 = vsub.s32 (!%p243_p2), 1, %v352_v1  ;;  %v377_v5 = vsub.s32 (!%p243_p2), 2, %v352_v1 }
   0xb   : > { %v703_v7 = vrot.slane (!%p243_p2), %v312_v2, %v353_v3  ;;  %v705_v8 = vrot.slane (!%p243_p2), %v312_v2, %v365_v4  ;;  %v707_v9 = vrot.slane (!%p243_p2), %v312_v2, %v377_v5  ;;  %v722_v13 = vrot.slane (!%p243_p2), %v313_v6, %v377_v5 }
   0xc   : > { %v727_v20 = vrot.slane (!%p243_p2), %v313_v6, %v353_v3  ;;  %v729_v23 = vrot.slane (!%p243_p2), %v313_v6, %v365_v4  ;;  %v744_v38 = vrot.slane (!%p243_p2), %v314_v24, %v377_v5  ;;  %v747_v40 = vrot.slane (!%p243_p2), %v314_v24, %v353_v3 }
   0xd   : > { %s815_s22 = smov (!%p287_p3, %s609_s22), 1  ;;  %v749_v41 = vrot.slane %v314_v24, %v365_v4 }
   0xe   : > { %s624_s25 = smul.u32 20, %s815_s22  ;;  %s623_s20 = sshll.u32 %s815_s22, 3 }
   0xf   : > { %s794_s24 = scalar_lea.vmem %s813_s6, %s623_s20 }
  0x10   : > { %s696_s30 = scalar_lea.vmem %s807_s0, %s624_s25  ;;  %s701_s9 = scalar_lea.vmem %s808_s1, %s624_s25 }
  0x11   : > { %s712_s12 = scalar_lea.vmem %s809_s2, %s624_s25  ;;  %s717_s15 = scalar_lea.vmem %s810_s3, %s624_s25  ;;  %v315_v10 = vld [vmem:[%s696_s30] sm:$0x7]  ;;  %v316_v11 = vld [vmem:[%s696_s30 + $0x4] sm:$0x7]  ;;  %v317_v29 = vld [vmem:[%s696_s30 + $0x8] sm:$0x7] }
  0x12   : > { %v325_v12 = vld [vmem:[%s701_s9] sm:$0x7]  ;;  %v320_v14 = vunpack.c.l.bf16 %v315_v10  ;;  %v321_v15 = vunpack.c.l.bf16 %v316_v11  ;;  %v326_v16 = vld [vmem:[%s701_s9 + $0x4] sm:$0x7]  ;;  %v327_v33 = vld [vmem:[%s701_s9 + $0x8] sm:$0x7]  ;;  %v322_v42 = vunpack.c.l.bf16 %v317_v29 }
  0x13   : > { %v330_v17 = vunpack.c.l.bf16 %v325_v12  ;;  %v335_v18 = vld [vmem:[%s712_s12] sm:$0x7]  ;;  %v331_v21 = vunpack.c.l.bf16 %v326_v16  ;;  %v336_v34 = vld [vmem:[%s712_s12 + $0x4] sm:$0x7]  ;;  %v332_v45 = vunpack.c.l.bf16 %v327_v33  ;;  %v318_v51 = vld [vmem:[%s696_s30 + $0xc] sm:$0x7] }
  0x14   : > { %v343_v19 = vld [vmem:[%s717_s15] sm:$0x7]  ;;  %v339_v22 = vunpack.c.l.bf16 %v335_v18  ;;  %v355_v26 = vmul.f32 %v703_v7, %v320_v14  ;;  %v379_v28 = vmul.f32 %v707_v9, %v320_v14  ;;  %v356_v30 = vmul.f32 %v703_v7, %v321_v15  ;;  %v344_v39 = vld [vmem:[%s717_s15 + $0x4] sm:$0x7]  ;;  %v755_v52 = vld [vmem:[%s701_s9 + $0xc] sm:$0x7] }
  0x15   : > { %v347_v25 = vunpack.c.l.bf16 %v343_v19  ;;  %v367_v27 = vmul.f32 %v705_v8, %v330_v17  ;;  %v368_v31 = vmul.f32 %v705_v8, %v331_v21  ;;  %v340_v46 = vunpack.c.l.bf16 %v336_v34  ;;  %v337_v57 = vld [vmem:[%s712_s12 + $0x8] sm:$0x7]  ;;  %v338_v24 = vld [vmem:[%s712_s12 + $0xc] sm:$0x7] }
  0x16   : > { %v427_v32 = vmul.f32 %v722_v13, %v339_v22  ;;  %v387_v36 = vrot.slane %v379_v28, 1  ;;  %v403_v37 = vmul.f32 %v727_v20, %v339_v22  ;;  %v348_v49 = vunpack.c.l.bf16 %v344_v39  ;;  %v345_v1 = vld [vmem:[%s717_s15 + $0x8] sm:$0x7]  ;;  %v346_v29 = vld [vmem:[%s717_s15 + $0xc] sm:$0x7] }
  0x17   : > { %v371_v35 = vadd.f32 %v367_v27, %v355_v26  ;;  %v415_v44 = vmul.f32 %v729_v23, %v347_v25  ;;  %v372_v47 = vadd.f32 %v368_v31, %v356_v30  ;;  %v380_v50 = vmul.f32 %v707_v9, %v321_v15 }
  0x18   : > { %v435_v48 = vrot.slane %v427_v32, 1  ;;  %v475_v54 = vmul.f32 %v744_v38, %v321_v15  ;;  %v357_v55 = vmul.f32 %v703_v7, %v322_v42  ;;  %v369_v56 = vmul.f32 %v705_v8, %v332_v45  ;;  %v620_v32 = vld [vmem:[%s812_s5] ss:$0 sm:$0xff] }
  0x19   : > { %v395_v43 = vadd.f32 %v387_v36, %v371_v35  ;;  %v388_v58 = vrot.slane %v380_v50, 1  ;;  %v404_v59 = vmul.f32 %v727_v20, %v340_v46  ;;  %v428_v60 = vmul.f32 %v722_v13, %v340_v46 }
  0x1a   : > { %v451_v62 = vmul.f32 %v747_v40, %v321_v15  ;;  %v323_v63 = vunpack.c.l.bf16 %v318_v51  ;;  %v333_v0 = vunpack.c.l.bf16 %v755_v52  ;;  %v463_v2 = vmul.f32 %v749_v41, %v331_v21 }
  0x1b   : > { %v407_v53 = vadd.f32 %v403_v37, %v395_v43  ;;  %v396_v3 = vadd.f32 %v388_v58, %v372_v47  ;;  %v416_v4 = vmul.f32 %v729_v23, %v348_v49  ;;  %v341_v5 = vunpack.c.l.bf16 %v337_v57 }
  0x1c   : > { %v483_v10 = vrot.slane %v475_v54, 1  ;;  %v373_v11 = vadd.f32 %v369_v56, %v357_v55  ;;  %v452_v12 = vmul.f32 %v747_v40, %v322_v42  ;;  %v436_v16 = vrot.slane %v428_v60, 1  ;;  %v329_v55 = vld [vmem:[%s701_s9 + $0x10] sm:$0x7] }
  0x1d   : > { %v419_v61 = vadd.f32 %v415_v44, %v407_v53  ;;  %v408_v14 = vadd.f32 %v404_v59, %v396_v3  ;;  %v349_v15 = vunpack.c.l.bf16 %v345_v1  ;;  %v381_v17 = vmul.f32 %v707_v9, %v322_v42 }
  0x1e   : > { %v476_v19 = vmul.f32 %v744_v38, %v322_v42  ;;  %v358_v21 = vmul.f32 %v703_v7, %v323_v63  ;;  %v370_v22 = vmul.f32 %v705_v8, %v333_v0  ;;  %v405_v27 = vmul.f32 %v727_v20, %v341_v5 }
  0x1f   : > { %v443_v6 = vadd.f32 %v435_v48, %v419_v61  ;;  %v420_v25 = vadd.f32 %v416_v4, %v408_v14  ;;  %v389_v26 = vrot.slane %v381_v17, 1  ;;  %v429_v28 = vmul.f32 %v722_v13, %v341_v5 }
  0x20   : > { %v464_v31 = vmul.f32 %v749_v41, %v332_v45  ;;  %v417_v8 = vmul.f32 %v729_v23, %v349_v15  ;;  %v342_v34 = vunpack.c.l.bf16 %v338_v24  ;;  %v374_v36 = vadd.f32 %v370_v22, %v358_v21  ;;  %v319_v45 = vld [vmem:[%s696_s30 + $0x10] sm:$0x7] }
  0x21   : > { %v455_v18 = vadd.f32 %v451_v62, %v443_v6  ;;  %v444_v7 = vadd.f32 %v436_v16, %v420_v25  ;;  %v397_v33 = vadd.f32 %v389_v26, %v373_v11  ;;  %v350_v37 = vunpack.c.l.bf16 %v346_v29 }
  0x22   : > { %v382_v39 = vmul.f32 %v707_v9, %v323_v63  ;;  %v484_v43 = vrot.slane %v476_v19, 1  ;;  %v437_v46 = vrot.slane %v429_v28, 1  ;;  %v406_v49 = vmul.f32 %v727_v20, %v342_v34 }
  0x23   : > { %v467_v30 = vadd.f32 %v463_v2, %v455_v18  ;;  %v456_v42 = vadd.f32 %v452_v12, %v444_v7  ;;  %v409_v44 = vadd.f32 %v405_v27, %v397_v33  ;;  %v430_v50 = vmul.f32 %v722_v13, %v342_v34 }
  0x24   : > { %v390_v48 = vrot.slane %v382_v39, 1  ;;  %v453_v53 = vmul.f32 %v747_v40, %v323_v63  ;;  %v477_v54 = vmul.f32 %v744_v38, %v323_v63  ;;  %v324_v56 = vunpack.c.l.bf16 %v319_v45 }
  0x25   : > { %v491_v35 = vadd.f32 %v483_v10, %v467_v30  ;;  %v468_v51 = vadd.f32 %v464_v31, %v456_v42  ;;  %v421_v52 = vadd.f32 %v417_v8, %v409_v44  ;;  %v418_v58 = vmul.f32 %v729_v23, %v350_v37 }
  0x26   : > { %v398_v57 = vadd.f32 %v390_v48, %v374_v36  ;;  %v465_v59 = vmul.f32 %v749_v41, %v333_v0  ;;  %v334_v61 = vunpack.c.l.bf16 %v329_v55  ;;  %v438_v63 = vrot.slane %v430_v50, 1 }
  0x27   : > { %v502_v47 = vadd.f32 %v620_v32, %v491_v35  ;;  %v492_v20 = vadd.f32 %v484_v43, %v468_v51  ;;  %v445_v13 = vadd.f32 %v437_v46, %v421_v52  ;;  %v485_v3 = vrot.slane %v477_v54, 1 }
  0x28   : > { %v410_v62 = vadd.f32 %v406_v49, %v398_v57  ;;  %v454_v4 = vmul.f32 %v747_v40, %v324_v56  ;;  %v478_v5 = vmul.f32 %v744_v38, %v324_v56  ;;  %v466_v0 = vmul.f32 %v749_v41, %v334_v61 }
  0x29   : > { %v506_v9 = vmax.f32 %v502_v47, 0.0  ;;  %v503_v1 = vadd.f32 %v620_v32, %v492_v20  ;;  %v457_v2 = vadd.f32 %v453_v53, %v445_v13 }
  0x2a   : > { %v422_v23 = vadd.f32 %v418_v58, %v410_v62  ;;  %v486_v15 = vrot.slane %v478_v5, 1 }
  0x2b   : > { %v510_v60 = vpack.c.bf16 %v506_v9, %v506_v9  ;;  %v507_v6 = vmax.f32 %v503_v1, 0.0  ;;  %v469_v10 = vadd.f32 %v465_v59, %v457_v2 }
  0x2c   : > { %v446_v11 = vadd.f32 %v438_v63, %v422_v23 }
  0x2d   : > { %514 = vst [vmem:[%s794_s24] sm:$0x3] %v510_v60  ;;  %v511_v12 = vpack.c.bf16 %v507_v6, %v507_v6  ;;  %v493_v14 = vadd.f32 %v485_v3, %v469_v10 }
  0x2e   : > { %v458_v16 = vadd.f32 %v454_v4, %v446_v11 }
  0x2f   : > { %515 = vst [vmem:[%s794_s24 + $0x2] sm:$0x3] %v511_v12  ;;  %v504_v17 = vadd.f32 %v620_v32, %v493_v14 }
  0x30   : > { %v470_v18 = vadd.f32 %v466_v0, %v458_v16 }
  0x31   : > { %v508_v19 = vmax.f32 %v504_v17, 0.0 }
  0x32   : > { %v494_v21 = vadd.f32 %v486_v15, %v470_v18 }
  0x33   : > { %v512_v22 = vpack.c.bf16 %v508_v19, %v508_v19 }
  0x34   : > { %v505_v40 = vadd.f32 %v620_v32, %v494_v21 }
  0x35   : > { %516 = vst [vmem:[%s794_s24 + $0x4] sm:$0x3] %v512_v22 }
  0x36   : > { %v509_v38 = vmax.f32 %v505_v40, 0.0 }
  0x38   : > { %v513_v24 = vpack.c.bf16 %v509_v38, %v509_v38 }
  0x3a   : > { %517 = vst [vmem:[%s794_s24 + $0x6] sm:$0x3] %v513_v24 }
  0x3b PF: > { %s16_s21 = sadd.s32 1, %s639_s21  }
  0x3c   : > { %p13_p4 = scmp.ge.s32.totalorder %s16_s21, 4  }
  0x3e   :  { %15 = sbr.rel (!%p13_p4) target bundleno = 1 (0x1), region = 83 }

// kernel: network_forward.22
= control target key start
LH: loop header
LB: loop body
LE: loop exit
PB: predicated region body
PF: predicated region fallthrough
CT: control target
= control target key end

     0   :  { %s343_s1 = inlined_call_operand.vmem [shape: bf16[128,128], index: 1, kind: input, shape index: {}]   ;;  %s344_s0 = inlined_call_operand.vmem [shape: bf16[32,128], index: 0, kind: input, shape index: {}]   ;;  %s345_s3 = inlined_call_operand.vmem [shape: bf16[32,128], index: 3, kind: input, shape index: {}]   ;;  %s346_s2 = inlined_call_operand.vmem [shape: f32[1,128], index: 2, kind: input, shape index: {}]   ;;  %s347_s4 = inlined_call_operand.vmem [shape: bf16[32,128], index: 4, kind: output, shape index: {}]  }
   0x1   :  { %v263_v0 = vld [vmem:[%s343_s1] sm:$0xff]   ;;  %v264_v1 = vld [vmem:[%s343_s1 + $0x8] sm:$0xff]   ;;  %v265_v2 = vld [vmem:[%s343_s1 + $0x10] sm:$0xff]  }
   0x2   :  { %243 = vmatprep.subr.bf16.mxu0 %v263_v0  ;;  %v266_v3 = vld [vmem:[%s343_s1 + $0x18] sm:$0xff]   ;;  %v271_v4 = vld [vmem:[%s344_s0] sm:$0xff]   ;;  %v268_v6 = vld [vmem:[%s343_s1 + $0x28] sm:$0xff]  }
   0x3   :  { %244 = vmatpush3.bf16.msra.mxu0 %v263_v0  ;;  %259 = vmatprep.mubr.bf16.mxu0 %v271_v4  ;;  %v267_v5 = vld [vmem:[%s343_s1 + $0x20] sm:$0xff]   ;;  %v269_v7 = vld [vmem:[%s343_s1 + $0x30] sm:$0xff]   ;;  %v270_v8 = vld [vmem:[%s343_s1 + $0x38] sm:$0xff]  }
   0x4   :  { %245 = vmatprep.subr.bf16.mxu0 %v264_v1  ;;  %v272_v9 = vld [vmem:[%s344_s0 + $0x8] sm:$0xff]   ;;  %v214_v11 = vld [vmem:[%s345_s3] sm:$0xff]  }
   0x5   :  { %v231_v10 = vld [vmem:[%s345_s3 + $0x8] sm:$0xff]   ;;  %v194_v12 = vld [vmem:[%s346_s2] ss:$0 sm:$0xff]  ;;  %v215_v15 = vunpack.c.l.bf16 %v214_v11  ;;  %v216_v21 = vunpack.c.h.bf16 %v214_v11 }
   0x6   :  { %v219_v13 = vunpack.c.l.bf16 %v231_v10  ;;  %v220_v18 = vunpack.c.h.bf16 %v231_v10 }
   0x7   :  { %246 = vmatpush3.bf16.msra.mxu0 %v264_v1 }
   0x8   :  { %247 = vmatprep.subr.bf16.mxu0 %v265_v2 }
   0xb   :  { %248 = vmatpush3.bf16.msra.mxu0 %v265_v2 }
   0xc   :  { %249 = vmatprep.subr.bf16.mxu0 %v266_v3 }
   0xf   :  { %250 = vmatpush3.bf16.msra.mxu0 %v266_v3 }
  0x10   :  { %251 = vmatprep.subr.bf16.mxu0 %v267_v5 }
  0x13   :  { %252 = vmatpush3.bf16.msra.mxu0 %v267_v5 }
  0x14   :  { %253 = vmatprep.subr.bf16.mxu0 %v268_v6 }
  0x17   :  { %254 = vmatpush3.bf16.msra.mxu0 %v268_v6 }
  0x18   :  { %255 = vmatprep.subr.bf16.mxu0 %v269_v7 }
  0x1b   :  { %256 = vmatpush3.bf16.msra.mxu0 %v269_v7 }
  0x1c   :  { %257 = vmatprep.subr.bf16.mxu0 %v270_v8 }
  0x1f   :  { %258 = vmatpush3.bf16.msra.mxu0 %v270_v8 }
  0x22   :  { %260 = vmatmul.mubr.bf16.vlgmr.msra.gmra.mrb[0].mxu0 %v272_v9 }
  0xf5   :  { %v261_v14 = vpop.f32.mrb[0].mxu0 }
  0xf6   :  { %v148_v16 = vadd.f32 %v261_v14, %v194_v12  ;;  %v139_v17 = vpop.f32.mrb[1].mxu0 }
  0xf7   :  { %v140_v19 = vadd.f32 %v194_v12, %v139_v17  ;;  %v262_v20 = vpop.f32.mrb[2].mxu0 }
  0xf8   :  { %v164_v22 = vadd.f32 %v219_v13, %v148_v16  ;;  %v151_v23 = vadd.f32 %v262_v20, %v194_v12  ;;  %v142_v24 = vpop.f32.mrb[3].mxu0 }
  0xf9   :  { %v162_v25 = vadd.f32 %v215_v15, %v140_v19  ;;  %v143_v26 = vadd.f32 %v194_v12, %v142_v24 }
  0xfa   :  { %v165_v27 = vadd.f32 %v220_v18, %v151_v23  ;;  %v168_v29 = vmax.f32 %v164_v22, 0.0 }
  0xfb   :  { %v163_v28 = vadd.f32 %v216_v21, %v143_v26  ;;  %v166_v31 = vmax.f32 %v162_v25, 0.0 }
  0xfc   :  { %v169_v30 = vmax.f32 %v165_v27, 0.0 }
  0xfd   :  { %v167_v32 = vmax.f32 %v163_v28, 0.0 }
  0xfe   :  { %v229_v33 = vpack.c.bf16 %v169_v30, %v168_v29 }
  0xff   :  { %v224_v34 = vpack.c.bf16 %v167_v32, %v166_v31 }
 0x100   :  { %232 = vst [vmem:[%s347_s4 + $0x8] sm:$0xff] %v229_v33  }
 0x101   :  { %225 = vst [vmem:[%s347_s4] sm:$0xff] %v224_v34  }

// kernel: network_forward.26
= control target key start
LH: loop header
LB: loop body
LE: loop exit
PB: predicated region body
PF: predicated region fallthrough
CT: control target
= control target key end

     0   :  { %s214_s6 = smov 0   ;;  %s225_s0 = inlined_call_operand.vmem [shape: bf16[2,16,128], index: 0, kind: input, shape index: {}]   ;;  %s226_s1 = inlined_call_operand.vmem [shape: f32[2,1,128], index: 1, kind: output, shape index: {}]  }
   0x1 LB: > { %s174_s7 = sadd.s32 4294967295, %s202_s6   ;;  %p178_p0 = scmp.ge.s32.totalorder %s202_s6, 1  ;;  %s202_s6 = sphi %s214_s6, %s11_s6  }
   0x2   : > { %p87_p1 = scmp.lt.s32.totalorder %s202_s6, 3 }
   0x4   : > { %p88_p2 = pnand %p178_p0, %p87_p1 }
   0x5   : > { %p105_p3 = scmp.lt.s32.totalorder (!%p88_p2), %s174_s7, 1 }
   0x6   : > { %91 = sbr.rel (%p88_p2) target bundleno = 36 (0x24), region = 24 }
   0xd   : > { %s228_s7 = smov (!%p105_p3, %s174_s7), 1 }
   0xe   : > { %s183_s8 = sshll.u32 %s228_s7, 3  ;;  %s112_s14 = scalar_lea.vmem %s226_s1, %s228_s7 }
   0xf   : > { %s109_s11 = scalar_lea.vmem %s225_s0, %s183_s8 }
  0x10   : > { %v185_v0 = vld [vmem:[%s109_s11] sm:$0xff]  }
  0x11   : > { %v186_v1 = vunpack.c.l.bf16 %v185_v0  ;;  %v187_v2 = vunpack.c.h.bf16 %v185_v0 }
  0x13   : > { %v117_v3 = vadd.f32 %v187_v2, %v186_v1 }
  0x15   : > { %v118_v4 = vrot.slane %v117_v3, 4 }
  0x17   : > { %v119_v5 = vadd.f32 %v118_v4, %v117_v3 }
  0x19   : > { %v120_v6 = vrot.slane %v119_v5, 2 }
  0x1b   : > { %v121_v7 = vadd.f32 %v120_v6, %v119_v5 }
  0x1d   : > { %v122_v8 = vrot.slane %v121_v7, 1 }
  0x1f   : > { %v123_v9 = vadd.f32 %v122_v8, %v121_v7 }
  0x21   : > { %v125_v10 = vmul.f32 0.0625, %v123_v9 }
  0x23   : > { %126 = vst [vmem:[%s112_s14] sm:$0x1] %v125_v10 }
  0x24 PF: > { %s11_s6 = sadd.s32 1, %s202_s6  }
  0x25   : > { %p8_p4 = scmp.ge.s32.totalorder %s11_s6, 4  }
  0x27   :  { %10 = sbr.rel (!%p8_p4) target bundleno = 1 (0x1), region = 54 }

// kernel: network_forward.23
= control target key start
LH: loop header
LB: loop body
LE: loop exit
PB: predicated region body
PF: predicated region fallthrough
CT: control target
= control target key end

     0   :  { %s308_s1 = inlined_call_operand.vmem [shape: bf16[128,128], index: 1, kind: input, shape index: {}]   ;;  %s309_s0 = inlined_call_operand.vmem [shape: bf16[32,128], index: 0, kind: input, shape index: {}]   ;;  %s310_s2 = inlined_call_operand.vmem [shape: f32[1,128], index: 2, kind: input, shape index: {}]   ;;  %s311_s3 = inlined_call_operand.vmem [shape: bf16[32,128], index: 3, kind: output, shape index: {}]  }
   0x1   :  { %v239_v0 = vld [vmem:[%s308_s1] sm:$0xff]   ;;  %v240_v1 = vld [vmem:[%s308_s1 + $0x8] sm:$0xff]   ;;  %v241_v2 = vld [vmem:[%s308_s1 + $0x10] sm:$0xff]  }
   0x2   :  { %219 = vmatprep.subr.bf16.mxu0 %v239_v0  ;;  %v242_v3 = vld [vmem:[%s308_s1 + $0x18] sm:$0xff]   ;;  %v247_v4 = vld [vmem:[%s309_s0] sm:$0xff]   ;;  %v244_v6 = vld [vmem:[%s308_s1 + $0x28] sm:$0xff]  }
   0x3   :  { %220 = vmatpush3.bf16.msra.mxu0 %v239_v0  ;;  %235 = vmatprep.mubr.bf16.mxu0 %v247_v4  ;;  %v243_v5 = vld [vmem:[%s308_s1 + $0x20] sm:$0xff]   ;;  %v245_v7 = vld [vmem:[%s308_s1 + $0x30] sm:$0xff]   ;;  %v246_v8 = vld [vmem:[%s308_s1 + $0x38] sm:$0xff]  }
   0x4   :  { %221 = vmatprep.subr.bf16.mxu0 %v240_v1  ;;  %v248_v9 = vld [vmem:[%s309_s0 + $0x8] sm:$0xff]   ;;  %v179_v10 = vld [vmem:[%s310_s2] ss:$0 sm:$0xff] }
   0x7   :  { %222 = vmatpush3.bf16.msra.mxu0 %v240_v1 }
   0x8   :  { %223 = vmatprep.subr.bf16.mxu0 %v241_v2 }
   0xb   :  { %224 = vmatpush3.bf16.msra.mxu0 %v241_v2 }
   0xc   :  { %225 = vmatprep.subr.bf16.mxu0 %v242_v3 }
   0xf   :  { %226 = vmatpush3.bf16.msra.mxu0 %v242_v3 }
  0x10   :  { %227 = vmatprep.subr.bf16.mxu0 %v243_v5 }
  0x13   :  { %228 = vmatpush3.bf16.msra.mxu0 %v243_v5 }
  0x14   :  { %229 = vmatprep.subr.bf16.mxu0 %v244_v6 }
  0x17   :  { %230 = vmatpush3.bf16.msra.mxu0 %v244_v6 }
  0x18   :  { %231 = vmatprep.subr.bf16.mxu0 %v245_v7 }
  0x1b   :  { %232 = vmatpush3.bf16.msra.mxu0 %v245_v7 }
  0x1c   :  { %233 = vmatprep.subr.bf16.mxu0 %v246_v8 }
  0x1f   :  { %234 = vmatpush3.bf16.msra.mxu0 %v246_v8 }
  0x22   :  { %236 = vmatmul.mubr.bf16.vlgmr.msra.gmra.mrb[0].mxu0 %v248_v9 }
  0xf5   :  { %v237_v11 = vpop.f32.mrb[0].mxu0 }
  0xf6   :  { %v145_v12 = vadd.f32 %v237_v11, %v179_v10  ;;  %v136_v13 = vpop.f32.mrb[1].mxu0 }
  0xf7   :  { %v137_v14 = vadd.f32 %v179_v10, %v136_v13  ;;  %v238_v15 = vpop.f32.mrb[2].mxu0 }
  0xf8   :  { %v148_v16 = vadd.f32 %v238_v15, %v179_v10  ;;  %v139_v17 = vpop.f32.mrb[3].mxu0  ;;  %v153_v19 = vmax.f32 %v145_v12, 0.0 }
  0xf9   :  { %v140_v18 = vadd.f32 %v179_v10, %v139_v17  ;;  %v151_v21 = vmax.f32 %v137_v14, 0.0 }
  0xfa   :  { %v154_v20 = vmax.f32 %v148_v16, 0.0 }
  0xfb   :  { %v152_v22 = vmax.f32 %v140_v18, 0.0 }
  0xfc   :  { %v206_v23 = vpack.c.bf16 %v154_v20, %v153_v19 }
  0xfd   :  { %v201_v24 = vpack.c.bf16 %v152_v22, %v151_v21 }
  0xfe   :  { %208 = vst [vmem:[%s311_s3 + $0x8] sm:$0xff] %v206_v23  }
  0xff   :  { %202 = vst [vmem:[%s311_s3] sm:$0xff] %v201_v24  }

// kernel: network_forward.27
= control target key start
LH: loop header
LB: loop body
LE: loop exit
PB: predicated region body
PF: predicated region fallthrough
CT: control target
= control target key end

     0   :  { %v180_v0 = vmov 0.0   ;;  %vm181_vm0 = vmmov 0   ;;  %s235_s1 = inlined_call_operand.vmem [shape: bf16[128,128], index: 1, kind: input, shape index: {}]   ;;  %s236_s0 = inlined_call_operand.vmem [shape: bf16[8,128], index: 0, kind: input, shape index: {}]   ;;  %s237_s2 = inlined_call_operand.vmem [shape: f32[1,128], index: 2, kind: input, shape index: {}]   ;;  %s238_s3 = inlined_call_operand.vmem [shape: f32[8,128], index: 3, kind: output, shape index: {}]  }
   0x1   :  { %150 = vmatprep.subr.bf16.mxu0 %v180_v0  ;;  %v172_v1 = vld [vmem:[%s235_s1] sm:$0xff]   ;;  %166 = vmatprep.mubr.msk.bf16.mxu0 %vm181_vm0, %v180_v0  ;;  %v173_v2 = vld [vmem:[%s235_s1 + $0x8] sm:$0xff]   ;;  %v174_v3 = vld [vmem:[%s235_s1 + $0x10] sm:$0xff]  }
   0x2   :  { %151 = vmatpush3.bf16.msra.mxu0 %v172_v1  ;;  %v175_v4 = vld [vmem:[%s235_s1 + $0x18] sm:$0xff]   ;;  %v176_v5 = vld [vmem:[%s235_s1 + $0x20] sm:$0xff]   ;;  %v177_v6 = vld [vmem:[%s235_s1 + $0x28] sm:$0xff]  }
   0x3   :  { %152 = vmatprep.subr.bf16.mxu0 %v180_v0  ;;  %v178_v7 = vld [vmem:[%s235_s1 + $0x30] sm:$0xff]   ;;  %v179_v8 = vld [vmem:[%s235_s1 + $0x38] sm:$0xff]   ;;  %v15_v9 = vld [vmem:[%s236_s0] sm:$0xf] }
   0x4   :  { %v132_v10 = vld [vmem:[%s237_s2] ss:$0 sm:$0xff] }
   0x6   :  { %153 = vmatpush3.bf16.msra.mxu0 %v173_v2 }
   0x7   :  { %154 = vmatprep.subr.bf16.mxu0 %v180_v0 }
   0xa   :  { %155 = vmatpush3.bf16.msra.mxu0 %v174_v3 }
   0xb   :  { %156 = vmatprep.subr.bf16.mxu0 %v180_v0 }
   0xe   :  { %157 = vmatpush3.bf16.msra.mxu0 %v175_v4 }
   0xf   :  { %158 = vmatprep.subr.bf16.mxu0 %v180_v0 }
  0x12   :  { %159 = vmatpush3.bf16.msra.mxu0 %v176_v5 }
  0x13   :  { %160 = vmatprep.subr.bf16.mxu0 %v180_v0 }
  0x16   :  { %161 = vmatpush3.bf16.msra.mxu0 %v177_v6 }
  0x17   :  { %162 = vmatprep.subr.bf16.mxu0 %v180_v0 }
  0x1a   :  { %163 = vmatpush3.bf16.msra.mxu0 %v178_v7 }
  0x1b   :  { %164 = vmatprep.subr.bf16.mxu0 %v180_v0 }
  0x1e   :  { %165 = vmatpush3.bf16.msra.mxu0 %v179_v8 }
  0x21   :  { %167 = vmatmul.mubr.bf16.vlgmr.msra.gmra.mrb[0].mxu0 %v15_v9 }
  0xf4   :  { %v121_v11 = vpop.f32.mrb[0].mxu0 }
  0xf5   :  { %v122_v12 = vadd.f32 %v132_v10, %v121_v11  ;;  %v168_v13 = vpop.f32.mrb[1].mxu0 }
  0xf6   :  { %v124_v14 = vpop.f32.mrb[2].mxu0 }
  0xf7   :  { %127 = vst [vmem:[%s238_s3] sm:$0xff] %v122_v12  ;;  %v169_v15 = vpop.f32.mrb[3].mxu0 }

// kernel: network_forward.24
= control target key start
LH: loop header
LB: loop body
LE: loop exit
PB: predicated region body
PF: predicated region fallthrough
CT: control target
= control target key end

     0   :  { %s539_s12 = smov 0   ;;  %s541_s13 = smov 0   ;;  %s603_s0 = inlined_call_operand.vmem [shape: bf16[2,4,4,128], index: 0, kind: input, shape index: {}]   ;;  %s604_s1 = inlined_call_operand.vmem [shape: f32[3,3,128], index: 1, kind: input, shape index: {}]   ;;  %s605_s2 = inlined_call_operand.vmem [shape: f32[1,128], index: 2, kind: input, shape index: {}]   ;;  %s606_s3 = inlined_call_operand.vmem [shape: bf16[2,4,4,128], index: 3, kind: output, shape index: {}]  }
   0x1   :  { %s543_s14 = smov 0  }
   0x2 LB: > { %s25_s15 = sadd.s32 1, %s512_s13  ;;  %p459_p0 = scmp.ge.s32.totalorder %s516_s14, 1  ;;  %s516_s14 = sphi %s543_s14, %s13_s14   ;;  %s512_s13 = sphi %s541_s13, %s608_s13   ;;  %s508_s12 = sphi %s539_s12, %s607_s12  }
   0x3   : > { %p27_p1 = scmp.ge.s32.totalorder %s25_s15, 2  ;;  %p151_p2 = scmp.lt.s32.totalorder %s516_s14, 3 }
   0x5   : > { %s610_s15 = smov (%p27_p1, %s25_s15), 0  ;;  %p152_p3 = pnand %p459_p0, %p151_p2 }
   0x6   : > { %p179_p4 = scmp.lt.s32.totalorder (!%p152_p3), %s508_s12, 1  ;;  %v230_v0 = vlaneseq (!%p152_p3)  ;;  %v518_v1 = vmov (!%p152_p3), 0.0   ;;  %v217_v7 = vld [vmem:[%s604_s1] sm:$0x7] (!%p152_p3)  ;;  %v218_v8 = vld [vmem:[%s604_s1 + $0x4] sm:$0x7] (!%p152_p3) }
   0x7   : > { %155 = sbr.rel (%p152_p3) target bundleno = 57 (0x39), region = 32  ;;  %199 = vst [vmem:[#allocation2 + $0x8] sm:$0x3f] (!%p152_p3), %v518_v1  ;;  %198 = vst [vmem:[#allocation2] sm:$0x3f] (!%p152_p3), %v518_v1 }
   0x8   : > { %200 = vst [vmem:[#allocation2 + $0x10] sm:$0x3f] (!%p152_p3), %v518_v1  ;;  %201 = vst [vmem:[#allocation2 + $0x18] sm:$0x3f] (!%p152_p3), %v518_v1  ;;  %v231_v2 = vshrl.u32 (!%p152_p3), %v230_v0, 7 }
   0x9   : > { %202 = vst [vmem:[#allocation2 + $0x20] sm:$0x3f] (!%p152_p3), %v518_v1  ;;  %203 = vst [vmem:[#allocation2 + $0x28] sm:$0x3f] (!%p152_p3), %v518_v1  ;;  %v219_v10 = vld [vmem:[%s604_s1 + $0x8] sm:$0x7] (!%p152_p3) }
   0xa   : > { %v232_v4 = vsub.s32 (!%p152_p3), 0, %v231_v2  ;;  %v274_v13 = vsub.s32 (!%p152_p3), 1, %v231_v2  ;;  %v316_v18 = vsub.s32 (!%p152_p3), 2, %v231_v2 }
   0xc   : > { %v233_v9 = vrot.slane (!%p152_p3), %v217_v7, %v232_v4  ;;  %v245_v12 = vrot.slane (!%p152_p3), %v218_v8, %v232_v4  ;;  %v257_v15 = vrot.slane (!%p152_p3), %v219_v10, %v232_v4  ;;  %v275_v20 = vrot.slane (!%p152_p3), %v217_v7, %v274_v13 }
   0xd   : > { %v287_v28 = vrot.slane (!%p152_p3), %v218_v8, %v274_v13  ;;  %v299_v30 = vrot.slane (!%p152_p3), %v219_v10, %v274_v13  ;;  %v574_v31 = vrot.slane (!%p152_p3), %v217_v7, %v316_v18  ;;  %v576_v40 = vrot.slane (!%p152_p3), %v218_v8, %v316_v18 }
   0xe   : > { %s612_s12 = smov (!%p179_p4, %s508_s12), 1  ;;  %v224_v11 = vld [vmem:[#allocation2] sm:$0xf]  ;;  %v341_v61 = vrot.slane %v219_v10, %v316_v18 }
   0xf   : > { %s467_s16 = sshll.u32 %s612_s12, 3  ;;  %v234_v14 = vmul.f32 %v233_v9, %v224_v11  ;;  %v266_v22 = vld [vmem:[#allocation2 + $0x1] sm:$0xf] }
  0x10   : > { %s183_s19 = scalar_lea.vmem %s603_s0, %s467_s16  ;;  %v229_v29 = vld [vmem:[#allocation2 + $0x28] sm:$0xf]  ;;  %v276_v37 = vmul.f32 %v275_v20, %v266_v22  ;;  %v308_v46 = vld [vmem:[#allocation2 + $0x2] sm:$0xf]  ;;  %s192_s30 = scalar_lea.vmem %s606_s3, %s467_s16 }
  0x11   : > { %v204_v3 = vld [vmem:[%s183_s19] sm:$0xff]   ;;  %v261_v43 = vmul.f32 %v257_v15, %v229_v29  ;;  %v318_v60 = vmul.f32 %v574_v31, %v308_v46 }
  0x12   : > { %v208_v5 = vunpack.c.l.bf16 %v204_v3  ;;  %v210_v6 = vunpack.c.h.bf16 %v204_v3 }
  0x14   : > { %213 = vst [vmem:[#allocation2 + $0x9] ss:$8 sps:$4 sm:$0xff] %v208_v5   ;;  %215 = vst [vmem:[#allocation2 + $0x19] ss:$8 sps:$4 sm:$0xff] %v210_v6  }
  0x1b   : > { %v225_v16 = vld [vmem:[#allocation2 + $0x8] sm:$0xf]  ;;  %v226_v17 = vld [vmem:[#allocation2 + $0x10] sm:$0xf]  ;;  %v227_v23 = vld [vmem:[#allocation2 + $0x18] sm:$0xf] }
  0x1c   : > { %v246_v19 = vmul.f32 %v245_v12, %v225_v16  ;;  %v235_v21 = vmul.f32 %v233_v9, %v225_v16  ;;  %v247_v24 = vmul.f32 %v245_v12, %v226_v17  ;;  %v258_v26 = vmul.f32 %v257_v15, %v226_v17  ;;  %v267_v27 = vld [vmem:[#allocation2 + $0x9] sm:$0xf]  ;;  %v228_v34 = vld [vmem:[#allocation2 + $0x20] sm:$0xf]  ;;  %v268_v36 = vld [vmem:[#allocation2 + $0x11] sm:$0xf] }
  0x1d   : > { %v259_v33 = vmul.f32 %v257_v15, %v227_v23  ;;  %v236_v38 = vmul.f32 %v233_v9, %v226_v17  ;;  %v248_v39 = vmul.f32 %v245_v12, %v227_v23  ;;  %v277_v42 = vmul.f32 %v275_v20, %v267_v27  ;;  %v269_v47 = vld [vmem:[#allocation2 + $0x19] sm:$0xf]  ;;  %v309_v55 = vld [vmem:[#allocation2 + $0xa] sm:$0xf]  ;;  %v270_v57 = vld [vmem:[#allocation2 + $0x21] sm:$0xf] }
  0x1e   : > { %v250_v25 = vadd.f32 %v246_v19, %v234_v14  ;;  %v251_v32 = vadd.f32 %v247_v24, %v235_v21  ;;  %v288_v45 = vmul.f32 %v287_v28, %v267_v27  ;;  %v260_v49 = vmul.f32 %v257_v15, %v228_v34  ;;  %v310_v1 = vld [vmem:[#allocation2 + $0x12] sm:$0xf]  ;;  %v311_v11 = vld [vmem:[#allocation2 + $0x1a] sm:$0xf]  ;;  %v271_v14 = vld [vmem:[#allocation2 + $0x29] sm:$0xf] }
  0x1f   : > { %v252_v48 = vadd.f32 %v248_v39, %v236_v38  ;;  %v300_v50 = vmul.f32 %v299_v30, %v268_v36  ;;  %v289_v52 = vmul.f32 %v287_v28, %v268_v36  ;;  %v237_v53 = vmul.f32 %v233_v9, %v227_v23  ;;  %v312_v22 = vld [vmem:[#allocation2 + $0x22] sm:$0xf] }
  0x20   : > { %v262_v35 = vadd.f32 %v258_v26, %v250_v25  ;;  %v263_v41 = vadd.f32 %v259_v33, %v251_v32  ;;  %v278_v58 = vmul.f32 %v275_v20, %v268_v36  ;;  %v249_v59 = vmul.f32 %v245_v12, %v228_v34  ;;  %v464_v25 = vld [vmem:[%s605_s2] ss:$0 sm:$0xff] }
  0x21   : > { %v264_v56 = vadd.f32 %v260_v49, %v252_v48  ;;  %v301_v63 = vmul.f32 %v299_v30, %v269_v47  ;;  %v290_v3 = vmul.f32 %v287_v28, %v269_v47  ;;  %v330_v5 = vmul.f32 %v576_v40, %v309_v55 }
  0x22   : > { %v280_v44 = vadd.f32 %v276_v37, %v262_v35  ;;  %v281_v51 = vadd.f32 %v277_v42, %v263_v41  ;;  %v253_v4 = vadd.f32 %v249_v59, %v237_v53  ;;  %v319_v7 = vmul.f32 %v574_v31, %v309_v55  ;;  %v313_v42 = vld [vmem:[#allocation2 + $0x2a] sm:$0xf] }
  0x23   : > { %v282_v2 = vadd.f32 %v278_v58, %v264_v56  ;;  %v302_v8 = vmul.f32 %v299_v30, %v270_v57  ;;  %v279_v15 = vmul.f32 %v275_v20, %v269_v47  ;;  %v342_v10 = vmul.f32 %v341_v61, %v310_v1 }
  0x24   : > { %v292_v54 = vadd.f32 %v288_v45, %v280_v44  ;;  %v293_v62 = vadd.f32 %v289_v52, %v281_v51  ;;  %v265_v12 = vadd.f32 %v261_v43, %v253_v4  ;;  %v331_v17 = vmul.f32 %v576_v40, %v310_v1 }
  0x25   : > { %v294_v13 = vadd.f32 %v290_v3, %v282_v2  ;;  %v320_v18 = vmul.f32 %v574_v31, %v310_v1  ;;  %v291_v24 = vmul.f32 %v287_v28, %v270_v57  ;;  %v343_v27 = vmul.f32 %v341_v61, %v311_v11 }
  0x26   : > { %v304_v0 = vadd.f32 %v300_v50, %v292_v54  ;;  %v305_v6 = vadd.f32 %v301_v63, %v293_v62  ;;  %v283_v23 = vadd.f32 %v279_v15, %v265_v12  ;;  %v303_v29 = vmul.f32 %v299_v30, %v271_v14 }
  0x27   : > { %v306_v21 = vadd.f32 %v302_v8, %v294_v13  ;;  %v332_v33 = vmul.f32 %v576_v40, %v311_v11  ;;  %v344_v36 = vmul.f32 %v341_v61, %v312_v22  ;;  %v321_v28 = vmul.f32 %v574_v31, %v311_v11 }
  0x28   : > { %v322_v9 = vadd.f32 %v318_v60, %v304_v0  ;;  %v323_v16 = vadd.f32 %v319_v7, %v305_v6  ;;  %v295_v34 = vadd.f32 %v291_v24, %v283_v23  ;;  %v333_v30 = vmul.f32 %v576_v40, %v312_v22 }
  0x29   : > { %v324_v20 = vadd.f32 %v320_v18, %v306_v21  ;;  %v345_v50 = vmul.f32 %v341_v61, %v313_v42 }
  0x2a   : > { %v334_v19 = vadd.f32 %v330_v5, %v322_v9  ;;  %v335_v26 = vadd.f32 %v331_v17, %v323_v16  ;;  %v307_v39 = vadd.f32 %v303_v29, %v295_v34 }
  0x2b   : > { %v336_v38 = vadd.f32 %v332_v33, %v324_v20 }
  0x2c   : > { %v346_v32 = vadd.f32 %v342_v10, %v334_v19  ;;  %v347_v35 = vadd.f32 %v343_v27, %v335_v26  ;;  %v325_v45 = vadd.f32 %v321_v28, %v307_v39 }
  0x2d   : > { %v348_v44 = vadd.f32 %v344_v36, %v336_v38 }
  0x2e   : > { %v356_v37 = vadd.f32 %v464_v25, %v346_v32  ;;  %v357_v41 = vadd.f32 %v464_v25, %v347_v35  ;;  %v337_v49 = vadd.f32 %v333_v30, %v325_v45 }
  0x2f   : > { %v358_v48 = vadd.f32 %v464_v25, %v348_v44 }
  0x30   : > { %v360_v43 = vmax.f32 %v356_v37, 0.0  ;;  %v361_v46 = vmax.f32 %v357_v41, 0.0  ;;  %v349_v52 = vadd.f32 %v345_v50, %v337_v49 }
  0x31   : > { %v362_v31 = vmax.f32 %v358_v48, 0.0 }
  0x32   : > { %v364_v47 = vpack.c.bf16 %v360_v43, %v360_v43  ;;  %v365_v51 = vpack.c.bf16 %v361_v46, %v361_v46  ;;  %v359_v54 = vadd.f32 %v464_v25, %v349_v52 }
  0x33   : > { %v366_v53 = vpack.c.bf16 %v362_v31, %v362_v31 }
  0x34   : > { %368 = vst [vmem:[%s192_s30] sm:$0x3] %v364_v47  ;;  %369 = vst [vmem:[%s192_s30 + $0x2] sm:$0x3] %v365_v51  ;;  %v363_v55 = vmax.f32 %v359_v54, 0.0 }
  0x35   : > { %370 = vst [vmem:[%s192_s30 + $0x4] sm:$0x3] %v366_v53 }
  0x36   : > { %v367_v40 = vpack.c.bf16 %v363_v55, %v363_v55 }
  0x38   : > { %371 = vst [vmem:[%s192_s30 + $0x6] sm:$0x3] %v367_v40 }
  0x39 PF: > { %s13_s14 = sadd.s32 1, %s516_s14   ;;  %s607_s12 = smov %s512_s13 }
  0x3a   : > { %p10_p5 = scmp.ge.s32.totalorder %s13_s14, 4   ;;  %s608_s13 = smov %s610_s15 }
  0x3c   :  { %12 = sbr.rel (!%p10_p5) target bundleno = 2 (0x2), region = 68 }

</bundles_post_ra>
